<compile_context>
chip_gen: v7x
topology: tpu7x:2x2x1
jax: 0.10.0
libtpu: 0.0.40
codegen_flags: <defaults>
</compile_context>

<pallas_src>
import jax
import jax.numpy as jnp
from jax.experimental import pallas as pl
from jax.experimental.pallas import tpu as pltpu


def _round_up(x, m):
    return ((x + m - 1) // m) * m


def _make_kernel(n_slots, band, group):
    """Builds the fused one-hot-gather + folded-fc kernel.

    Kernel refs:
      idx_ref : (tb, n_slots) int32  -- per-row table indices, one per weight slot
      fold_ref: (n_slots*band, H) bf16 -- folded tables, slot-major, VMEM resident
      bias_ref: (1, H) f32
      out_ref : (tb, H)
    """

    def kernel(idx_ref, fold_ref, bias_ref, out_ref):
        tb = out_ref.shape[0]
        # Hoisted once: a single lane-iota reused by every slot compare
        # (JAX does not CSE broadcasts).
        lanes = jax.lax.broadcasted_iota(jnp.int32, (tb, band), 1)

        acc = None
        for s0 in range(0, n_slots, group):
            n = min(group, n_slots - s0)
            # Narrow (band-wide) one-hot per slot; lane-concatenate the group
            # so each MXU call sees K = n*band (256 for the default config).
            parts = [
                (lanes == idx_ref[:, s0 + g:s0 + g + 1]).astype(jnp.bfloat16)
                for g in range(n)
            ]
            onehot = parts[0] if n == 1 else jnp.concatenate(parts, axis=1)
            contrib = jnp.dot(onehot,
                              fold_ref[s0 * band:(s0 + n) * band, :],
                              preferred_element_type=jnp.float32)
            acc = contrib if acc is None else acc + contrib

        out_ref[...] = (acc + bias_ref[...]).astype(out_ref.dtype)

    return kernel


def prepare_params(params, *, map_size, pos_down_sample):
    """Once-per-weight-update precompute: fold the embedding tables through
    the comm_fc weight (costs ~17 MFLOP; rerun only when weights change)."""
    pos_table = params["pos_embedding"].astype(jnp.float32)    # (n_pos, E)
    tok_table = params["token_embedding"].astype(jnp.float32)  # (n_tok, E)
    w = params["fc_w"].astype(jnp.float32)                     # (D, H) == torch weight.T
    b = params["fc_b"].astype(jnp.float32)                     # (H,)

    n_pos, e = pos_table.shape
    n_tok = tok_table.shape[0]
    d, h = w.shape
    assert d % e == 0 and (d // e) % 2 == 1
    comm_obs_len = (d // e - 1) // 2
    n_slots = 2 * comm_obs_len + 1
    band = _round_up(max(n_pos, n_tok), 8)

    # Slot order matches torch: [my_pos, pos_0, tok_0, pos_1, tok_1, ...]
    w_slots = w.reshape(n_slots, e, h)
    blocks = []
    for s in range(n_slots):
        table = pos_table if (s == 0 or s % 2 == 1) else tok_table
        f = table @ w_slots[s]                                 # (rows, H) f32
        f = jnp.pad(f, ((0, band - f.shape[0]), (0, 0)))
        blocks.append(f)
    fold = jnp.concatenate(blocks, axis=0).astype(jnp.bfloat16)  # (n_slots*band, H)

    return {
        "fold": fold,
        "bias": b.reshape(1, h),
        "band": int(band),
        "n_slots": int(n_slots),
        "comm_obs_len": int(comm_obs_len),
        "grid_w": map_size // pos_down_sample,
        "pos_down_sample": pos_down_sample,
        "hidden": int(h),
    }


def comm_embed_encoder(comm_obs, my_id, prepared, *, block_b=1024,
                       out_dtype=jnp.float32):
    """Pallas implementation of CommEmbedEncoder.forward (uses prepare_params)."""
    band = prepared["band"]
    n_slots = prepared["n_slots"]
    h = prepared["hidden"]
    grid_w = prepared["grid_w"]
    pds = prepared["pos_down_sample"]

    comm_obs = comm_obs.astype(jnp.int32)
    agent_ids = comm_obs[:, :, 0]
    pos_idx = (comm_obs[:, :, 1] // pds) * grid_w + (comm_obs[:, :, 2] // pds)
    tokens = comm_obs[:, :, 3]
    B, L = agent_ids.shape
    assert n_slots == 2 * L + 1

    # First-match row selection (torch: where(any, argmax(mask), 0)) done with
    # elementwise ops + one row reduction, so no XLA gather anywhere in glue.
    mask = (agent_ids == my_id.astype(jnp.int32)[:, None]) & (agent_ids != 0)
    first = mask & (jnp.cumsum(mask.astype(jnp.int32), axis=1) == 1)
    has = jnp.any(mask, axis=1)
    my_idx = jnp.where(has, jnp.sum(jnp.where(first, pos_idx, 0), axis=1),
                       pos_idx[:, 0])

    # Per-row slot indices in folded-table order [my, pos_0, tok_0, pos_1, ...].
    slot_idx = jnp.stack([pos_idx, tokens], axis=2).reshape(B, 2 * L)
    idx = jnp.concatenate([my_idx[:, None], slot_idx], axis=1).astype(jnp.int32)

    # Batch tile: large by default, multiple of 16 (bf16 sublanes), >=2 grid
    # steps when there is enough work (v7x megacore), ragged last block.
    tb = _round_up(B, 16)
    if B >= 32:
        tb = min(tb, _round_up(pl.cdiv(B, 2), 16))
    tb = min(tb, _round_up(block_b, 16))
    grid = (pl.cdiv(B, tb),)

    group = max(1, 256 // band)            # slots per MXU call -> K ~= 256
    kernel = _make_kernel(n_slots, band, group)

    out_bytes = jnp.dtype(out_dtype).itemsize
    cost = pl.CostEstimate(
        flops=2 * B * n_slots * band * h,
        transcendentals=0,
        bytes_accessed=int(idx.size * 4 + prepared["fold"].size * 2
                           + B * h * out_bytes + h * 4),
    )

    return pl.pallas_call(
        kernel,
        out_shape=jax.ShapeDtypeStruct((B, h), out_dtype),
        grid=grid,
        in_specs=[
            pl.BlockSpec((tb, n_slots), lambda i: (i, 0)),           # indices
            pl.BlockSpec(prepared["fold"].shape, lambda i: (0, 0)),  # resident
            pl.BlockSpec((1, h), lambda i: (0, 0)),                  # resident
        ],
        out_specs=pl.BlockSpec((tb, h), lambda i: (i, 0)),
        compiler_params=pltpu.CompilerParams(
            dimension_semantics=("parallel",)),
        cost_estimate=cost,
    )(idx, prepared["fold"], prepared["bias"])


def _reference(comm_obs, my_id, params, *, map_size, pos_down_sample):
    """Pure-JAX f32 reference mirroring the PyTorch forward."""
    comm_obs = comm_obs.astype(jnp.int32)
    agent_ids = comm_obs[:, :, 0]
    rows = comm_obs[:, :, 1] // pos_down_sample
    cols = comm_obs[:, :, 2] // pos_down_sample
    tokens = comm_obs[:, :, 3]
    grid_w = map_size // pos_down_sample
    pos_idx = rows * grid_w + cols

    pos_emb = params["pos_embedding"][pos_idx]           # (B, L, E)
    tok_emb = params["token_embedding"][tokens]          # (B, L, E)

    B = comm_obs.shape[0]
    mask = (agent_ids == my_id[:, None]) & (agent_ids != 0)
    any_ = jnp.any(mask, axis=1)
    arg = jnp.argmax(mask.astype(jnp.int32), axis=1)
    row = jnp.where(any_, arg, 0)
    my_pos = pos_emb[jnp.arange(B), row]                 # (B, E)

    emb = jnp.concatenate([pos_emb, tok_emb], axis=2).reshape(B, -1)
    feat = jnp.concatenate([my_pos, emb], axis=1)
    return feat @ params["fc_w"] + params["fc_b"]


if __name__ == "__main__":
    # Module hyperparameters (consistent with __init__ defaults, small shapes).
    B = 37                # batch (ragged: exercises cdiv grid + masked last block)
    L = 32                # comm_obs_len
    E = 16                # embed_dim
    map_size = 64
    pos_down_sample = 8
    token_num = 10
    input_size = 128      # comm_fc output features

    key = jax.random.PRNGKey(0)
    k1, k2, k3, k4, k5, k6, k7, k8, k9 = jax.random.split(key, 9)

    grid_w = map_size // pos_down_sample
    D = E * (2 * L + 1)   # 16 * 65 = 1040 linear input features

    params = {
        "pos_embedding": jax.random.normal(k1, (grid_w * grid_w, E), jnp.float32),
        "token_embedding": jax.random.normal(k2, (token_num + 1, E), jnp.float32),
        "fc_w": jax.random.normal(k3, (D, input_size), jnp.float32) * 0.02,
        "fc_b": jax.random.normal(k4, (input_size,), jnp.float32) * 0.02,
    }

    agent_ids = jax.random.randint(k5, (B, L), 0, 5)
    rows = jax.random.randint(k6, (B, L), 0, map_size)
    cols = jax.random.randint(k7, (B, L), 0, map_size)
    tokens = jax.random.randint(k8, (B, L), 0, token_num + 1)
    # comm_obs arrives as float in the torch module and is cast with .int()
    comm_obs = jnp.stack([agent_ids, rows, cols, tokens], axis=2).astype(jnp.float32)
    my_id = jax.random.randint(k9, (B,), 0, 5)

    # Once-per-weight-update precompute (folded bf16 tables + f32 bias).
    prepared = prepare_params(params, map_size=map_size,
                              pos_down_sample=pos_down_sample)

    out = comm_embed_encoder(comm_obs, my_id, prepared)
    out = jax.block_until_ready(out)

    ref = _reference(comm_obs, my_id, params,
                     map_size=map_size, pos_down_sample=pos_down_sample)
    assert out.shape == (B, input_size)
    # bf16 folded tables (exact one-hot gather, f32 accumulation) vs f32 ref.
    assert jnp.allclose(out, ref, atol=5e-2, rtol=5e-2), "mismatch vs reference"

    print("KERNEL_OK")
</pallas_src>

<mosaic_0001>
module attributes {stable_mosaic.version = 11 : i64} {
  func.func @kernel(%arg0: i32, %arg1: memref<32x65xi32, #tpu.memory_space<vmem>>, %arg2: memref<4160x128xbf16, #tpu.memory_space<vmem>>, %arg3: memref<1x128xf32, #tpu.memory_space<vmem>>, %arg4: memref<32x128xf32, #tpu.memory_space<vmem>>) attributes {dimension_semantics = [#tpu.dimension_semantics<parallel>], iteration_bounds = array<i64: 2>, scalar_prefetch = 0 : i64, scratch_operands = 0 : i64, tpu.core_type = #tpu.core_type<tc>, window_params = [{transform_indices = @transform_0, window_bounds = array<i64: 32, 65>}, {pipeline_mode = #tpu.pipeline_mode<synchronous>, transform_indices = @transform_1, window_bounds = array<i64: 4160, 128>}, {pipeline_mode = #tpu.pipeline_mode<synchronous>, transform_indices = @transform_2, window_bounds = array<i64: 1, 128>}, {transform_indices = @transform_3, window_bounds = array<i64: 32, 128>}]} {
    %0 = tpu.iota {dimensions = array<i32: 1>} : vector<32x64xi32>
    %c0 = arith.constant 0 : index
    %c0_0 = arith.constant 0 : index
    %1 = vector.load %arg1[%c0, %c0_0] : memref<32x65xi32, #tpu.memory_space<vmem>>, vector<32x1xi32>
    %2 = vector.broadcast %1 : vector<32x1xi32> to vector<32x64xi32>
    %3 = arith.cmpi eq, %0, %2 : vector<32x64xi32>
    %4 = arith.extui %3 : vector<32x64xi1> to vector<32x64xi32>
    %5 = arith.sitofp %4 : vector<32x64xi32> to vector<32x64xf32>
    %6 = arith.truncf %5 : vector<32x64xf32> to vector<32x64xbf16>
    %c0_1 = arith.constant 0 : index
    %c1 = arith.constant 1 : index
    %7 = vector.load %arg1[%c0_1, %c1] : memref<32x65xi32, #tpu.memory_space<vmem>>, vector<32x1xi32>
    %8 = vector.broadcast %7 : vector<32x1xi32> to vector<32x64xi32>
    %9 = arith.cmpi eq, %0, %8 : vector<32x64xi32>
    %10 = arith.extui %9 : vector<32x64xi1> to vector<32x64xi32>
    %11 = arith.sitofp %10 : vector<32x64xi32> to vector<32x64xf32>
    %12 = arith.truncf %11 : vector<32x64xf32> to vector<32x64xbf16>
    %c0_2 = arith.constant 0 : index
    %c2 = arith.constant 2 : index
    %13 = vector.load %arg1[%c0_2, %c2] : memref<32x65xi32, #tpu.memory_space<vmem>>, vector<32x1xi32>
    %14 = vector.broadcast %13 : vector<32x1xi32> to vector<32x64xi32>
    %15 = arith.cmpi eq, %0, %14 : vector<32x64xi32>
    %16 = arith.extui %15 : vector<32x64xi1> to vector<32x64xi32>
    %17 = arith.sitofp %16 : vector<32x64xi32> to vector<32x64xf32>
    %18 = arith.truncf %17 : vector<32x64xf32> to vector<32x64xbf16>
    %c0_3 = arith.constant 0 : index
    %c3 = arith.constant 3 : index
    %19 = vector.load %arg1[%c0_3, %c3] : memref<32x65xi32, #tpu.memory_space<vmem>>, vector<32x1xi32>
    %20 = vector.broadcast %19 : vector<32x1xi32> to vector<32x64xi32>
    %21 = arith.cmpi eq, %0, %20 : vector<32x64xi32>
    %22 = arith.extui %21 : vector<32x64xi1> to vector<32x64xi32>
    %23 = arith.sitofp %22 : vector<32x64xi32> to vector<32x64xf32>
    %24 = arith.truncf %23 : vector<32x64xf32> to vector<32x64xbf16>
    %25 = tpu.concatenate %6, %12, %18, %24 in 1 : vector<32x64xbf16>, vector<32x64xbf16>, vector<32x64xbf16>, vector<32x64xbf16> -> vector<32x256xbf16>
    %c0_4 = arith.constant 0 : index
    %c0_5 = arith.constant 0 : index
    %26 = vector.load %arg2[%c0_4, %c0_5] : memref<4160x128xbf16, #tpu.memory_space<vmem>>, vector<256x128xbf16>
    %cst = arith.constant dense<0.000000e+00> : vector<32x128xf32>
    %27 = tpu.matmul %25, %26, %cst {dimension_numbers = #tpu.dot_dimension_numbers<[1], [0], [0], [1], [0, 0, 1, 1], [], []>} : vector<32x256xbf16>, vector<256x128xbf16>, vector<32x128xf32> -> vector<32x128xf32>
    %c0_6 = arith.constant 0 : index
    %c4 = arith.constant 4 : index
    %28 = vector.load %arg1[%c0_6, %c4] : memref<32x65xi32, #tpu.memory_space<vmem>>, vector<32x1xi32>
    %29 = vector.broadcast %28 : vector<32x1xi32> to vector<32x64xi32>
    %30 = arith.cmpi eq, %0, %29 : vector<32x64xi32>
    %31 = arith.extui %30 : vector<32x64xi1> to vector<32x64xi32>
    %32 = arith.sitofp %31 : vector<32x64xi32> to vector<32x64xf32>
    %33 = arith.truncf %32 : vector<32x64xf32> to vector<32x64xbf16>
    %c0_7 = arith.constant 0 : index
    %c5 = arith.constant 5 : index
    %34 = vector.load %arg1[%c0_7, %c5] : memref<32x65xi32, #tpu.memory_space<vmem>>, vector<32x1xi32>
    %35 = vector.broadcast %34 : vector<32x1xi32> to vector<32x64xi32>
    %36 = arith.cmpi eq, %0, %35 : vector<32x64xi32>
    %37 = arith.extui %36 : vector<32x64xi1> to vector<32x64xi32>
    %38 = arith.sitofp %37 : vector<32x64xi32> to vector<32x64xf32>
    %39 = arith.truncf %38 : vector<32x64xf32> to vector<32x64xbf16>
    %c0_8 = arith.constant 0 : index
    %c6 = arith.constant 6 : index
    %40 = vector.load %arg1[%c0_8, %c6] : memref<32x65xi32, #tpu.memory_space<vmem>>, vector<32x1xi32>
    %41 = vector.broadcast %40 : vector<32x1xi32> to vector<32x64xi32>
    %42 = arith.cmpi eq, %0, %41 : vector<32x64xi32>
    %43 = arith.extui %42 : vector<32x64xi1> to vector<32x64xi32>
    %44 = arith.sitofp %43 : vector<32x64xi32> to vector<32x64xf32>
    %45 = arith.truncf %44 : vector<32x64xf32> to vector<32x64xbf16>
    %c0_9 = arith.constant 0 : index
    %c7 = arith.constant 7 : index
    %46 = vector.load %arg1[%c0_9, %c7] : memref<32x65xi32, #tpu.memory_space<vmem>>, vector<32x1xi32>
    %47 = vector.broadcast %46 : vector<32x1xi32> to vector<32x64xi32>
    %48 = arith.cmpi eq, %0, %47 : vector<32x64xi32>
    %49 = arith.extui %48 : vector<32x64xi1> to vector<32x64xi32>
    %50 = arith.sitofp %49 : vector<32x64xi32> to vector<32x64xf32>
    %51 = arith.truncf %50 : vector<32x64xf32> to vector<32x64xbf16>
    %52 = tpu.concatenate %33, %39, %45, %51 in 1 : vector<32x64xbf16>, vector<32x64xbf16>, vector<32x64xbf16>, vector<32x64xbf16> -> vector<32x256xbf16>
    %c256 = arith.constant 256 : index
    %c0_10 = arith.constant 0 : index
    %53 = vector.load %arg2[%c256, %c0_10] : memref<4160x128xbf16, #tpu.memory_space<vmem>>, vector<256x128xbf16>
    %cst_11 = arith.constant dense<0.000000e+00> : vector<32x128xf32>
    %54 = tpu.matmul %52, %53, %cst_11 {dimension_numbers = #tpu.dot_dimension_numbers<[1], [0], [0], [1], [0, 0, 1, 1], [], []>} : vector<32x256xbf16>, vector<256x128xbf16>, vector<32x128xf32> -> vector<32x128xf32>
    %55 = arith.addf %27, %54 : vector<32x128xf32>
    %c0_12 = arith.constant 0 : index
    %c8 = arith.constant 8 : index
    %56 = vector.load %arg1[%c0_12, %c8] : memref<32x65xi32, #tpu.memory_space<vmem>>, vector<32x1xi32>
    %57 = vector.broadcast %56 : vector<32x1xi32> to vector<32x64xi32>
    %58 = arith.cmpi eq, %0, %57 : vector<32x64xi32>
    %59 = arith.extui %58 : vector<32x64xi1> to vector<32x64xi32>
    %60 = arith.sitofp %59 : vector<32x64xi32> to vector<32x64xf32>
    %61 = arith.truncf %60 : vector<32x64xf32> to vector<32x64xbf16>
    %c0_13 = arith.constant 0 : index
    %c9 = arith.constant 9 : index
    %62 = vector.load %arg1[%c0_13, %c9] : memref<32x65xi32, #tpu.memory_space<vmem>>, vector<32x1xi32>
    %63 = vector.broadcast %62 : vector<32x1xi32> to vector<32x64xi32>
    %64 = arith.cmpi eq, %0, %63 : vector<32x64xi32>
    %65 = arith.extui %64 : vector<32x64xi1> to vector<32x64xi32>
    %66 = arith.sitofp %65 : vector<32x64xi32> to vector<32x64xf32>
    %67 = arith.truncf %66 : vector<32x64xf32> to vector<32x64xbf16>
    %c0_14 = arith.constant 0 : index
    %c10 = arith.constant 10 : index
    %68 = vector.load %arg1[%c0_14, %c10] : memref<32x65xi32, #tpu.memory_space<vmem>>, vector<32x1xi32>
    %69 = vector.broadcast %68 : vector<32x1xi32> to vector<32x64xi32>
    %70 = arith.cmpi eq, %0, %69 : vector<32x64xi32>
    %71 = arith.extui %70 : vector<32x64xi1> to vector<32x64xi32>
    %72 = arith.sitofp %71 : vector<32x64xi32> to vector<32x64xf32>
    %73 = arith.truncf %72 : vector<32x64xf32> to vector<32x64xbf16>
    %c0_15 = arith.constant 0 : index
    %c11 = arith.constant 11 : index
    %74 = vector.load %arg1[%c0_15, %c11] : memref<32x65xi32, #tpu.memory_space<vmem>>, vector<32x1xi32>
    %75 = vector.broadcast %74 : vector<32x1xi32> to vector<32x64xi32>
    %76 = arith.cmpi eq, %0, %75 : vector<32x64xi32>
    %77 = arith.extui %76 : vector<32x64xi1> to vector<32x64xi32>
    %78 = arith.sitofp %77 : vector<32x64xi32> to vector<32x64xf32>
    %79 = arith.truncf %78 : vector<32x64xf32> to vector<32x64xbf16>
    %80 = tpu.concatenate %61, %67, %73, %79 in 1 : vector<32x64xbf16>, vector<32x64xbf16>, vector<32x64xbf16>, vector<32x64xbf16> -> vector<32x256xbf16>
    %c512 = arith.constant 512 : index
    %c0_16 = arith.constant 0 : index
    %81 = vector.load %arg2[%c512, %c0_16] : memref<4160x128xbf16, #tpu.memory_space<vmem>>, vector<256x128xbf16>
    %cst_17 = arith.constant dense<0.000000e+00> : vector<32x128xf32>
    %82 = tpu.matmul %80, %81, %cst_17 {dimension_numbers = #tpu.dot_dimension_numbers<[1], [0], [0], [1], [0, 0, 1, 1], [], []>} : vector<32x256xbf16>, vector<256x128xbf16>, vector<32x128xf32> -> vector<32x128xf32>
    %83 = arith.addf %55, %82 : vector<32x128xf32>
    %c0_18 = arith.constant 0 : index
    %c12 = arith.constant 12 : index
    %84 = vector.load %arg1[%c0_18, %c12] : memref<32x65xi32, #tpu.memory_space<vmem>>, vector<32x1xi32>
    %85 = vector.broadcast %84 : vector<32x1xi32> to vector<32x64xi32>
    %86 = arith.cmpi eq, %0, %85 : vector<32x64xi32>
    %87 = arith.extui %86 : vector<32x64xi1> to vector<32x64xi32>
    %88 = arith.sitofp %87 : vector<32x64xi32> to vector<32x64xf32>
    %89 = arith.truncf %88 : vector<32x64xf32> to vector<32x64xbf16>
    %c0_19 = arith.constant 0 : index
    %c13 = arith.constant 13 : index
    %90 = vector.load %arg1[%c0_19, %c13] : memref<32x65xi32, #tpu.memory_space<vmem>>, vector<32x1xi32>
    %91 = vector.broadcast %90 : vector<32x1xi32> to vector<32x64xi32>
    %92 = arith.cmpi eq, %0, %91 : vector<32x64xi32>
    %93 = arith.extui %92 : vector<32x64xi1> to vector<32x64xi32>
    %94 = arith.sitofp %93 : vector<32x64xi32> to vector<32x64xf32>
    %95 = arith.truncf %94 : vector<32x64xf32> to vector<32x64xbf16>
    %c0_20 = arith.constant 0 : index
    %c14 = arith.constant 14 : index
    %96 = vector.load %arg1[%c0_20, %c14] : memref<32x65xi32, #tpu.memory_space<vmem>>, vector<32x1xi32>
    %97 = vector.broadcast %96 : vector<32x1xi32> to vector<32x64xi32>
    %98 = arith.cmpi eq, %0, %97 : vector<32x64xi32>
    %99 = arith.extui %98 : vector<32x64xi1> to vector<32x64xi32>
    %100 = arith.sitofp %99 : vector<32x64xi32> to vector<32x64xf32>
    %101 = arith.truncf %100 : vector<32x64xf32> to vector<32x64xbf16>
    %c0_21 = arith.constant 0 : index
    %c15 = arith.constant 15 : index
    %102 = vector.load %arg1[%c0_21, %c15] : memref<32x65xi32, #tpu.memory_space<vmem>>, vector<32x1xi32>
    %103 = vector.broadcast %102 : vector<32x1xi32> to vector<32x64xi32>
    %104 = arith.cmpi eq, %0, %103 : vector<32x64xi32>
    %105 = arith.extui %104 : vector<32x64xi1> to vector<32x64xi32>
    %106 = arith.sitofp %105 : vector<32x64xi32> to vector<32x64xf32>
    %107 = arith.truncf %106 : vector<32x64xf32> to vector<32x64xbf16>
    %108 = tpu.concatenate %89, %95, %101, %107 in 1 : vector<32x64xbf16>, vector<32x64xbf16>, vector<32x64xbf16>, vector<32x64xbf16> -> vector<32x256xbf16>
    %c768 = arith.constant 768 : index
    %c0_22 = arith.constant 0 : index
    %109 = vector.load %arg2[%c768, %c0_22] : memref<4160x128xbf16, #tpu.memory_space<vmem>>, vector<256x128xbf16>
    %cst_23 = arith.constant dense<0.000000e+00> : vector<32x128xf32>
    %110 = tpu.matmul %108, %109, %cst_23 {dimension_numbers = #tpu.dot_dimension_numbers<[1], [0], [0], [1], [0, 0, 1, 1], [], []>} : vector<32x256xbf16>, vector<256x128xbf16>, vector<32x128xf32> -> vector<32x128xf32>
    %111 = arith.addf %83, %110 : vector<32x128xf32>
    %c0_24 = arith.constant 0 : index
    %c16 = arith.constant 16 : index
    %112 = vector.load %arg1[%c0_24, %c16] : memref<32x65xi32, #tpu.memory_space<vmem>>, vector<32x1xi32>
    %113 = vector.broadcast %112 : vector<32x1xi32> to vector<32x64xi32>
    %114 = arith.cmpi eq, %0, %113 : vector<32x64xi32>
    %115 = arith.extui %114 : vector<32x64xi1> to vector<32x64xi32>
    %116 = arith.sitofp %115 : vector<32x64xi32> to vector<32x64xf32>
    %117 = arith.truncf %116 : vector<32x64xf32> to vector<32x64xbf16>
    %c0_25 = arith.constant 0 : index
    %c17 = arith.constant 17 : index
    %118 = vector.load %arg1[%c0_25, %c17] : memref<32x65xi32, #tpu.memory_space<vmem>>, vector<32x1xi32>
    %119 = vector.broadcast %118 : vector<32x1xi32> to vector<32x64xi32>
    %120 = arith.cmpi eq, %0, %119 : vector<32x64xi32>
    %121 = arith.extui %120 : vector<32x64xi1> to vector<32x64xi32>
    %122 = arith.sitofp %121 : vector<32x64xi32> to vector<32x64xf32>
    %123 = arith.truncf %122 : vector<32x64xf32> to vector<32x64xbf16>
    %c0_26 = arith.constant 0 : index
    %c18 = arith.constant 18 : index
    %124 = vector.load %arg1[%c0_26, %c18] : memref<32x65xi32, #tpu.memory_space<vmem>>, vector<32x1xi32>
    %125 = vector.broadcast %124 : vector<32x1xi32> to vector<32x64xi32>
    %126 = arith.cmpi eq, %0, %125 : vector<32x64xi32>
    %127 = arith.extui %126 : vector<32x64xi1> to vector<32x64xi32>
    %128 = arith.sitofp %127 : vector<32x64xi32> to vector<32x64xf32>
    %129 = arith.truncf %128 : vector<32x64xf32> to vector<32x64xbf16>
    %c0_27 = arith.constant 0 : index
    %c19 = arith.constant 19 : index
    %130 = vector.load %arg1[%c0_27, %c19] : memref<32x65xi32, #tpu.memory_space<vmem>>, vector<32x1xi32>
    %131 = vector.broadcast %130 : vector<32x1xi32> to vector<32x64xi32>
    %132 = arith.cmpi eq, %0, %131 : vector<32x64xi32>
    %133 = arith.extui %132 : vector<32x64xi1> to vector<32x64xi32>
    %134 = arith.sitofp %133 : vector<32x64xi32> to vector<32x64xf32>
    %135 = arith.truncf %134 : vector<32x64xf32> to vector<32x64xbf16>
    %136 = tpu.concatenate %117, %123, %129, %135 in 1 : vector<32x64xbf16>, vector<32x64xbf16>, vector<32x64xbf16>, vector<32x64xbf16> -> vector<32x256xbf16>
    %c1024 = arith.constant 1024 : index
    %c0_28 = arith.constant 0 : index
    %137 = vector.load %arg2[%c1024, %c0_28] : memref<4160x128xbf16, #tpu.memory_space<vmem>>, vector<256x128xbf16>
    %cst_29 = arith.constant dense<0.000000e+00> : vector<32x128xf32>
    %138 = tpu.matmul %136, %137, %cst_29 {dimension_numbers = #tpu.dot_dimension_numbers<[1], [0], [0], [1], [0, 0, 1, 1], [], []>} : vector<32x256xbf16>, vector<256x128xbf16>, vector<32x128xf32> -> vector<32x128xf32>
    %139 = arith.addf %111, %138 : vector<32x128xf32>
    %c0_30 = arith.constant 0 : index
    %c20 = arith.constant 20 : index
    %140 = vector.load %arg1[%c0_30, %c20] : memref<32x65xi32, #tpu.memory_space<vmem>>, vector<32x1xi32>
    %141 = vector.broadcast %140 : vector<32x1xi32> to vector<32x64xi32>
    %142 = arith.cmpi eq, %0, %141 : vector<32x64xi32>
    %143 = arith.extui %142 : vector<32x64xi1> to vector<32x64xi32>
    %144 = arith.sitofp %143 : vector<32x64xi32> to vector<32x64xf32>
    %145 = arith.truncf %144 : vector<32x64xf32> to vector<32x64xbf16>
    %c0_31 = arith.constant 0 : index
    %c21 = arith.constant 21 : index
    %146 = vector.load %arg1[%c0_31, %c21] : memref<32x65xi32, #tpu.memory_space<vmem>>, vector<32x1xi32>
    %147 = vector.broadcast %146 : vector<32x1xi32> to vector<32x64xi32>
    %148 = arith.cmpi eq, %0, %147 : vector<32x64xi32>
    %149 = arith.extui %148 : vector<32x64xi1> to vector<32x64xi32>
    %150 = arith.sitofp %149 : vector<32x64xi32> to vector<32x64xf32>
    %151 = arith.truncf %150 : vector<32x64xf32> to vector<32x64xbf16>
    %c0_32 = arith.constant 0 : index
    %c22 = arith.constant 22 : index
    %152 = vector.load %arg1[%c0_32, %c22] : memref<32x65xi32, #tpu.memory_space<vmem>>, vector<32x1xi32>
    %153 = vector.broadcast %152 : vector<32x1xi32> to vector<32x64xi32>
    %154 = arith.cmpi eq, %0, %153 : vector<32x64xi32>
    %155 = arith.extui %154 : vector<32x64xi1> to vector<32x64xi32>
    %156 = arith.sitofp %155 : vector<32x64xi32> to vector<32x64xf32>
    %157 = arith.truncf %156 : vector<32x64xf32> to vector<32x64xbf16>
    %c0_33 = arith.constant 0 : index
    %c23 = arith.constant 23 : index
    %158 = vector.load %arg1[%c0_33, %c23] : memref<32x65xi32, #tpu.memory_space<vmem>>, vector<32x1xi32>
    %159 = vector.broadcast %158 : vector<32x1xi32> to vector<32x64xi32>
    %160 = arith.cmpi eq, %0, %159 : vector<32x64xi32>
    %161 = arith.extui %160 : vector<32x64xi1> to vector<32x64xi32>
    %162 = arith.sitofp %161 : vector<32x64xi32> to vector<32x64xf32>
    %163 = arith.truncf %162 : vector<32x64xf32> to vector<32x64xbf16>
    %164 = tpu.concatenate %145, %151, %157, %163 in 1 : vector<32x64xbf16>, vector<32x64xbf16>, vector<32x64xbf16>, vector<32x64xbf16> -> vector<32x256xbf16>
    %c1280 = arith.constant 1280 : index
    %c0_34 = arith.constant 0 : index
    %165 = vector.load %arg2[%c1280, %c0_34] : memref<4160x128xbf16, #tpu.memory_space<vmem>>, vector<256x128xbf16>
    %cst_35 = arith.constant dense<0.000000e+00> : vector<32x128xf32>
    %166 = tpu.matmul %164, %165, %cst_35 {dimension_numbers = #tpu.dot_dimension_numbers<[1], [0], [0], [1], [0, 0, 1, 1], [], []>} : vector<32x256xbf16>, vector<256x128xbf16>, vector<32x128xf32> -> vector<32x128xf32>
    %167 = arith.addf %139, %166 : vector<32x128xf32>
    %c0_36 = arith.constant 0 : index
    %c24 = arith.constant 24 : index
    %168 = vector.load %arg1[%c0_36, %c24] : memref<32x65xi32, #tpu.memory_space<vmem>>, vector<32x1xi32>
    %169 = vector.broadcast %168 : vector<32x1xi32> to vector<32x64xi32>
    %170 = arith.cmpi eq, %0, %169 : vector<32x64xi32>
    %171 = arith.extui %170 : vector<32x64xi1> to vector<32x64xi32>
    %172 = arith.sitofp %171 : vector<32x64xi32> to vector<32x64xf32>
    %173 = arith.truncf %172 : vector<32x64xf32> to vector<32x64xbf16>
    %c0_37 = arith.constant 0 : index
    %c25 = arith.constant 25 : index
    %174 = vector.load %arg1[%c0_37, %c25] : memref<32x65xi32, #tpu.memory_space<vmem>>, vector<32x1xi32>
    %175 = vector.broadcast %174 : vector<32x1xi32> to vector<32x64xi32>
    %176 = arith.cmpi eq, %0, %175 : vector<32x64xi32>
    %177 = arith.extui %176 : vector<32x64xi1> to vector<32x64xi32>
    %178 = arith.sitofp %177 : vector<32x64xi32> to vector<32x64xf32>
    %179 = arith.truncf %178 : vector<32x64xf32> to vector<32x64xbf16>
    %c0_38 = arith.constant 0 : index
    %c26 = arith.constant 26 : index
    %180 = vector.load %arg1[%c0_38, %c26] : memref<32x65xi32, #tpu.memory_space<vmem>>, vector<32x1xi32>
    %181 = vector.broadcast %180 : vector<32x1xi32> to vector<32x64xi32>
    %182 = arith.cmpi eq, %0, %181 : vector<32x64xi32>
    %183 = arith.extui %182 : vector<32x64xi1> to vector<32x64xi32>
    %184 = arith.sitofp %183 : vector<32x64xi32> to vector<32x64xf32>
    %185 = arith.truncf %184 : vector<32x64xf32> to vector<32x64xbf16>
    %c0_39 = arith.constant 0 : index
    %c27 = arith.constant 27 : index
    %186 = vector.load %arg1[%c0_39, %c27] : memref<32x65xi32, #tpu.memory_space<vmem>>, vector<32x1xi32>
    %187 = vector.broadcast %186 : vector<32x1xi32> to vector<32x64xi32>
    %188 = arith.cmpi eq, %0, %187 : vector<32x64xi32>
    %189 = arith.extui %188 : vector<32x64xi1> to vector<32x64xi32>
    %190 = arith.sitofp %189 : vector<32x64xi32> to vector<32x64xf32>
    %191 = arith.truncf %190 : vector<32x64xf32> to vector<32x64xbf16>
    %192 = tpu.concatenate %173, %179, %185, %191 in 1 : vector<32x64xbf16>, vector<32x64xbf16>, vector<32x64xbf16>, vector<32x64xbf16> -> vector<32x256xbf16>
    %c1536 = arith.constant 1536 : index
    %c0_40 = arith.constant 0 : index
    %193 = vector.load %arg2[%c1536, %c0_40] : memref<4160x128xbf16, #tpu.memory_space<vmem>>, vector<256x128xbf16>
    %cst_41 = arith.constant dense<0.000000e+00> : vector<32x128xf32>
    %194 = tpu.matmul %192, %193, %cst_41 {dimension_numbers = #tpu.dot_dimension_numbers<[1], [0], [0], [1], [0, 0, 1, 1], [], []>} : vector<32x256xbf16>, vector<256x128xbf16>, vector<32x128xf32> -> vector<32x128xf32>
    %195 = arith.addf %167, %194 : vector<32x128xf32>
    %c0_42 = arith.constant 0 : index
    %c28 = arith.constant 28 : index
    %196 = vector.load %arg1[%c0_42, %c28] : memref<32x65xi32, #tpu.memory_space<vmem>>, vector<32x1xi32>
    %197 = vector.broadcast %196 : vector<32x1xi32> to vector<32x64xi32>
    %198 = arith.cmpi eq, %0, %197 : vector<32x64xi32>
    %199 = arith.extui %198 : vector<32x64xi1> to vector<32x64xi32>
    %200 = arith.sitofp %199 : vector<32x64xi32> to vector<32x64xf32>
    %201 = arith.truncf %200 : vector<32x64xf32> to vector<32x64xbf16>
    %c0_43 = arith.constant 0 : index
    %c29 = arith.constant 29 : index
    %202 = vector.load %arg1[%c0_43, %c29] : memref<32x65xi32, #tpu.memory_space<vmem>>, vector<32x1xi32>
    %203 = vector.broadcast %202 : vector<32x1xi32> to vector<32x64xi32>
    %204 = arith.cmpi eq, %0, %203 : vector<32x64xi32>
    %205 = arith.extui %204 : vector<32x64xi1> to vector<32x64xi32>
    %206 = arith.sitofp %205 : vector<32x64xi32> to vector<32x64xf32>
    %207 = arith.truncf %206 : vector<32x64xf32> to vector<32x64xbf16>
    %c0_44 = arith.constant 0 : index
    %c30 = arith.constant 30 : index
    %208 = vector.load %arg1[%c0_44, %c30] : memref<32x65xi32, #tpu.memory_space<vmem>>, vector<32x1xi32>
    %209 = vector.broadcast %208 : vector<32x1xi32> to vector<32x64xi32>
    %210 = arith.cmpi eq, %0, %209 : vector<32x64xi32>
    %211 = arith.extui %210 : vector<32x64xi1> to vector<32x64xi32>
    %212 = arith.sitofp %211 : vector<32x64xi32> to vector<32x64xf32>
    %213 = arith.truncf %212 : vector<32x64xf32> to vector<32x64xbf16>
    %c0_45 = arith.constant 0 : index
    %c31 = arith.constant 31 : index
    %214 = vector.load %arg1[%c0_45, %c31] : memref<32x65xi32, #tpu.memory_space<vmem>>, vector<32x1xi32>
    %215 = vector.broadcast %214 : vector<32x1xi32> to vector<32x64xi32>
    %216 = arith.cmpi eq, %0, %215 : vector<32x64xi32>
    %217 = arith.extui %216 : vector<32x64xi1> to vector<32x64xi32>
    %218 = arith.sitofp %217 : vector<32x64xi32> to vector<32x64xf32>
    %219 = arith.truncf %218 : vector<32x64xf32> to vector<32x64xbf16>
    %220 = tpu.concatenate %201, %207, %213, %219 in 1 : vector<32x64xbf16>, vector<32x64xbf16>, vector<32x64xbf16>, vector<32x64xbf16> -> vector<32x256xbf16>
    %c1792 = arith.constant 1792 : index
    %c0_46 = arith.constant 0 : index
    %221 = vector.load %arg2[%c1792, %c0_46] : memref<4160x128xbf16, #tpu.memory_space<vmem>>, vector<256x128xbf16>
    %cst_47 = arith.constant dense<0.000000e+00> : vector<32x128xf32>
    %222 = tpu.matmul %220, %221, %cst_47 {dimension_numbers = #tpu.dot_dimension_numbers<[1], [0], [0], [1], [0, 0, 1, 1], [], []>} : vector<32x256xbf16>, vector<256x128xbf16>, vector<32x128xf32> -> vector<32x128xf32>
    %223 = arith.addf %195, %222 : vector<32x128xf32>
    %c0_48 = arith.constant 0 : index
    %c32 = arith.constant 32 : index
    %224 = vector.load %arg1[%c0_48, %c32] : memref<32x65xi32, #tpu.memory_space<vmem>>, vector<32x1xi32>
    %225 = vector.broadcast %224 : vector<32x1xi32> to vector<32x64xi32>
    %226 = arith.cmpi eq, %0, %225 : vector<32x64xi32>
    %227 = arith.extui %226 : vector<32x64xi1> to vector<32x64xi32>
    %228 = arith.sitofp %227 : vector<32x64xi32> to vector<32x64xf32>
    %229 = arith.truncf %228 : vector<32x64xf32> to vector<32x64xbf16>
    %c0_49 = arith.constant 0 : index
    %c33 = arith.constant 33 : index
    %230 = vector.load %arg1[%c0_49, %c33] : memref<32x65xi32, #tpu.memory_space<vmem>>, vector<32x1xi32>
    %231 = vector.broadcast %230 : vector<32x1xi32> to vector<32x64xi32>
    %232 = arith.cmpi eq, %0, %231 : vector<32x64xi32>
    %233 = arith.extui %232 : vector<32x64xi1> to vector<32x64xi32>
    %234 = arith.sitofp %233 : vector<32x64xi32> to vector<32x64xf32>
    %235 = arith.truncf %234 : vector<32x64xf32> to vector<32x64xbf16>
    %c0_50 = arith.constant 0 : index
    %c34 = arith.constant 34 : index
    %236 = vector.load %arg1[%c0_50, %c34] : memref<32x65xi32, #tpu.memory_space<vmem>>, vector<32x1xi32>
    %237 = vector.broadcast %236 : vector<32x1xi32> to vector<32x64xi32>
    %238 = arith.cmpi eq, %0, %237 : vector<32x64xi32>
    %239 = arith.extui %238 : vector<32x64xi1> to vector<32x64xi32>
    %240 = arith.sitofp %239 : vector<32x64xi32> to vector<32x64xf32>
    %241 = arith.truncf %240 : vector<32x64xf32> to vector<32x64xbf16>
    %c0_51 = arith.constant 0 : index
    %c35 = arith.constant 35 : index
    %242 = vector.load %arg1[%c0_51, %c35] : memref<32x65xi32, #tpu.memory_space<vmem>>, vector<32x1xi32>
    %243 = vector.broadcast %242 : vector<32x1xi32> to vector<32x64xi32>
    %244 = arith.cmpi eq, %0, %243 : vector<32x64xi32>
    %245 = arith.extui %244 : vector<32x64xi1> to vector<32x64xi32>
    %246 = arith.sitofp %245 : vector<32x64xi32> to vector<32x64xf32>
    %247 = arith.truncf %246 : vector<32x64xf32> to vector<32x64xbf16>
    %248 = tpu.concatenate %229, %235, %241, %247 in 1 : vector<32x64xbf16>, vector<32x64xbf16>, vector<32x64xbf16>, vector<32x64xbf16> -> vector<32x256xbf16>
    %c2048 = arith.constant 2048 : index
    %c0_52 = arith.constant 0 : index
    %249 = vector.load %arg2[%c2048, %c0_52] : memref<4160x128xbf16, #tpu.memory_space<vmem>>, vector<256x128xbf16>
    %cst_53 = arith.constant dense<0.000000e+00> : vector<32x128xf32>
    %250 = tpu.matmul %248, %249, %cst_53 {dimension_numbers = #tpu.dot_dimension_numbers<[1], [0], [0], [1], [0, 0, 1, 1], [], []>} : vector<32x256xbf16>, vector<256x128xbf16>, vector<32x128xf32> -> vector<32x128xf32>
    %251 = arith.addf %223, %250 : vector<32x128xf32>
    %c0_54 = arith.constant 0 : index
    %c36 = arith.constant 36 : index
    %252 = vector.load %arg1[%c0_54, %c36] : memref<32x65xi32, #tpu.memory_space<vmem>>, vector<32x1xi32>
    %253 = vector.broadcast %252 : vector<32x1xi32> to vector<32x64xi32>
    %254 = arith.cmpi eq, %0, %253 : vector<32x64xi32>
    %255 = arith.extui %254 : vector<32x64xi1> to vector<32x64xi32>
    %256 = arith.sitofp %255 : vector<32x64xi32> to vector<32x64xf32>
    %257 = arith.truncf %256 : vector<32x64xf32> to vector<32x64xbf16>
    %c0_55 = arith.constant 0 : index
    %c37 = arith.constant 37 : index
    %258 = vector.load %arg1[%c0_55, %c37] : memref<32x65xi32, #tpu.memory_space<vmem>>, vector<32x1xi32>
    %259 = vector.broadcast %258 : vector<32x1xi32> to vector<32x64xi32>
    %260 = arith.cmpi eq, %0, %259 : vector<32x64xi32>
    %261 = arith.extui %260 : vector<32x64xi1> to vector<32x64xi32>
    %262 = arith.sitofp %261 : vector<32x64xi32> to vector<32x64xf32>
    %263 = arith.truncf %262 : vector<32x64xf32> to vector<32x64xbf16>
    %c0_56 = arith.constant 0 : index
    %c38 = arith.constant 38 : index
    %264 = vector.load %arg1[%c0_56, %c38] : memref<32x65xi32, #tpu.memory_space<vmem>>, vector<32x1xi32>
    %265 = vector.broadcast %264 : vector<32x1xi32> to vector<32x64xi32>
    %266 = arith.cmpi eq, %0, %265 : vector<32x64xi32>
    %267 = arith.extui %266 : vector<32x64xi1> to vector<32x64xi32>
    %268 = arith.sitofp %267 : vector<32x64xi32> to vector<32x64xf32>
    %269 = arith.truncf %268 : vector<32x64xf32> to vector<32x64xbf16>
    %c0_57 = arith.constant 0 : index
    %c39 = arith.constant 39 : index
    %270 = vector.load %arg1[%c0_57, %c39] : memref<32x65xi32, #tpu.memory_space<vmem>>, vector<32x1xi32>
    %271 = vector.broadcast %270 : vector<32x1xi32> to vector<32x64xi32>
    %272 = arith.cmpi eq, %0, %271 : vector<32x64xi32>
    %273 = arith.extui %272 : vector<32x64xi1> to vector<32x64xi32>
    %274 = arith.sitofp %273 : vector<32x64xi32> to vector<32x64xf32>
    %275 = arith.truncf %274 : vector<32x64xf32> to vector<32x64xbf16>
    %276 = tpu.concatenate %257, %263, %269, %275 in 1 : vector<32x64xbf16>, vector<32x64xbf16>, vector<32x64xbf16>, vector<32x64xbf16> -> vector<32x256xbf16>
    %c2304 = arith.constant 2304 : index
    %c0_58 = arith.constant 0 : index
    %277 = vector.load %arg2[%c2304, %c0_58] : memref<4160x128xbf16, #tpu.memory_space<vmem>>, vector<256x128xbf16>
    %cst_59 = arith.constant dense<0.000000e+00> : vector<32x128xf32>
    %278 = tpu.matmul %276, %277, %cst_59 {dimension_numbers = #tpu.dot_dimension_numbers<[1], [0], [0], [1], [0, 0, 1, 1], [], []>} : vector<32x256xbf16>, vector<256x128xbf16>, vector<32x128xf32> -> vector<32x128xf32>
    %279 = arith.addf %251, %278 : vector<32x128xf32>
    %c0_60 = arith.constant 0 : index
    %c40 = arith.constant 40 : index
    %280 = vector.load %arg1[%c0_60, %c40] : memref<32x65xi32, #tpu.memory_space<vmem>>, vector<32x1xi32>
    %281 = vector.broadcast %280 : vector<32x1xi32> to vector<32x64xi32>
    %282 = arith.cmpi eq, %0, %281 : vector<32x64xi32>
    %283 = arith.extui %282 : vector<32x64xi1> to vector<32x64xi32>
    %284 = arith.sitofp %283 : vector<32x64xi32> to vector<32x64xf32>
    %285 = arith.truncf %284 : vector<32x64xf32> to vector<32x64xbf16>
    %c0_61 = arith.constant 0 : index
    %c41 = arith.constant 41 : index
    %286 = vector.load %arg1[%c0_61, %c41] : memref<32x65xi32, #tpu.memory_space<vmem>>, vector<32x1xi32>
    %287 = vector.broadcast %286 : vector<32x1xi32> to vector<32x64xi32>
    %288 = arith.cmpi eq, %0, %287 : vector<32x64xi32>
    %289 = arith.extui %288 : vector<32x64xi1> to vector<32x64xi32>
    %290 = arith.sitofp %289 : vector<32x64xi32> to vector<32x64xf32>
    %291 = arith.truncf %290 : vector<32x64xf32> to vector<32x64xbf16>
    %c0_62 = arith.constant 0 : index
    %c42 = arith.constant 42 : index
    %292 = vector.load %arg1[%c0_62, %c42] : memref<32x65xi32, #tpu.memory_space<vmem>>, vector<32x1xi32>
    %293 = vector.broadcast %292 : vector<32x1xi32> to vector<32x64xi32>
    %294 = arith.cmpi eq, %0, %293 : vector<32x64xi32>
    %295 = arith.extui %294 : vector<32x64xi1> to vector<32x64xi32>
    %296 = arith.sitofp %295 : vector<32x64xi32> to vector<32x64xf32>
    %297 = arith.truncf %296 : vector<32x64xf32> to vector<32x64xbf16>
    %c0_63 = arith.constant 0 : index
    %c43 = arith.constant 43 : index
    %298 = vector.load %arg1[%c0_63, %c43] : memref<32x65xi32, #tpu.memory_space<vmem>>, vector<32x1xi32>
    %299 = vector.broadcast %298 : vector<32x1xi32> to vector<32x64xi32>
    %300 = arith.cmpi eq, %0, %299 : vector<32x64xi32>
    %301 = arith.extui %300 : vector<32x64xi1> to vector<32x64xi32>
    %302 = arith.sitofp %301 : vector<32x64xi32> to vector<32x64xf32>
    %303 = arith.truncf %302 : vector<32x64xf32> to vector<32x64xbf16>
    %304 = tpu.concatenate %285, %291, %297, %303 in 1 : vector<32x64xbf16>, vector<32x64xbf16>, vector<32x64xbf16>, vector<32x64xbf16> -> vector<32x256xbf16>
    %c2560 = arith.constant 2560 : index
    %c0_64 = arith.constant 0 : index
    %305 = vector.load %arg2[%c2560, %c0_64] : memref<4160x128xbf16, #tpu.memory_space<vmem>>, vector<256x128xbf16>
    %cst_65 = arith.constant dense<0.000000e+00> : vector<32x128xf32>
    %306 = tpu.matmul %304, %305, %cst_65 {dimension_numbers = #tpu.dot_dimension_numbers<[1], [0], [0], [1], [0, 0, 1, 1], [], []>} : vector<32x256xbf16>, vector<256x128xbf16>, vector<32x128xf32> -> vector<32x128xf32>
    %307 = arith.addf %279, %306 : vector<32x128xf32>
    %c0_66 = arith.constant 0 : index
    %c44 = arith.constant 44 : index
    %308 = vector.load %arg1[%c0_66, %c44] : memref<32x65xi32, #tpu.memory_space<vmem>>, vector<32x1xi32>
    %309 = vector.broadcast %308 : vector<32x1xi32> to vector<32x64xi32>
    %310 = arith.cmpi eq, %0, %309 : vector<32x64xi32>
    %311 = arith.extui %310 : vector<32x64xi1> to vector<32x64xi32>
    %312 = arith.sitofp %311 : vector<32x64xi32> to vector<32x64xf32>
    %313 = arith.truncf %312 : vector<32x64xf32> to vector<32x64xbf16>
    %c0_67 = arith.constant 0 : index
    %c45 = arith.constant 45 : index
    %314 = vector.load %arg1[%c0_67, %c45] : memref<32x65xi32, #tpu.memory_space<vmem>>, vector<32x1xi32>
    %315 = vector.broadcast %314 : vector<32x1xi32> to vector<32x64xi32>
    %316 = arith.cmpi eq, %0, %315 : vector<32x64xi32>
    %317 = arith.extui %316 : vector<32x64xi1> to vector<32x64xi32>
    %318 = arith.sitofp %317 : vector<32x64xi32> to vector<32x64xf32>
    %319 = arith.truncf %318 : vector<32x64xf32> to vector<32x64xbf16>
    %c0_68 = arith.constant 0 : index
    %c46 = arith.constant 46 : index
    %320 = vector.load %arg1[%c0_68, %c46] : memref<32x65xi32, #tpu.memory_space<vmem>>, vector<32x1xi32>
    %321 = vector.broadcast %320 : vector<32x1xi32> to vector<32x64xi32>
    %322 = arith.cmpi eq, %0, %321 : vector<32x64xi32>
    %323 = arith.extui %322 : vector<32x64xi1> to vector<32x64xi32>
    %324 = arith.sitofp %323 : vector<32x64xi32> to vector<32x64xf32>
    %325 = arith.truncf %324 : vector<32x64xf32> to vector<32x64xbf16>
    %c0_69 = arith.constant 0 : index
    %c47 = arith.constant 47 : index
    %326 = vector.load %arg1[%c0_69, %c47] : memref<32x65xi32, #tpu.memory_space<vmem>>, vector<32x1xi32>
    %327 = vector.broadcast %326 : vector<32x1xi32> to vector<32x64xi32>
    %328 = arith.cmpi eq, %0, %327 : vector<32x64xi32>
    %329 = arith.extui %328 : vector<32x64xi1> to vector<32x64xi32>
    %330 = arith.sitofp %329 : vector<32x64xi32> to vector<32x64xf32>
    %331 = arith.truncf %330 : vector<32x64xf32> to vector<32x64xbf16>
    %332 = tpu.concatenate %313, %319, %325, %331 in 1 : vector<32x64xbf16>, vector<32x64xbf16>, vector<32x64xbf16>, vector<32x64xbf16> -> vector<32x256xbf16>
    %c2816 = arith.constant 2816 : index
    %c0_70 = arith.constant 0 : index
    %333 = vector.load %arg2[%c2816, %c0_70] : memref<4160x128xbf16, #tpu.memory_space<vmem>>, vector<256x128xbf16>
    %cst_71 = arith.constant dense<0.000000e+00> : vector<32x128xf32>
    %334 = tpu.matmul %332, %333, %cst_71 {dimension_numbers = #tpu.dot_dimension_numbers<[1], [0], [0], [1], [0, 0, 1, 1], [], []>} : vector<32x256xbf16>, vector<256x128xbf16>, vector<32x128xf32> -> vector<32x128xf32>
    %335 = arith.addf %307, %334 : vector<32x128xf32>
    %c0_72 = arith.constant 0 : index
    %c48 = arith.constant 48 : index
    %336 = vector.load %arg1[%c0_72, %c48] : memref<32x65xi32, #tpu.memory_space<vmem>>, vector<32x1xi32>
    %337 = vector.broadcast %336 : vector<32x1xi32> to vector<32x64xi32>
    %338 = arith.cmpi eq, %0, %337 : vector<32x64xi32>
    %339 = arith.extui %338 : vector<32x64xi1> to vector<32x64xi32>
    %340 = arith.sitofp %339 : vector<32x64xi32> to vector<32x64xf32>
    %341 = arith.truncf %340 : vector<32x64xf32> to vector<32x64xbf16>
    %c0_73 = arith.constant 0 : index
    %c49 = arith.constant 49 : index
    %342 = vector.load %arg1[%c0_73, %c49] : memref<32x65xi32, #tpu.memory_space<vmem>>, vector<32x1xi32>
    %343 = vector.broadcast %342 : vector<32x1xi32> to vector<32x64xi32>
    %344 = arith.cmpi eq, %0, %343 : vector<32x64xi32>
    %345 = arith.extui %344 : vector<32x64xi1> to vector<32x64xi32>
    %346 = arith.sitofp %345 : vector<32x64xi32> to vector<32x64xf32>
    %347 = arith.truncf %346 : vector<32x64xf32> to vector<32x64xbf16>
    %c0_74 = arith.constant 0 : index
    %c50 = arith.constant 50 : index
    %348 = vector.load %arg1[%c0_74, %c50] : memref<32x65xi32, #tpu.memory_space<vmem>>, vector<32x1xi32>
    %349 = vector.broadcast %348 : vector<32x1xi32> to vector<32x64xi32>
    %350 = arith.cmpi eq, %0, %349 : vector<32x64xi32>
    %351 = arith.extui %350 : vector<32x64xi1> to vector<32x64xi32>
    %352 = arith.sitofp %351 : vector<32x64xi32> to vector<32x64xf32>
    %353 = arith.truncf %352 : vector<32x64xf32> to vector<32x64xbf16>
    %c0_75 = arith.constant 0 : index
    %c51 = arith.constant 51 : index
    %354 = vector.load %arg1[%c0_75, %c51] : memref<32x65xi32, #tpu.memory_space<vmem>>, vector<32x1xi32>
    %355 = vector.broadcast %354 : vector<32x1xi32> to vector<32x64xi32>
    %356 = arith.cmpi eq, %0, %355 : vector<32x64xi32>
    %357 = arith.extui %356 : vector<32x64xi1> to vector<32x64xi32>
    %358 = arith.sitofp %357 : vector<32x64xi32> to vector<32x64xf32>
    %359 = arith.truncf %358 : vector<32x64xf32> to vector<32x64xbf16>
    %360 = tpu.concatenate %341, %347, %353, %359 in 1 : vector<32x64xbf16>, vector<32x64xbf16>, vector<32x64xbf16>, vector<32x64xbf16> -> vector<32x256xbf16>
    %c3072 = arith.constant 3072 : index
    %c0_76 = arith.constant 0 : index
    %361 = vector.load %arg2[%c3072, %c0_76] : memref<4160x128xbf16, #tpu.memory_space<vmem>>, vector<256x128xbf16>
    %cst_77 = arith.constant dense<0.000000e+00> : vector<32x128xf32>
    %362 = tpu.matmul %360, %361, %cst_77 {dimension_numbers = #tpu.dot_dimension_numbers<[1], [0], [0], [1], [0, 0, 1, 1], [], []>} : vector<32x256xbf16>, vector<256x128xbf16>, vector<32x128xf32> -> vector<32x128xf32>
    %363 = arith.addf %335, %362 : vector<32x128xf32>
    %c0_78 = arith.constant 0 : index
    %c52 = arith.constant 52 : index
    %364 = vector.load %arg1[%c0_78, %c52] : memref<32x65xi32, #tpu.memory_space<vmem>>, vector<32x1xi32>
    %365 = vector.broadcast %364 : vector<32x1xi32> to vector<32x64xi32>
    %366 = arith.cmpi eq, %0, %365 : vector<32x64xi32>
    %367 = arith.extui %366 : vector<32x64xi1> to vector<32x64xi32>
    %368 = arith.sitofp %367 : vector<32x64xi32> to vector<32x64xf32>
    %369 = arith.truncf %368 : vector<32x64xf32> to vector<32x64xbf16>
    %c0_79 = arith.constant 0 : index
    %c53 = arith.constant 53 : index
    %370 = vector.load %arg1[%c0_79, %c53] : memref<32x65xi32, #tpu.memory_space<vmem>>, vector<32x1xi32>
    %371 = vector.broadcast %370 : vector<32x1xi32> to vector<32x64xi32>
    %372 = arith.cmpi eq, %0, %371 : vector<32x64xi32>
    %373 = arith.extui %372 : vector<32x64xi1> to vector<32x64xi32>
    %374 = arith.sitofp %373 : vector<32x64xi32> to vector<32x64xf32>
    %375 = arith.truncf %374 : vector<32x64xf32> to vector<32x64xbf16>
    %c0_80 = arith.constant 0 : index
    %c54 = arith.constant 54 : index
    %376 = vector.load %arg1[%c0_80, %c54] : memref<32x65xi32, #tpu.memory_space<vmem>>, vector<32x1xi32>
    %377 = vector.broadcast %376 : vector<32x1xi32> to vector<32x64xi32>
    %378 = arith.cmpi eq, %0, %377 : vector<32x64xi32>
    %379 = arith.extui %378 : vector<32x64xi1> to vector<32x64xi32>
    %380 = arith.sitofp %379 : vector<32x64xi32> to vector<32x64xf32>
    %381 = arith.truncf %380 : vector<32x64xf32> to vector<32x64xbf16>
    %c0_81 = arith.constant 0 : index
    %c55 = arith.constant 55 : index
    %382 = vector.load %arg1[%c0_81, %c55] : memref<32x65xi32, #tpu.memory_space<vmem>>, vector<32x1xi32>
    %383 = vector.broadcast %382 : vector<32x1xi32> to vector<32x64xi32>
    %384 = arith.cmpi eq, %0, %383 : vector<32x64xi32>
    %385 = arith.extui %384 : vector<32x64xi1> to vector<32x64xi32>
    %386 = arith.sitofp %385 : vector<32x64xi32> to vector<32x64xf32>
    %387 = arith.truncf %386 : vector<32x64xf32> to vector<32x64xbf16>
    %388 = tpu.concatenate %369, %375, %381, %387 in 1 : vector<32x64xbf16>, vector<32x64xbf16>, vector<32x64xbf16>, vector<32x64xbf16> -> vector<32x256xbf16>
    %c3328 = arith.constant 3328 : index
    %c0_82 = arith.constant 0 : index
    %389 = vector.load %arg2[%c3328, %c0_82] : memref<4160x128xbf16, #tpu.memory_space<vmem>>, vector<256x128xbf16>
    %cst_83 = arith.constant dense<0.000000e+00> : vector<32x128xf32>
    %390 = tpu.matmul %388, %389, %cst_83 {dimension_numbers = #tpu.dot_dimension_numbers<[1], [0], [0], [1], [0, 0, 1, 1], [], []>} : vector<32x256xbf16>, vector<256x128xbf16>, vector<32x128xf32> -> vector<32x128xf32>
    %391 = arith.addf %363, %390 : vector<32x128xf32>
    %c0_84 = arith.constant 0 : index
    %c56 = arith.constant 56 : index
    %392 = vector.load %arg1[%c0_84, %c56] : memref<32x65xi32, #tpu.memory_space<vmem>>, vector<32x1xi32>
    %393 = vector.broadcast %392 : vector<32x1xi32> to vector<32x64xi32>
    %394 = arith.cmpi eq, %0, %393 : vector<32x64xi32>
    %395 = arith.extui %394 : vector<32x64xi1> to vector<32x64xi32>
    %396 = arith.sitofp %395 : vector<32x64xi32> to vector<32x64xf32>
    %397 = arith.truncf %396 : vector<32x64xf32> to vector<32x64xbf16>
    %c0_85 = arith.constant 0 : index
    %c57 = arith.constant 57 : index
    %398 = vector.load %arg1[%c0_85, %c57] : memref<32x65xi32, #tpu.memory_space<vmem>>, vector<32x1xi32>
    %399 = vector.broadcast %398 : vector<32x1xi32> to vector<32x64xi32>
    %400 = arith.cmpi eq, %0, %399 : vector<32x64xi32>
    %401 = arith.extui %400 : vector<32x64xi1> to vector<32x64xi32>
    %402 = arith.sitofp %401 : vector<32x64xi32> to vector<32x64xf32>
    %403 = arith.truncf %402 : vector<32x64xf32> to vector<32x64xbf16>
    %c0_86 = arith.constant 0 : index
    %c58 = arith.constant 58 : index
    %404 = vector.load %arg1[%c0_86, %c58] : memref<32x65xi32, #tpu.memory_space<vmem>>, vector<32x1xi32>
    %405 = vector.broadcast %404 : vector<32x1xi32> to vector<32x64xi32>
    %406 = arith.cmpi eq, %0, %405 : vector<32x64xi32>
    %407 = arith.extui %406 : vector<32x64xi1> to vector<32x64xi32>
    %408 = arith.sitofp %407 : vector<32x64xi32> to vector<32x64xf32>
    %409 = arith.truncf %408 : vector<32x64xf32> to vector<32x64xbf16>
    %c0_87 = arith.constant 0 : index
    %c59 = arith.constant 59 : index
    %410 = vector.load %arg1[%c0_87, %c59] : memref<32x65xi32, #tpu.memory_space<vmem>>, vector<32x1xi32>
    %411 = vector.broadcast %410 : vector<32x1xi32> to vector<32x64xi32>
    %412 = arith.cmpi eq, %0, %411 : vector<32x64xi32>
    %413 = arith.extui %412 : vector<32x64xi1> to vector<32x64xi32>
    %414 = arith.sitofp %413 : vector<32x64xi32> to vector<32x64xf32>
    %415 = arith.truncf %414 : vector<32x64xf32> to vector<32x64xbf16>
    %416 = tpu.concatenate %397, %403, %409, %415 in 1 : vector<32x64xbf16>, vector<32x64xbf16>, vector<32x64xbf16>, vector<32x64xbf16> -> vector<32x256xbf16>
    %c3584 = arith.constant 3584 : index
    %c0_88 = arith.constant 0 : index
    %417 = vector.load %arg2[%c3584, %c0_88] : memref<4160x128xbf16, #tpu.memory_space<vmem>>, vector<256x128xbf16>
    %cst_89 = arith.constant dense<0.000000e+00> : vector<32x128xf32>
    %418 = tpu.matmul %416, %417, %cst_89 {dimension_numbers = #tpu.dot_dimension_numbers<[1], [0], [0], [1], [0, 0, 1, 1], [], []>} : vector<32x256xbf16>, vector<256x128xbf16>, vector<32x128xf32> -> vector<32x128xf32>
    %419 = arith.addf %391, %418 : vector<32x128xf32>
    %c0_90 = arith.constant 0 : index
    %c60 = arith.constant 60 : index
    %420 = vector.load %arg1[%c0_90, %c60] : memref<32x65xi32, #tpu.memory_space<vmem>>, vector<32x1xi32>
    %421 = vector.broadcast %420 : vector<32x1xi32> to vector<32x64xi32>
    %422 = arith.cmpi eq, %0, %421 : vector<32x64xi32>
    %423 = arith.extui %422 : vector<32x64xi1> to vector<32x64xi32>
    %424 = arith.sitofp %423 : vector<32x64xi32> to vector<32x64xf32>
    %425 = arith.truncf %424 : vector<32x64xf32> to vector<32x64xbf16>
    %c0_91 = arith.constant 0 : index
    %c61 = arith.constant 61 : index
    %426 = vector.load %arg1[%c0_91, %c61] : memref<32x65xi32, #tpu.memory_space<vmem>>, vector<32x1xi32>
    %427 = vector.broadcast %426 : vector<32x1xi32> to vector<32x64xi32>
    %428 = arith.cmpi eq, %0, %427 : vector<32x64xi32>
    %429 = arith.extui %428 : vector<32x64xi1> to vector<32x64xi32>
    %430 = arith.sitofp %429 : vector<32x64xi32> to vector<32x64xf32>
    %431 = arith.truncf %430 : vector<32x64xf32> to vector<32x64xbf16>
    %c0_92 = arith.constant 0 : index
    %c62 = arith.constant 62 : index
    %432 = vector.load %arg1[%c0_92, %c62] : memref<32x65xi32, #tpu.memory_space<vmem>>, vector<32x1xi32>
    %433 = vector.broadcast %432 : vector<32x1xi32> to vector<32x64xi32>
    %434 = arith.cmpi eq, %0, %433 : vector<32x64xi32>
    %435 = arith.extui %434 : vector<32x64xi1> to vector<32x64xi32>
    %436 = arith.sitofp %435 : vector<32x64xi32> to vector<32x64xf32>
    %437 = arith.truncf %436 : vector<32x64xf32> to vector<32x64xbf16>
    %c0_93 = arith.constant 0 : index
    %c63 = arith.constant 63 : index
    %438 = vector.load %arg1[%c0_93, %c63] : memref<32x65xi32, #tpu.memory_space<vmem>>, vector<32x1xi32>
    %439 = vector.broadcast %438 : vector<32x1xi32> to vector<32x64xi32>
    %440 = arith.cmpi eq, %0, %439 : vector<32x64xi32>
    %441 = arith.extui %440 : vector<32x64xi1> to vector<32x64xi32>
    %442 = arith.sitofp %441 : vector<32x64xi32> to vector<32x64xf32>
    %443 = arith.truncf %442 : vector<32x64xf32> to vector<32x64xbf16>
    %444 = tpu.concatenate %425, %431, %437, %443 in 1 : vector<32x64xbf16>, vector<32x64xbf16>, vector<32x64xbf16>, vector<32x64xbf16> -> vector<32x256xbf16>
    %c3840 = arith.constant 3840 : index
    %c0_94 = arith.constant 0 : index
    %445 = vector.load %arg2[%c3840, %c0_94] : memref<4160x128xbf16, #tpu.memory_space<vmem>>, vector<256x128xbf16>
    %cst_95 = arith.constant dense<0.000000e+00> : vector<32x128xf32>
    %446 = tpu.matmul %444, %445, %cst_95 {dimension_numbers = #tpu.dot_dimension_numbers<[1], [0], [0], [1], [0, 0, 1, 1], [], []>} : vector<32x256xbf16>, vector<256x128xbf16>, vector<32x128xf32> -> vector<32x128xf32>
    %447 = arith.addf %419, %446 : vector<32x128xf32>
    %c0_96 = arith.constant 0 : index
    %c64 = arith.constant 64 : index
    %448 = vector.load %arg1[%c0_96, %c64] : memref<32x65xi32, #tpu.memory_space<vmem>>, vector<32x1xi32>
    %449 = vector.broadcast %448 : vector<32x1xi32> to vector<32x64xi32>
    %450 = arith.cmpi eq, %0, %449 : vector<32x64xi32>
    %451 = arith.extui %450 : vector<32x64xi1> to vector<32x64xi32>
    %452 = arith.sitofp %451 : vector<32x64xi32> to vector<32x64xf32>
    %453 = arith.truncf %452 : vector<32x64xf32> to vector<32x64xbf16>
    %c4096 = arith.constant 4096 : index
    %c0_97 = arith.constant 0 : index
    %454 = vector.load %arg2[%c4096, %c0_97] : memref<4160x128xbf16, #tpu.memory_space<vmem>>, vector<64x128xbf16>
    %cst_98 = arith.constant dense<0.000000e+00> : vector<32x128xf32>
    %455 = tpu.matmul %453, %454, %cst_98 {dimension_numbers = #tpu.dot_dimension_numbers<[1], [0], [0], [1], [0, 0, 1, 1], [], []>} : vector<32x64xbf16>, vector<64x128xbf16>, vector<32x128xf32> -> vector<32x128xf32>
    %456 = arith.addf %447, %455 : vector<32x128xf32>
    %c0_99 = arith.constant 0 : index
    %c0_100 = arith.constant 0 : index
    %457 = vector.load %arg3[%c0_99, %c0_100] : memref<1x128xf32, #tpu.memory_space<vmem>>, vector<1x128xf32>
    %458 = vector.broadcast %457 : vector<1x128xf32> to vector<32x128xf32>
    %459 = arith.addf %456, %458 : vector<32x128xf32>
    %c0_101 = arith.constant 0 : index
    %c0_102 = arith.constant 0 : index
    %460 = vector.load %arg4[%c0_101, %c0_102] : memref<32x128xf32, #tpu.memory_space<vmem>>, vector<32x128xf32>
    tpu.vector_store %arg4[%c0_101, %c0_102], %459 {strides = array<i32>} : memref<32x128xf32, #tpu.memory_space<vmem>>, vector<32x128xf32>,
    return
  }
  func.func @transform_0(%arg0: i32) -> (i32, i32) {
    %c0_i32 = arith.constant 0 : i32
    %c0_i32_0 = arith.constant 0 : i32
    return %arg0, %c0_i32 : i32, i32
  }
  func.func @transform_1(%arg0: i32) -> (i32, i32) {
    %c0_i32 = arith.constant 0 : i32
    %c0_i32_0 = arith.constant 0 : i32
    %c0_i32_1 = arith.constant 0 : i32
    return %c0_i32, %c0_i32_0 : i32, i32
  }
  func.func @transform_2(%arg0: i32) -> (i32, i32) {
    %c0_i32 = arith.constant 0 : i32
    %c0_i32_0 = arith.constant 0 : i32
    %c0_i32_1 = arith.constant 0 : i32
    return %c0_i32, %c0_i32_0 : i32, i32
  }
  func.func @transform_3(%arg0: i32) -> (i32, i32) {
    %c0_i32 = arith.constant 0 : i32
    %c0_i32_0 = arith.constant 0 : i32
    return %arg0, %c0_i32 : i32, i32
  }
}

</mosaic_0001>

<bundles_post_ra>
// kernel: tpu_custom_call.1
= control target key start
LH: loop header
LB: loop body
LE: loop exit
PB: predicated region body
PF: predicated region fallthrough
CT: control target
= control target key end

     0   :  { %8 = vsyncpa [#allocation3], 0  ;;  %s9078_s0 = inlined_call_operand.hbm [shape: s32[37,65], index: 0, kind: input, shape index: {}]   ;;  %s9079_s1 = inlined_call_operand.hbm [shape: bf16[4160,128], index: 1, kind: input, shape index: {}]   ;;  %s9080_s2 = inlined_call_operand.hbm [shape: f32[1,128], index: 2, kind: input, shape index: {}]   ;;  %s9081_s3 = inlined_call_operand.hbm [shape: f32[37,128], index: 3, kind: output, shape index: {}]  }
   0x1   :  { %10 = vsyncpa [#allocation3 + $0x1], 0 }
   0x2   :  { %11 = vsyncpa [#allocation6], 0 }
   0x3   :  { %12 = vsyncpa [#allocation4], 0 }
   0x4   :  { %14 = vsyncpa [#allocation4 + $0x1], 0  ;;  %s7314_s12 = smov 0   ;;  %s7316_s13 = smov 0  }
   0x5   :  { %s7318_s14 = smov 0   ;;  %s7320_s15 = smov 0  }
   0x6 LB: > { %s7335_s16 = sadd.s32 4294967295, %s7215_s15   ;;  %s5484_s17 = sadd.s32 4294967294, %s7215_s15   ;;  %s7215_s15 = sphi %s7320_s15, %s9101_s15   ;;  %s7211_s14 = sphi %s7318_s14, %s9100_s14   ;;  %s7207_s13 = sphi %s7316_s13, %s9099_s13   ;;  %s7203_s12 = sphi %s7314_s12, %s9098_s12  }
   0x7   : > { %s7339_s18 = sadd.s32 1, %s7215_s15   ;;  %s27_s19 = sadd.s32 1, %s7211_s14 }
   0x8   : > { %s24_s20 = ssub.s32 %s7215_s15, %s7339_s18  ;;  %p34_p0 = scmp.ne.s32.totalorder %s7211_s14, %s7207_s13 }
   0x9   : > { %p25_p1 = scmp.eq.s32.totalorder %s24_s20, 0  ;;  %p35_p2 = scmp.eq.s32.totalorder %s7215_s15, 0 }
   0xa   : > { %p40_p3 = scmp.ne.s32.totalorder %s7207_s13, %s7203_s12  ;;  %p9082_p4 = scmp.eq.s32.totalorder %s7335_s16, 0 }
   0xb   : > { %s7351_s21 = scalar_select %p25_p1, %s7211_s14, %s27_s19  }
   0xc   : > { %p7353_p5 = por %p35_p2, %p34_p0  ;;  %p7359_p6 = por %p9082_p4, %p40_p3 }
   0xd   : > { %p106_p7 = scmp.eq.s32.totalorder %s7335_s16, 1  ;;  %p112_p8 = scmp.eq.s32.totalorder %s5484_s17, 1 }
   0xe   : > { %s9085_s22 = scalar_select %p7353_p5, 1, 0 }
   0xf   : > { %s9086_s23 = scalar_select %p7359_p6, 1, 0 }
  0x10   : > { %p5485_p9 = scmp.ge.s32.totalorder %s7215_s15, 1  ;;  %p119_p10 = scmp.lt.s32.totalorder %s7215_s15, 3 }
  0x11   : > { %p7366_p11 = por %p106_p7, %p34_p0  ;;  %p7370_p12 = por %p112_p8, %p40_p3 }
  0x12   : > { %p7374_p13 = pnand %p5485_p9, %p119_p10  ;;  %s7217_s27 = smov [#allocation5]  }
  0x13   : > { %s9087_s24 = scalar_select %p7366_p11, 1, 0 }
  0x14   : > { %s9088_s25 = scalar_select %p7370_p12, 1, 0 }
  0x15   : > { %s9089_s26 = scalar_select %p7374_p13, 1, 0 }
  0x16   : > { %p6511_p1 = pneg %p7374_p13  ;;  %s131_s28 = sshll.u32 %s7217_s27, 4  ;;  %s132_s28 = int_to_ptr.vmem [resolvable:$true] %s131_s28 }
  0x17   : > { %s7218_s30 = smov [#allocation7]   ;;  %s7061_s7 = scalar_lea.hbm %s9079_s1, 33280 }
  0x18   : > { %p7382_p2 = pnand %p6511_p1, %p9082_p4  ;;  %s145_s4 = sshll.u32 %s7218_s30, 4  ;;  %s7386_s4 = int_to_ptr.vmem [resolvable:$true] %s145_s4 }
  0x19   : > { %p7062_p0 = scmp.ne.s32.totalorder %s9079_s1, %s7061_s7  ;;  %p7068_p9 = scmp.lt.u32.totalorder %s7061_s7, %s9079_s1 }
  0x1a   : > { %p7063_p3 = pneg %p7382_p2 }
  0x1c   : > { %p7064_p7 = pnand %p7063_p3, %p7062_p0 }
  0x1e   : > { %p7065_p8 = pneg %p7064_p7 }
  0x20   : > { %p7070_p10 = pnand %p7068_p9, %p7065_p8 }
  0x22   : > { %7073 = shalt.err (!%p7070_p10)
}
  0x23   : > { %s7074_s17 = scalar_lea.vmem %s132_s28, 33280  ;;  %p7082_p11 = scmp.lt.s32.totalorder %s132_s28, %s132_s28 }
  0x24   : > { %p7075_p1 = scmp.ne.s32.totalorder %s132_s28, %s7074_s17  ;;  %p7083_p6 = scmp.lt.s32.totalorder %s7074_s17, %s7074_s17 }
  0x26   : > { %p7077_p4 = pnand %p7075_p1, %p7063_p3  ;;  %p7084_p13 = por %p7083_p6, %p7082_p11 }
  0x28   : > { %p7078_p12 = pneg %p7077_p4 }
  0x2a   : > { %p7085_p5 = pnand %p7084_p13, %p7078_p12 }
  0x2c   : > { %7088 = shalt.err (!%p7085_p5)
}
  0x2d   : > { %s7219_s19 = smov 64   ;;  %s7220_s20 = smov 4  }
  0x2e   : > { %6514 = dma.hbm_to_vmem [thread:$0]  (!%p7382_p2), %s9079_s1, 33280, %s132_s28, [#allocation6], %s7219_s19, %s7219_s19, %s7220_s20  }
  0x2f   : > { %s7089_s7 = scalar_lea.hbm %s9080_s2, 16 }
  0x30   : > { %p7090_p4 = scmp.ne.s32.totalorder %s9080_s2, %s7089_s7  ;;  %p7096_p11 = scmp.lt.u32.totalorder %s7089_s7, %s9080_s2 }
  0x32   : > { %p7092_p5 = pnand %p7090_p4, %p7063_p3 }
  0x34   : > { %p7093_p6 = pneg %p7092_p5 }
  0x36   : > { %p7098_p12 = pnand %p7096_p11, %p7093_p6 }
  0x38   : > { %7101 = shalt.err (!%p7098_p12)
}
  0x39   : > { %s7102_s28 = scalar_lea.vmem %s7386_s4, 16  ;;  %s7109_s17 = scalar_lea.vmem %s7386_s4, 32 }
  0x3a   : > { %p7103_p13 = scmp.ne.s32.totalorder %s7386_s4, %s7102_s28  ;;  %p7110_p8 = scmp.lt.s32.totalorder %s7386_s4, %s7386_s4 }
  0x3b   : > { %p7111_p9 = scmp.lt.s32.totalorder %s7109_s17, %s7102_s28 }
  0x3c   : > { %p7105_p0 = pnand %p7103_p13, %p7063_p3 }
  0x3d   : > { %p7112_p10 = por %p7111_p9, %p7110_p8 }
  0x3e   : > { %p7106_p7 = pneg %p7105_p0 }
  0x40   : > { %p7113_p1 = pnand %p7112_p10, %p7106_p7 }
  0x42   : > { %7116 = shalt.err (!%p7113_p1)
}
  0x43   : > { %6517 = dma.hbm_to_vmem [thread:$0]  (!%p7382_p2), %s9080_s2, 16, %s7386_s4, [#allocation6]  }
  0x44   : > { %p5488_p4 = scmp.ge.s32.totalorder %s7215_s15, 2 }
  0x45   : > { %p9091_p3 = scmp.ne.s32.totalorder (!%p5488_p4), %s9085_s22, 0 }
  0x46   : > { %152 = sbr.rel (%p5488_p4) target bundleno = 112 (0x70), region = 24 }
  0x4d   : > { %155 = sbr.rel (!%p9091_p3) target bundleno = 112 (0x70), region = 28  ;;  %s156_s27 = sand.u32 (%p9091_p3), 1, %s7211_s14  }
  0x4e   : > { %s5490_s30 = sshll.u32 (%p9091_p3), %s7215_s15, 2  ;;  %s5489_s5 = sshll.u32 (%p9091_p3), %s156_s27, 5 }
  0x4f   : > { %s162_s6 = ssub.s32 (%p9091_p3), 5, %s5490_s30  ;;  %s7446_s7 = scalar_lea.sflag (%p9091_p3), [#allocation3], %s156_s27 }
  0x50   : > { %p163_p5 = scmp.lt.s32.totalorder (%p9091_p3), %s162_s6, 4  ;;  %s160_s8 = scalar_lea.vmem (%p9091_p3), [#allocation2], %s5489_s5 }
  0x54   : > { %s9103_s6 = smov (!%p163_p5, %s162_s6), 4 }
  0x55   : > { %s7443_s29 = sshll.u32 %s9103_s6, 7 }
  0x56   : > { %s167_s4 = ssub.s32 512, %s7443_s29 }
  0x57   : > { %168 = vsyncadd %s7446_s7, %s167_s4  ;;  %p5492_p2 = scmp.ne.s32.totalorder %s7443_s29, 0  ;;  %s6033_s22 = sshll.u32 %s7215_s15, 9 }
  0x58   : > { %s7454_s11 = scalar_lea.hbm %s9078_s0, %s6033_s22  ;;  %s173_s28 = sshll.u32 %s160_s8, 4  ;;  %s7456_s28 = int_to_ptr.vmem [resolvable:$true] %s173_s28 }
  0x59   : > { %s7117_s17 = scalar_lea.hbm %s7454_s11, %s7443_s29  ;;  %s7121_s27 = scalar_lea.hbm %s9078_s0, 640 }
  0x5a   : > { %p7118_p6 = scmp.ne.s32.totalorder %s7454_s11, %s7117_s17  ;;  %p7122_p13 = scmp.lt.u32.totalorder %s7454_s11, %s9078_s0 }
  0x5b   : > { %p7123_p0 = scmp.lt.u32.totalorder %s7121_s27, %s7117_s17  ;;  %p7125_p8 = scmp.lt.u32.totalorder %s7117_s17, %s7454_s11 }
  0x5c   : > { %p7119_p11 = pnand %p7118_p6, %p5492_p2 }
  0x5d   : > { %p7124_p7 = por %p7123_p0, %p7122_p13 }
  0x5e   : > { %p7120_p12 = pneg %p7119_p11 }
  0x5f   : > { %p7126_p9 = por %p7125_p8, %p7124_p7 }
  0x61   : > { %p7127_p10 = pnand %p7126_p9, %p7120_p12 }
  0x63   : > { %7130 = shalt.err (!%p7127_p10)
}
  0x64   : > { %s7131_s6 = scalar_lea.vmem %s7456_s28, %s7443_s29  ;;  %s7221_s4 = smov [#allocation2]  }
  0x65   : > { %p7132_p1 = scmp.ne.s32.totalorder %s7456_s28, %s7131_s6  ;;  %s7135_s8 = sshll.u32 %s7221_s4, 4  ;;  %s7136_s8 = int_to_ptr.vmem [resolvable:$false] %s7135_s8 }
  0x66   : > { %s7137_s22 = scalar_lea.vmem %s7136_s8, 1024  ;;  %p7138_p6 = scmp.lt.s32.totalorder %s7456_s28, %s7136_s8 }
  0x67   : > { %p7133_p3 = pnand %p7132_p1, %p5492_p2  ;;  %p7139_p11 = scmp.lt.s32.totalorder %s7137_s22, %s7131_s6 }
  0x69   : > { %p7134_p5 = pneg %p7133_p3  ;;  %p7140_p13 = por %p7139_p11, %p7138_p6 }
  0x6b   : > { %p7141_p0 = pnand %p7140_p13, %p7134_p5 }
  0x6d   : > { %7144 = shalt.err (!%p7141_p0)
}
  0x6e   : > { %s7222_s9 = smov 128   ;;  %s7223_s10 = smov 8  }
  0x6f   : > { %179 = dma.hbm_to_vmem [thread:$0]  (%p5492_p2), %s7454_s11, %s7443_s29, %s7456_s28, %s7446_s7, %s7222_s9, %s7222_s9, %s7223_s10  }
  0x70 PF: > { %p9092_p12 = scmp.ne.s32.totalorder %s9089_s26, 0 }
  0x71   : > { %s7486_s17 = sand.u32 (!%p9092_p12), 1, %s7207_s13   ;;  %p9093_p7 = scmp.ne.s32.totalorder (!%p9092_p12), %s9086_s23, 0 }
  0x72   : > { %185 = sbr.rel (%p9092_p12) target bundleno = 2312 (0x908), region = 32  ;;  %s5497_s19 = sshll.u32 (!%p9092_p12), %s7486_s17, 5 }
  0x73   : > { %s188_s20 = scalar_lea.sflag (!%p9092_p12), [#allocation3], %s7486_s17  ;;  %s7492_s27 = scalar_lea.vmem (!%p9092_p12), [#allocation2], %s5497_s19 }
  0x79   : > { %7190 = dma.done.wait (%p9093_p7), %s188_s20, 512  }
  0x7a   : > { %7192 = vsyncadd (%p9093_p7), %s188_s20, 4294966784  ;;  %p9094_p2 = scmp.eq.s32.totalorder %s7335_s16, 0 }
  0x7c   : > { %7194 = dma.done.wait (%p9094_p2), [#allocation6], 33296   ;;  %p9095_p8 = pmov %p9094_p2 }
  0x7d   : > { %v7224_v0 = vmov 0   ;;  %v7503_v1 = vld [vmem:[%s7492_s27 + $0x10] sm:$0xff]  ;;  %v7506_v2 = vld [vmem:[%s7492_s27] sm:$0xff]  ;;  %v7509_v3 = vld [vmem:[%s7492_s27 + $0x18] sm:$0xff]  ;;  %v7225_v5 = vmov 1   ;;  %v7226_v6 = vmov 2   ;;  %v233_v26 = vlaneseq }
  0x7e   : > { %7196 = vsyncadd (%p9095_p8), [#allocation6], 4294934000  ;;  %6635 = vset.pattern.permute.xlu1 %v7224_v0  ;;  %6634 = vset.pattern.permute.xlu0 %v7224_v0  ;;  %v7514_v4 = vld [vmem:[%s7492_s27 + $0x8] sm:$0xff]  ;;  %v7227_v7 = vmov 3   ;;  %v7228_v8 = vmov 4   ;;  %v7229_v9 = vmov 5  }
  0x7f   : > { %246 = vperm.xlu1 %6635, %v7503_v1   ;;  %240 = vperm.xlu0 %6634, %v7506_v2   ;;  %v7230_v10 = vmov 6   ;;  %v7231_v11 = vmov 7   ;;  %v7232_v12 = vmov 8   ;;  %v7233_v13 = vmov 9   ;;  %v6786_v17 = vld [vmem:[#allocation5 + $0x40] sm:$0xff]   ;;  %v6788_v19 = vld [vmem:[#allocation5 + $0x48] sm:$0xff]  }
  0x80   : > { %v7234_v14 = vmov 10   ;;  %v7235_v15 = vmov 11   ;;  %v7236_v16 = vmov 12   ;;  %v6787_v18 = vld [vmem:[#allocation5] sm:$0xff]   ;;  %6063 = vmatprep.subr.bf16.mxu1 %v6786_v17  ;;  %v6789_v20 = vld [vmem:[#allocation5 + $0x8] sm:$0xff]   ;;  %v6790_v21 = vld [vmem:[#allocation5 + $0x50] sm:$0xff]  }
  0x81   : > { %6064 = vmatpush3.bf16.msra.mxu1 %v6787_v18  ;;  %v6791_v24 = vld [vmem:[#allocation5 + $0x10] sm:$0xff]   ;;  %v6792_v25 = vld [vmem:[#allocation5 + $0x58] sm:$0xff]   ;;  %v6794_v30 = vld [vmem:[#allocation5 + $0x60] sm:$0xff]   ;;  %v7571_v31 = vand.u32 127, %v233_v26  ;;  %v7237_v36 = vmov 0.0   ;;  %s7238_s23 = smov 64  }
  0x82   : > { %6065 = vmatprep.subr.bf16.mxu1 %v6788_v19  ;;  %v6793_v29 = vld [vmem:[#allocation5 + $0x18] sm:$0xff]   ;;  %v6795_v32 = vld [vmem:[#allocation5 + $0x20] sm:$0xff]   ;;  %v6796_v35 = vld [vmem:[#allocation5 + $0x68] sm:$0xff]   ;;  %s221_s26 = scalar_lea.vmem [#allocation8], %s5497_s19  ;;  %s5373_s29 = scalar_lea.sflag [#allocation4], %s7486_s17 }
  0x83   : > { %249 = vperm.xlu1 %6635, %v7509_v3   ;;  %243 = vperm.xlu0 %6634, %v7514_v4   ;;  %v6797_v40 = vld [vmem:[#allocation5 + $0x28] sm:$0xff]   ;;  %v6798_v43 = vld [vmem:[#allocation5 + $0x70] sm:$0xff]   ;;  %v6800_v49 = vld [vmem:[#allocation5 + $0x78] sm:$0xff]   ;;  %p9096_p9 = scmp.ne.s32.totalorder %s9087_s24, 0 }
  0x84   : > { %v6799_v47 = vld [vmem:[#allocation5 + $0x30] sm:$0xff]   ;;  %v6801_v50 = vld [vmem:[#allocation5 + $0x38] sm:$0xff]   ;;  %v6802_v62 = vld [vmem:[#allocation5 + $0xc0] sm:$0xff]   ;;  %s6025_s7 = sshll.u32 (%p9096_p9), %s7335_s16, 2 }
  0x85   : > { %6066 = vmatpush3.bf16.msra.mxu1 %v6789_v20  ;;  %v6803_v63 = vld [vmem:[#allocation5 + $0x80] sm:$0xff]   ;;  %v6804_v0 = vld [vmem:[#allocation5 + $0xc8] sm:$0xff]   ;;  %6035 = vmatprep.subr.bf16.mxu0 %v6802_v62  ;;  %s5381_s11 = ssub.s32 (%p9096_p9), 5, %s6025_s7 }
  0x86   : > { %6067 = vmatprep.subr.bf16.mxu1 %v6790_v21  ;;  %6036 = vmatpush3.bf16.msra.mxu0 %v6803_v63  ;;  %v6813_v19 = vld [vmem:[#allocation5 + $0xa8] sm:$0xff]   ;;  %v6814_v21 = vld [vmem:[#allocation5 + $0xf0] sm:$0xff]   ;;  %p5382_p10 = scmp.lt.s32.totalorder (%p9096_p9), %s5381_s11, 4 }
  0x87   : > { %6637 = vset.pattern.permute.xlu1 %v7225_v5  ;;  %6636 = vset.pattern.permute.xlu0 %v7225_v5 }
  0x88   : > { %269 = vperm.xlu1 %6637, %v7514_v4   ;;  %266 = vperm.xlu0 %6636, %v7506_v2  }
  0x89   : > { %6068 = vmatpush3.bf16.msra.mxu1 %v6791_v24  ;;  %6037 = vmatprep.subr.bf16.mxu0 %v6804_v0 }
  0x8a   : > { %6069 = vmatprep.subr.bf16.mxu1 %v6792_v25 }
  0x8c   : > { %272 = vperm.xlu1 %6637, %v7503_v1   ;;  %275 = vperm.xlu0 %6636, %v7509_v3  }
  0x8d   : > { %6070 = vmatpush3.bf16.msra.mxu1 %v6793_v29  ;;  %v6815_v29 = vld [vmem:[#allocation5 + $0xb0] sm:$0xff]  }
  0x8e   : > { %6071 = vmatprep.subr.bf16.mxu1 %v6794_v30 }
  0x90   : > { %6638 = vset.pattern.permute.xlu1 %v7226_v6  ;;  %6639 = vset.pattern.permute.xlu0 %v7226_v6  ;;  %v6806_v6 = vld [vmem:[#allocation5 + $0xd0] sm:$0xff]  }
  0x91   : > { %292 = vperm.xlu1 %6638, %v7506_v2   ;;  %295 = vperm.xlu0 %6639, %v7514_v4  }
  0x92   : > { %6072 = vmatpush3.bf16.msra.mxu1 %v6795_v32  ;;  %v6816_v32 = vld [vmem:[#allocation5 + $0xf8] sm:$0xff]  }
  0x93   : > { %6073 = vmatprep.subr.bf16.mxu1 %v6796_v35  ;;  %v6817_v35 = vld [vmem:[#allocation5 + $0xb8] sm:$0xff]  }
  0x95   : > { %298 = vperm.xlu1 %6638, %v7503_v1   ;;  %6640 = vset.pattern.permute.xlu0 %v7227_v7 }
  0x96   : > { %318 = vperm.xlu0 %6640, %v7506_v2   ;;  %6074 = vmatpush3.bf16.msra.mxu1 %v6797_v40 }
  0x97   : > { %6075 = vmatprep.subr.bf16.mxu1 %v6798_v43 }
  0x99   : > { %301 = vperm.xlu1 %6638, %v7509_v3  }
  0x9a   : > { %327 = vperm.xlu0 %6640, %v7509_v3   ;;  %6076 = vmatpush3.bf16.msra.mxu1 %v6799_v47 }
  0x9b   : > { %6077 = vmatprep.subr.bf16.mxu1 %v6800_v49 }
  0x9d   : > { %6641 = vset.pattern.permute.xlu1 %v7227_v7 }
  0x9e   : > { %321 = vperm.xlu1 %6641, %v7514_v4   ;;  %6643 = vset.pattern.permute.xlu0 %v7228_v8 }
  0x9f   : > { %408 = vperm.xlu0 %6643, %v7514_v4   ;;  %6078 = vmatpush3.bf16.msra.mxu1 %v6801_v50 }
  0xa2   : > { %324 = vperm.xlu1 %6641, %v7503_v1  }
  0xa3   : > { %6644 = vset.pattern.permute.xlu0 %v7229_v9 }
  0xa4   : > { %431 = vperm.xlu0 %6644, %v7506_v2  }
  0xa6   : > { %6642 = vset.pattern.permute.xlu1 %v7228_v8  ;;  %v6807_v8 = vld [vmem:[#allocation5 + $0x90] sm:$0xff]  }
  0xa7   : > { %405 = vperm.xlu1 %6642, %v7506_v2  }
  0xa8   : > { %440 = vperm.xlu0 %6644, %v7509_v3  }
  0xab   : > { %411 = vperm.xlu1 %6642, %v7503_v1  }
  0xac   : > { %6647 = vset.pattern.permute.xlu0 %v7230_v10 }
  0xad   : > { %460 = vperm.xlu0 %6647, %v7514_v4  }
  0xaf   : > { %414 = vperm.xlu1 %6642, %v7509_v3  }
  0xb1   : > { %6648 = vset.pattern.permute.xlu0 %v7231_v11 }
  0xb2   : > { %483 = vperm.xlu0 %6648, %v7506_v2  }
  0xb3   : > { %6645 = vset.pattern.permute.xlu1 %v7229_v9 }
  0xb4   : > { %434 = vperm.xlu1 %6645, %v7514_v4  }
  0xb6   : > { %492 = vperm.xlu0 %6648, %v7509_v3  }
  0xb8   : > { %437 = vperm.xlu1 %6645, %v7503_v1  }
  0xba   : > { %6651 = vset.pattern.permute.xlu0 %v7232_v12 }
  0xbb   : > { %862 = vperm.xlu0 %6651, %v7514_v4  }
  0xbc   : > { %6646 = vset.pattern.permute.xlu1 %v7230_v10  ;;  %v6808_v10 = vld [vmem:[#allocation5 + $0xd8] sm:$0xff]  }
  0xbd   : > { %457 = vperm.xlu1 %6646, %v7506_v2  }
  0xbf   : > { %6652 = vset.pattern.permute.xlu0 %v7233_v13 }
  0xc0   : > { %885 = vperm.xlu0 %6652, %v7506_v2  }
  0xc1   : > { %463 = vperm.xlu1 %6646, %v7503_v1  }
  0xc4   : > { %894 = vperm.xlu0 %6652, %v7509_v3  }
  0xc5   : > { %466 = vperm.xlu1 %6646, %v7509_v3  }
  0xc8   : > { %6655 = vset.pattern.permute.xlu0 %v7234_v14 }
  0xc9   : > { %6649 = vset.pattern.permute.xlu1 %v7231_v11  ;;  %914 = vperm.xlu0 %6655, %v7514_v4  }
  0xca   : > { %486 = vperm.xlu1 %6649, %v7514_v4  }
  0xcd   : > { %6656 = vset.pattern.permute.xlu0 %v7235_v15 }
  0xce   : > { %489 = vperm.xlu1 %6649, %v7503_v1   ;;  %937 = vperm.xlu0 %6656, %v7506_v2  }
  0xd2   : > { %6650 = vset.pattern.permute.xlu1 %v7232_v12  ;;  %946 = vperm.xlu0 %6656, %v7509_v3   ;;  %v6809_v12 = vld [vmem:[#allocation5 + $0x98] sm:$0xff]  }
  0xd3   : > { %859 = vperm.xlu1 %6650, %v7506_v2  }
  0xd6   : > { %6659 = vset.pattern.permute.xlu0 %v7236_v16 }
  0xd7   : > { %865 = vperm.xlu1 %6650, %v7503_v1  }
  0xdb   : > { %868 = vperm.xlu1 %6650, %v7509_v3  }
  0xdf   : > { %6653 = vset.pattern.permute.xlu1 %v7233_v13  ;;  %v6810_v13 = vld [vmem:[#allocation5 + $0xe0] sm:$0xff]  }
  0xe0   : > { %888 = vperm.xlu1 %6653, %v7514_v4  }
  0xe4   : > { %891 = vperm.xlu1 %6653, %v7503_v1  }
  0xe8   : > { %6654 = vset.pattern.permute.xlu1 %v7234_v14  ;;  %v6811_v14 = vld [vmem:[#allocation5 + $0xa0] sm:$0xff]  }
  0xe9   : > { %911 = vperm.xlu1 %6654, %v7506_v2  }
  0xed   : > { %917 = vperm.xlu1 %6654, %v7503_v1  }
  0xf1   : > { %920 = vperm.xlu1 %6654, %v7509_v3  }
  0xf5   : > { %6657 = vset.pattern.permute.xlu1 %v7235_v15  ;;  %v6812_v15 = vld [vmem:[#allocation5 + $0xe8] sm:$0xff]  }
  0xf6   : > { %940 = vperm.xlu1 %6657, %v7514_v4  }
  0xfa   : > { %943 = vperm.xlu1 %6657, %v7503_v1  }
  0xfe   : > { %v7562_v22 = vpop.permute.xlu1 %246  ;;  %6658 = vset.pattern.permute.xlu1 %v7236_v16  ;;  %v7564_v23 = vpop.permute.xlu0 %240 }
  0xff   : > { %1172 = vperm.xlu1 %6658, %v7506_v2   ;;  %v6805_v2 = vld [vmem:[#allocation5 + $0x88] sm:$0xff]  }
 0x100   : > { %6038 = vmatpush3.bf16.msra.mxu0 %v6805_v2 }
 0x101   : > { %6039 = vmatprep.subr.bf16.mxu0 %v6806_v6 }
 0x102   : > { %v7567_v27 = vpop.permute.xlu1 %249  ;;  %v7569_v28 = vpop.permute.xlu0 %243 }
 0x104   : > { %6040 = vmatpush3.bf16.msra.mxu0 %v6807_v8 }
 0x105   : > { %6041 = vmatprep.subr.bf16.mxu0 %v6808_v10 }
 0x107   : > { %v270_v33 = vpop.permute.xlu1 %269  ;;  %v267_v34 = vpop.permute.xlu0 %266 }
 0x108   : > { %vm278_vm0 = vcmp.eq.s32.totalorder %v7571_v31, %v270_v33  ;;  %vm277_vm1 = vcmp.eq.s32.totalorder %v7571_v31, %v267_v34  ;;  %6042 = vmatpush3.bf16.msra.mxu0 %v6809_v12 }
 0x109   : > { %v5506_v37 = vsel %vm278_vm0, 1.0, %v7237_v36  ;;  %v5505_v38 = vsel %vm277_vm1, 1.0, %v7237_v36  ;;  %6043 = vmatprep.subr.bf16.mxu0 %v6810_v13 }
 0x10a   : > { %v289_v39 = vpack.c.bf16 %v5506_v37, %v5505_v38 }
 0x10b   : > { %v273_v41 = vpop.permute.xlu1 %272  ;;  %v276_v42 = vpop.permute.xlu0 %275 }
 0x10c   : > { %vm279_vm2 = vcmp.eq.s32.totalorder %v7571_v31, %v273_v41  ;;  %vm280_vm3 = vcmp.eq.s32.totalorder %v7571_v31, %v276_v42  ;;  %345 = vrot.lane.b32.xlu1 %v289_v39, %s7238_s23  ;;  %6044 = vmatpush3.bf16.msra.mxu0 %v6811_v14 }
 0x10d   : > { %v5507_v44 = vsel %vm279_vm2, 1.0, %v7237_v36  ;;  %v5508_v45 = vsel %vm280_vm3, 1.0, %v7237_v36  ;;  %6045 = vmatprep.subr.bf16.mxu0 %v6812_v15 }
 0x10e   : > { %v290_v46 = vpack.c.bf16 %v5508_v45, %v5507_v44  ;;  %v6818_v45 = vld [vmem:[#allocation5 + $0x140] sm:$0xff]  }
 0x110   : > { %v7582_v48 = vpop.permute.xlu1 %292  ;;  %347 = vrot.lane.b32.xlu0 %v290_v46, %s7238_s23  ;;  %v7585_v51 = vpop.permute.xlu0 %295  ;;  %6046 = vmatpush3.bf16.msra.mxu0 %v6813_v19 }
 0x111   : > { %6047 = vmatprep.subr.bf16.mxu0 %v6814_v21 }
 0x114   : > { %v7587_v52 = vpop.permute.xlu1 %298  ;;  %6048 = vmatpush3.bf16.msra.mxu0 %v6815_v29  ;;  %v7682_v29 = vld [vmem:[%s7492_s27 + $0x8] sm:$0xff] }
 0x115   : > { %v319_v53 = vpop.permute.xlu0 %318  ;;  %6049 = vmatprep.subr.bf16.mxu0 %v6816_v32  ;;  %v7687_v32 = vld [vmem:[%s7492_s27] sm:$0xff] }
 0x116   : > { %vm329_vm4 = vcmp.eq.s32.totalorder %v7571_v31, %v319_v53 }
 0x117   : > { %v5513_v55 = vsel %vm329_vm4, 1.0, %v7237_v36 }
 0x118   : > { %v7589_v54 = vpop.permute.xlu1 %301  ;;  %6050 = vmatpush3.bf16.msra.mxu0 %v6817_v35  ;;  %v7240_v35 = vmov 14  }
 0x119   : > { %v328_v56 = vpop.permute.xlu0 %327  ;;  %6091 = vmatprep.subr.bf16.mxu0 %v6818_v45 }
 0x11a   : > { %vm332_vm6 = vcmp.eq.s32.totalorder %v7571_v31, %v328_v56 }
 0x11b   : > { %v5516_v61 = vsel %vm332_vm6, 1.0, %v7237_v36 }
 0x11d   : > { %v322_v57 = vpop.permute.xlu1 %321 }
 0x11e   : > { %vm330_vm5 = vcmp.eq.s32.totalorder %v7571_v31, %v322_v57  ;;  %v7603_v5 = vpop.permute.xlu0 %408 }
 0x11f   : > { %v5514_v58 = vsel %vm330_vm5, 1.0, %v7237_v36 }
 0x120   : > { %v341_v59 = vpack.c.bf16 %v5514_v58, %v5513_v55 }
 0x121   : > { %v325_v60 = vpop.permute.xlu1 %324 }
 0x122   : > { %vm331_vm7 = vcmp.eq.s32.totalorder %v7571_v31, %v325_v60  ;;  %351 = vrot.lane.b32.xlu1 %v341_v59, %s7238_s23 }
 0x123   : > { %v5515_v1 = vsel %vm331_vm7, 1.0, %v7237_v36  ;;  %v432_v9 = vpop.permute.xlu0 %431 }
 0x124   : > { %v342_v3 = vpack.c.bf16 %v5516_v61, %v5515_v1  ;;  %vm442_vm8 = vcmp.eq.s32.totalorder %v7571_v31, %v432_v9 }
 0x125   : > { %v5521_v18 = vsel %vm442_vm8, 1.0, %v7237_v36  ;;  %vm303_vm8 = vcmp.eq.s32.totalorder %v7571_v31, %v7582_v48 }
 0x126   : > { %v7600_v4 = vpop.permute.xlu1 %405  ;;  %353 = vrot.lane.b32.xlu0 %v342_v3, %s7238_s23 }
 0x127   : > { %v441_v16 = vpop.permute.xlu0 %440 }
 0x128   : > { %vm445_vm10 = vcmp.eq.s32.totalorder %v7571_v31, %v441_v16 }
 0x129   : > { %v5524_v26 = vsel %vm445_vm10, 1.0, %v7237_v36  ;;  %vm251_vm10 = vcmp.eq.s32.totalorder %v7571_v31, %v7564_v23 }
 0x12a   : > { %v7605_v7 = vpop.permute.xlu1 %411  ;;  %v5501_v48 = vsel %vm251_vm10, 1.0, %v7237_v36 }
 0x12c   : > { %v7621_v37 = vpop.permute.xlu0 %460 }
 0x12e   : > { %v7607_v11 = vpop.permute.xlu1 %414 }
 0x131   : > { %v484_v39 = vpop.permute.xlu0 %483 }
 0x132   : > { %vm494_vm12 = vcmp.eq.s32.totalorder %v7571_v31, %v484_v39  ;;  %v5509_v39 = vsel %vm303_vm8, 1.0, %v7237_v36  ;;  %vm418_vm8 = vcmp.eq.s32.totalorder %v7571_v31, %v7605_v7  ;;  %v6825_v7 = vld [vmem:[#allocation5 + $0x118] sm:$0xff]  }
 0x133   : > { %v435_v17 = vpop.permute.xlu1 %434  ;;  %v5529_v43 = vsel %vm494_vm12, 1.0, %v7237_v36  ;;  %vm306_vm12 = vcmp.eq.s32.totalorder %v7571_v31, %v7589_v54 }
 0x134   : > { %vm443_vm9 = vcmp.eq.s32.totalorder %v7571_v31, %v435_v17 }
 0x135   : > { %v5522_v20 = vsel %vm443_vm9, 1.0, %v7237_v36  ;;  %v493_v41 = vpop.permute.xlu0 %492  ;;  %vm304_vm9 = vcmp.eq.s32.totalorder %v7571_v31, %v7585_v51 }
 0x136   : > { %v454_v24 = vpack.c.bf16 %v5522_v20, %v5521_v18  ;;  %vm497_vm14 = vcmp.eq.s32.totalorder %v7571_v31, %v493_v41  ;;  %v5510_v41 = vsel %vm304_vm9, 1.0, %v7237_v36 }
 0x137   : > { %v438_v25 = vpop.permute.xlu1 %437  ;;  %v5532_v49 = vsel %vm497_vm14, 1.0, %v7237_v36  ;;  %v315_v23 = vpack.c.bf16 %v5510_v41, %v5509_v39  ;;  %vm355_vm14 = vcmask 523264   ;;  %v6826_v39 = vld [vmem:[#allocation5 + $0x160] sm:$0xff]  }
 0x138   : > { %vm444_vm11 = vcmp.eq.s32.totalorder %v7571_v31, %v438_v25  ;;  %510 = vrot.lane.b32.xlu1 %v454_v24, %s7238_s23  ;;  %v7673_v25 = vld [vmem:[%s7492_s27 + $0x10] sm:$0xff]  ;;  %v6827_v41 = vld [vmem:[#allocation5 + $0x120] sm:$0xff]  }
 0x139   : > { %v5523_v30 = vsel %vm444_vm11, 1.0, %v7237_v36  ;;  %vm252_vm11 = vcmp.eq.s32.totalorder %v7571_v31, %v7569_v28 }
 0x13a   : > { %v455_v33 = vpack.c.bf16 %v5524_v26, %v5523_v30  ;;  %v7639_v56 = vpop.permute.xlu0 %862  ;;  %v7678_v26 = vld [vmem:[%s7492_s27 + $0x18] sm:$0xff]  ;;  %v7239_v30 = vmov 13   ;;  %v5502_v51 = vsel %vm252_vm11, 1.0, %v7237_v36 }
 0x13b   : > { %v263_v28 = vpack.c.bf16 %v5502_v51, %v5501_v48  ;;  %v6829_v48 = vld [vmem:[#allocation5 + $0x128] sm:$0xff]   ;;  %v6830_v51 = vld [vmem:[#allocation5 + $0x170] sm:$0xff]  }
 0x13c   : > { %v7618_v34 = vpop.permute.xlu1 %457  ;;  %512 = vrot.lane.b32.xlu0 %v455_v33, %s7238_s23 }
 0x13f   : > { %v886_v58 = vpop.permute.xlu0 %885 }
 0x140   : > { %v7623_v38 = vpop.permute.xlu1 %463  ;;  %vm896_vm0 = vcmp.eq.s32.totalorder %v7571_v31, %v886_v58 }
 0x141   : > { %v5569_v62 = vsel %vm896_vm0, 1.0, %v7237_v36  ;;  %vm253_vm0 = vcmp.eq.s32.totalorder %v7571_v31, %v7562_v22  ;;  %v7242_v22 = vmov 16  }
 0x143   : > { %v895_v60 = vpop.permute.xlu0 %894 }
 0x144   : > { %v7625_v40 = vpop.permute.xlu1 %466  ;;  %vm899_vm2 = vcmp.eq.s32.totalorder %v7571_v31, %v895_v60 }
 0x145   : > { %v5572_v2 = vsel %vm899_vm2, 1.0, %v7237_v36  ;;  %vm469_vm2 = vcmp.eq.s32.totalorder %v7571_v31, %v7621_v37 }
 0x148   : > { %v7657_v9 = vpop.permute.xlu0 %914 }
 0x149   : > { %v487_v42 = vpop.permute.xlu1 %486  ;;  %vm923_vm10 = vcmp.eq.s32.totalorder %v7571_v31, %v7657_v9 }
 0x14a   : > { %vm495_vm13 = vcmp.eq.s32.totalorder %v7571_v31, %v487_v42 }
 0x14b   : > { %v5530_v44 = vsel %vm495_vm13, 1.0, %v7237_v36  ;;  %vm305_vm13 = vcmp.eq.s32.totalorder %v7571_v31, %v7587_v52 }
 0x14c   : > { %v506_v46 = vpack.c.bf16 %v5530_v44, %v5529_v43  ;;  %v5512_v43 = vsel %vm306_vm12, 1.0, %v7237_v36  ;;  %v5511_v54 = vsel %vm305_vm13, 1.0, %v7237_v36  ;;  %vm871_vm12 = vcmp.eq.s32.totalorder %v7571_v31, %v7639_v56 }
 0x14d   : > { %v490_v47 = vpop.permute.xlu1 %489  ;;  %v938_v12 = vpop.permute.xlu0 %937 }
 0x14e   : > { %vm496_vm15 = vcmp.eq.s32.totalorder %v7571_v31, %v490_v47  ;;  %516 = vrot.lane.b32.xlu1 %v506_v46, %s7238_s23  ;;  %vm948_vm4 = vcmp.eq.s32.totalorder %v7571_v31, %v938_v12  ;;  %v7241_v46 = vmov 15  }
 0x14f   : > { %v5531_v50 = vsel %vm496_vm15, 1.0, %v7237_v36  ;;  %v5577_v14 = vsel %vm948_vm4, 1.0, %v7237_v36  ;;  %vm254_vm15 = vcmp.eq.s32.totalorder %v7571_v31, %v7567_v27  ;;  %v5503_v27 = vsel %vm253_vm0, 1.0, %v7237_v36 }
 0x150   : > { %v507_v53 = vpack.c.bf16 %v5532_v49, %v5531_v50  ;;  %v316_v49 = vpack.c.bf16 %v5512_v43, %v5511_v54  ;;  %vm417_vm4 = vcmp.eq.s32.totalorder %v7571_v31, %v7603_v5  ;;  %v6833_v43 = vld [vmem:[#allocation5 + $0x138] sm:$0xff]   ;;  %v5566_v54 = vsel %vm871_vm12, 1.0, %v7237_v36 }
 0x151   : > { %v947_v16 = vpop.permute.xlu0 %946 }
 0x152   : > { %v7636_v55 = vpop.permute.xlu1 %859  ;;  %518 = vrot.lane.b32.xlu0 %v507_v53, %s7238_s23  ;;  %vm951_vm6 = vcmp.eq.s32.totalorder %v7571_v31, %v947_v16  ;;  %v5504_v53 = vsel %vm254_vm15, 1.0, %v7237_v36 }
 0x153   : > { %v5580_v20 = vsel %vm951_vm6, 1.0, %v7237_v36  ;;  %v264_v60 = vpack.c.bf16 %v5504_v53, %v5503_v27  ;;  %vm470_vm6 = vcmp.eq.s32.totalorder %v7571_v31, %v7623_v38  ;;  %vm870_vm11 = vcmp.eq.s32.totalorder %v7571_v31, %v7636_v55 }
 0x156   : > { %v7641_v57 = vpop.permute.xlu1 %865 }
 0x15a   : > { %v7643_v59 = vpop.permute.xlu1 %868 }
 0x15b   : > { %vm873_vm0 = vcmp.eq.s32.totalorder %v7571_v31, %v7643_v59  ;;  %v6834_v59 = vld [vmem:[#allocation5 + $0x1c0] sm:$0xff]  }
 0x15c   : > { %6119 = vmatprep.subr.bf16.mxu1 %v6834_v59 }
 0x15f   : > { %v889_v61 = vpop.permute.xlu1 %888 }
 0x160   : > { %vm897_vm1 = vcmp.eq.s32.totalorder %v7571_v31, %v889_v61 }
 0x161   : > { %v5570_v63 = vsel %vm897_vm1, 1.0, %v7237_v36  ;;  %vm468_vm1 = vcmp.eq.s32.totalorder %v7571_v31, %v7618_v34 }
 0x162   : > { %v908_v0 = vpack.c.bf16 %v5570_v63, %v5569_v62  ;;  %v5525_v62 = vsel %vm468_vm1, 1.0, %v7237_v36  ;;  %v5526_v63 = vsel %vm469_vm2, 1.0, %v7237_v36  ;;  %vm872_vm1 = vcmp.eq.s32.totalorder %v7571_v31, %v7641_v57  ;;  %v6838_v57 = vld [vmem:[#allocation5 + $0x1d0] sm:$0xff]  }
 0x163   : > { %v892_v1 = vpop.permute.xlu1 %891  ;;  %v480_v34 = vpack.c.bf16 %v5526_v63, %v5525_v62  ;;  %v6836_v63 = vld [vmem:[#allocation5 + $0x1c8] sm:$0xff]  }
 0x164   : > { %vm898_vm3 = vcmp.eq.s32.totalorder %v7571_v31, %v892_v1  ;;  %964 = vrot.lane.b32.xlu1 %v908_v0, %s7238_s23 }
 0x165   : > { %v5571_v3 = vsel %vm898_vm3, 1.0, %v7237_v36  ;;  %vm416_vm3 = vcmp.eq.s32.totalorder %v7571_v31, %v7600_v4 }
 0x166   : > { %v909_v6 = vpack.c.bf16 %v5572_v2, %v5571_v3  ;;  %v5517_v1 = vsel %vm416_vm3, 1.0, %v7237_v36  ;;  %v5518_v2 = vsel %vm417_vm4, 1.0, %v7237_v36 }
 0x167   : > { %v428_v4 = vpack.c.bf16 %v5518_v2, %v5517_v1  ;;  %v6839_v2 = vld [vmem:[#allocation5 + $0x190] sm:$0xff]  }
 0x168   : > { %v7654_v8 = vpop.permute.xlu1 %911  ;;  %966 = vrot.lane.b32.xlu0 %v909_v6, %s7238_s23  ;;  %v6819_v6 = vld [vmem:[#allocation5 + $0x100] sm:$0xff]  }
 0x169   : > { %vm922_vm9 = vcmp.eq.s32.totalorder %v7571_v31, %v7654_v8 }
 0x16c   : > { %v7659_v10 = vpop.permute.xlu1 %917 }
 0x16d   : > { %vm924_vm15 = vcmp.eq.s32.totalorder %v7571_v31, %v7659_v10 }
 0x170   : > { %v7661_v13 = vpop.permute.xlu1 %920 }
 0x171   : > { %vm925_vm13 = vcmp.eq.s32.totalorder %v7571_v31, %v7661_v13 }
 0x172   : > { %v5576_v9 = vsel %vm925_vm13, 1.0, %v7237_v36 }
 0x175   : > { %v941_v15 = vpop.permute.xlu1 %940 }
 0x176   : > { %vm949_vm5 = vcmp.eq.s32.totalorder %v7571_v31, %v941_v15  ;;  %v5527_v15 = vsel %vm470_vm6, 1.0, %v7237_v36 }
 0x177   : > { %v5578_v17 = vsel %vm949_vm5, 1.0, %v7237_v36  ;;  %vm471_vm5 = vcmp.eq.s32.totalorder %v7571_v31, %v7625_v40 }
 0x178   : > { %v960_v18 = vpack.c.bf16 %v5578_v17, %v5577_v14  ;;  %v5528_v37 = vsel %vm471_vm5, 1.0, %v7237_v36  ;;  %v6820_v14 = vld [vmem:[#allocation5 + $0x148] sm:$0xff]  }
 0x179   : > { %v944_v19 = vpop.permute.xlu1 %943  ;;  %v481_v16 = vpack.c.bf16 %v5528_v37, %v5527_v15  ;;  %v6821_v17 = vld [vmem:[#allocation5 + $0x108] sm:$0xff]  }
 0x17a   : > { %vm950_vm7 = vcmp.eq.s32.totalorder %v7571_v31, %v944_v19  ;;  %970 = vrot.lane.b32.xlu1 %v960_v18, %s7238_s23 }
 0x17b   : > { %v5579_v21 = vsel %vm950_vm7, 1.0, %v7237_v36  ;;  %vm419_vm7 = vcmp.eq.s32.totalorder %v7571_v31, %v7607_v11  ;;  %v5519_v11 = vsel %vm418_vm8, 1.0, %v7237_v36 }
 0x17c   : > { %v961_v24 = vpack.c.bf16 %v5580_v20, %v5579_v21  ;;  %v5520_v18 = vsel %vm419_vm7, 1.0, %v7237_v36  ;;  %v6822_v20 = vld [vmem:[#allocation5 + $0x150] sm:$0xff]  }
 0x17d   : > { %v429_v21 = vpack.c.bf16 %v5520_v18, %v5519_v11  ;;  %v6847_v11 = vld [vmem:[#allocation5 + $0x1b0] sm:$0xff]  }
 0x17e   : > { %1178 = vperm.xlu1 %6658, %v7673_v25   ;;  %972 = vrot.lane.b32.xlu0 %v961_v24, %s7238_s23  ;;  %v7690_v33 = vpop.permute.xlu1 %1172  ;;  %v6823_v24 = vld [vmem:[#allocation5 + $0x110] sm:$0xff]  }
 0x17f   : > { %vm1183_vm13 = vcmp.eq.s32.totalorder %v7571_v31, %v7690_v33 }
 0x182   : > { %1181 = vperm.xlu1 %6658, %v7678_v26   ;;  %1175 = vperm.xlu0 %6659, %v7682_v29   ;;  %v346_v42 = vpop.permute.xlu1 %345  ;;  %v348_v44 = vpop.permute.xlu0 %347 }
 0x183   : > { %v358_v52 = vsel %vm355_vm14, %v263_v28, %v346_v42  ;;  %v362_v61 = vsel %vm355_vm14, %v264_v60, %v348_v44  ;;  %v6828_v42 = vld [vmem:[#allocation5 + $0x168] sm:$0xff]   ;;  %v6832_v28 = vld [vmem:[#allocation5 + $0x178] sm:$0xff]   ;;  %v5573_v44 = vsel %vm922_vm9, 1.0, %v7237_v36  ;;  %v5567_v60 = vsel %vm872_vm1, 1.0, %v7237_v36 }
 0x186   : > { %6661 = vset.pattern.permute.xlu1 %v7239_v30  ;;  %6660 = vset.pattern.permute.xlu0 %v7239_v30  ;;  %v6824_v30 = vld [vmem:[#allocation5 + $0x158] sm:$0xff]  }
 0x187   : > { %1201 = vperm.xlu1 %6661, %v7682_v29   ;;  %1198 = vperm.xlu0 %6660, %v7687_v32  }
 0x18b   : > { %1204 = vperm.xlu1 %6661, %v7673_v25   ;;  %1207 = vperm.xlu0 %6660, %v7678_v26  }
 0x18f   : > { %6662 = vset.pattern.permute.xlu1 %v7240_v35  ;;  %6663 = vset.pattern.permute.xlu0 %v7240_v35 }
 0x190   : > { %1224 = vperm.xlu1 %6662, %v7687_v32   ;;  %1227 = vperm.xlu0 %6663, %v7682_v29  }
 0x194   : > { %v352_v45 = vpop.permute.xlu1 %351  ;;  %1230 = vperm.xlu1 %6662, %v7673_v25   ;;  %6664 = vset.pattern.permute.xlu0 %v7241_v46 }
 0x195   : > { %v366_v47 = vsel %vm355_vm14, %v315_v23, %v352_v45  ;;  %1250 = vperm.xlu0 %6664, %v7687_v32   ;;  %v6831_v23 = vld [vmem:[#allocation5 + $0x130] sm:$0xff]   ;;  %v5574_v45 = vsel %vm923_vm10, 1.0, %v7237_v36 }
 0x196   : > { %841 = vmatprep.mubr.bf16.mxu1 %v366_v47  ;;  %v5565_v47 = vsel %vm870_vm11, 1.0, %v7237_v36  ;;  %v934_v8 = vpack.c.bf16 %v5574_v45, %v5573_v44 }
 0x197   : > { %842 = vmatmul.mubr.bf16.vlgmr.msra.gmra.mrb[0].mxu1 %v358_v52  ;;  %v882_v55 = vpack.c.bf16 %v5566_v54, %v5565_v47 }
 0x198   : > { %1233 = vperm.xlu1 %6662, %v7678_v26   ;;  %v354_v50 = vpop.permute.xlu0 %353 }
 0x199   : > { %v370_v58 = vsel %vm355_vm14, %v316_v49, %v354_v50  ;;  %1259 = vperm.xlu0 %6664, %v7678_v26   ;;  %v5575_v50 = vsel %vm924_vm15, 1.0, %v7237_v36 }
 0x19a   : > { %849 = vmatprep.mubr.bf16.mxu1 %v370_v58  ;;  %v935_v13 = vpack.c.bf16 %v5576_v9, %v5575_v50  ;;  %v5568_v58 = vsel %vm873_vm0, 1.0, %v7237_v36  ;;  %v7244_v9 = vmov 18  }
 0x19c   : > { %6665 = vset.pattern.permute.xlu1 %v7241_v46 }
 0x19d   : > { %1253 = vperm.xlu1 %6665, %v7682_v29   ;;  %6667 = vset.pattern.permute.xlu0 %v7242_v22 }
 0x19f   : > { %850 = vmatmul.mubr.bf16.gmra.mrb[4].mxu1 %v362_v61  ;;  %v883_v61 = vpack.c.bf16 %v5568_v58, %v5567_v60 }
 0x1a1   : > { %1256 = vperm.xlu1 %6665, %v7673_v25  }
 0x1a5   : > { %6666 = vset.pattern.permute.xlu1 %v7242_v22  ;;  %v6835_v22 = vld [vmem:[#allocation5 + $0x180] sm:$0xff]  }
 0x1a6   : > { %6120 = vmatpush3.bf16.msra.mxu1 %v6835_v22 }
 0x1a7   : > { %6121 = vmatprep.subr.bf16.mxu1 %v6836_v63  ;;  %v6850_v63 = vld [vmem:[#allocation5 + $0x240] sm:$0xff]  }
 0x1aa   : > { %v511_v0 = vpop.permute.xlu1 %510 }
 0x1ab   : > { %v522_v40 = vsel %vm355_vm14, %v428_v4, %v511_v0  ;;  %v6837_v0 = vld [vmem:[#allocation5 + $0x188] sm:$0xff]  }
 0x1ac   : > { %6122 = vmatpush3.bf16.msra.mxu1 %v6837_v0  ;;  %v6851_v0 = vld [vmem:[#allocation5 + $0x200] sm:$0xff]  }
 0x1ad   : > { %6123 = vmatprep.subr.bf16.mxu1 %v6838_v57  ;;  %v6852_v57 = vld [vmem:[#allocation5 + $0x248] sm:$0xff]  }
 0x1ae   : > { %v513_v5 = vpop.permute.xlu0 %512 }
 0x1af   : > { %v526_v35 = vsel %vm355_vm14, %v429_v21, %v513_v5  ;;  %v6841_v5 = vld [vmem:[#allocation5 + $0x198] sm:$0xff]  }
 0x1b0   : > { %6124 = vmatpush3.bf16.msra.mxu1 %v6839_v2  ;;  %v6853_v2 = vld [vmem:[#allocation5 + $0x208] sm:$0xff]  }
 0x1c0   : > { %v517_v3 = vpop.permute.xlu1 %516 }
 0x1c1   : > { %v530_v12 = vsel %vm355_vm14, %v480_v34, %v517_v3  ;;  %v6840_v34 = vld [vmem:[#allocation5 + $0x1d8] sm:$0xff]   ;;  %v6842_v3 = vld [vmem:[#allocation5 + $0x1e0] sm:$0xff]  }
 0x1c2   : > { %696 = vmatprep.mubr.bf16.mxu0 %v530_v12  ;;  %6125 = vmatprep.subr.bf16.mxu1 %v6840_v34  ;;  %v6844_v12 = vld [vmem:[#allocation5 + $0x1e8] sm:$0xff]  }
 0x1c3   : > { %697 = vmatmul.mubr.bf16.vlgmr.msra.gmra.mrb[0].mxu0 %v522_v40  ;;  %6126 = vmatpush3.bf16.msra.mxu1 %v6841_v5  ;;  %v6845_v40 = vld [vmem:[#allocation5 + $0x1a8] sm:$0xff]  }
 0x1c4   : > { %v519_v38 = vpop.permute.xlu0 %518  ;;  %6092 = vmatpush3.bf16.msra.mxu0 %v6819_v6  ;;  %v6843_v6 = vld [vmem:[#allocation5 + $0x1a0] sm:$0xff]   ;;  %6127 = vmatprep.subr.bf16.mxu1 %v6842_v3 }
 0x1c5   : > { %v534_v19 = vsel %vm355_vm14, %v481_v16, %v519_v38  ;;  %6093 = vmatprep.subr.bf16.mxu0 %v6820_v14 }
 0x1c6   : > { %704 = vmatprep.mubr.bf16.mxu0 %v534_v19 }
 0x1c7   : > { %6128 = vmatpush3.bf16.msra.mxu1 %v6843_v6 }
 0x1c8   : > { %6094 = vmatpush3.bf16.msra.mxu0 %v6821_v17  ;;  %6129 = vmatprep.subr.bf16.mxu1 %v6844_v12  ;;  %v6846_v17 = vld [vmem:[#allocation5 + $0x1f0] sm:$0xff]   ;;  %v5597_v12 = vsel %vm1183_vm13, 1.0, %v7237_v36 }
 0x1c9   : > { %6095 = vmatprep.subr.bf16.mxu0 %v6822_v20 }
 0x1cb   : > { %705 = vmatmul.mubr.bf16.gmra.mrb[4].mxu0 %v526_v35  ;;  %6130 = vmatpush3.bf16.msra.mxu1 %v6845_v40 }
 0x1cc   : > { %6096 = vmatpush3.bf16.msra.mxu0 %v6823_v24  ;;  %6131 = vmatprep.subr.bf16.mxu1 %v6846_v17 }
 0x1cd   : > { %6097 = vmatprep.subr.bf16.mxu0 %v6824_v30  ;;  %v6848_v30 = vld [vmem:[#allocation5 + $0x1f8] sm:$0xff]  }
 0x1cf   : > { %6132 = vmatpush3.bf16.msra.mxu1 %v6847_v11 }
 0x1d0   : > { %6098 = vmatpush3.bf16.msra.mxu0 %v6825_v7  ;;  %6133 = vmatprep.subr.bf16.mxu1 %v6848_v30 }
 0x1d1   : > { %6099 = vmatprep.subr.bf16.mxu0 %v6826_v39  ;;  %v6849_v39 = vld [vmem:[#allocation5 + $0x1b8] sm:$0xff]  }
 0x1d3   : > { %6134 = vmatpush3.bf16.msra.mxu1 %v6849_v39 }
 0x1d4   : > { %6100 = vmatpush3.bf16.msra.mxu0 %v6827_v41 }
 0x1d5   : > { %6101 = vmatprep.subr.bf16.mxu0 %v6828_v42 }
 0x1d6   : > { %v965_v46 = vpop.permute.xlu1 %964 }
 0x1d7   : > { %v976_v53 = vsel %vm355_vm14, %v882_v55, %v965_v46  ;;  %v7243_v55 = vmov 17  }
 0x1d8   : > { %6102 = vmatpush3.bf16.msra.mxu0 %v6829_v48 }
 0x1d9   : > { %6103 = vmatprep.subr.bf16.mxu0 %v6830_v51 }
 0x1da   : > { %v967_v56 = vpop.permute.xlu0 %966 }
 0x1db   : > { %v980_v62 = vsel %vm355_vm14, %v883_v61, %v967_v56  ;;  %v7245_v56 = vmov 19  }
 0x1dc   : > { %6104 = vmatpush3.bf16.msra.mxu0 %v6831_v23 }
 0x1dd   : > { %6105 = vmatprep.subr.bf16.mxu0 %v6832_v28 }
 0x1e0   : > { %6106 = vmatpush3.bf16.msra.mxu0 %v6833_v43 }
 0x1e1   : > { %6147 = vmatprep.subr.bf16.mxu0 %v6850_v63 }
 0x1ec   : > { %v971_v52 = vpop.permute.xlu1 %970 }
 0x1ed   : > { %v984_v49 = vsel %vm355_vm14, %v934_v8, %v971_v52  ;;  %v7246_v52 = vmov 20  }
 0x1ee   : > { %1150 = vmatprep.mubr.bf16.mxu0 %v984_v49 }
 0x1ef   : > { %1151 = vmatmul.mubr.bf16.vlgmr.msra.gmra.mrb[8].mxu0 %v976_v53 }
 0x1f0   : > { %v973_v10 = vpop.permute.xlu0 %972  ;;  %6148 = vmatpush3.bf16.msra.mxu0 %v6851_v0 }
 0x1f1   : > { %v988_v27 = vsel %vm355_vm14, %v935_v13, %v973_v10  ;;  %6149 = vmatprep.subr.bf16.mxu0 %v6852_v57 }
 0x1f2   : > { %1158 = vmatprep.mubr.bf16.mxu0 %v988_v27 }
 0x1f4   : > { %6150 = vmatpush3.bf16.msra.mxu0 %v6853_v2  ;;  %v6863_v2 = vld [vmem:[#allocation5 + $0x230] sm:$0xff]  }
 0x1f7   : > { %1159 = vmatmul.mubr.bf16.gmra.mrb[12].mxu0 %v980_v62 }
 0x1fd   : > { %v7786_v1 = vpop.permute.xlu1 %1178 }
 0x201   : > { %v7788_v4 = vpop.permute.xlu1 %1181  ;;  %v7790_v37 = vpop.permute.xlu0 %1175 }
 0x202   : > { %vm1184_vm12 = vcmp.eq.s32.totalorder %v7571_v31, %v7790_v37  ;;  %vm1186_vm1 = vcmp.eq.s32.totalorder %v7571_v31, %v7788_v4 }
 0x203   : > { %v5598_v6 = vsel %vm1184_vm12, 1.0, %v7237_v36 }
 0x204   : > { %v1195_v37 = vpack.c.bf16 %v5598_v6, %v5597_v12  ;;  %v6865_v12 = vld [vmem:[#allocation5 + $0x238] sm:$0xff]  }
 0x206   : > { %v1202_v14 = vpop.permute.xlu1 %1201  ;;  %v1199_v15 = vpop.permute.xlu0 %1198 }
 0x207   : > { %vm1210_vm2 = vcmp.eq.s32.totalorder %v7571_v31, %v1202_v14  ;;  %vm1209_vm3 = vcmp.eq.s32.totalorder %v7571_v31, %v1199_v15 }
 0x208   : > { %v5602_v16 = vsel %vm1210_vm2, 1.0, %v7237_v36  ;;  %v5601_v38 = vsel %vm1209_vm3, 1.0, %v7237_v36  ;;  %vm1185_vm2 = vcmp.eq.s32.totalorder %v7571_v31, %v7786_v1 }
 0x209   : > { %v1221_v18 = vpack.c.bf16 %v5602_v16, %v5601_v38 }
 0x20a   : > { %v1205_v19 = vpop.permute.xlu1 %1204  ;;  %v1208_v20 = vpop.permute.xlu0 %1207 }
 0x20b   : > { %vm1211_vm4 = vcmp.eq.s32.totalorder %v7571_v31, %v1205_v19  ;;  %vm1212_vm5 = vcmp.eq.s32.totalorder %v7571_v31, %v1208_v20  ;;  %1277 = vrot.lane.b32.xlu1 %v1221_v18, %s7238_s23 }
 0x20c   : > { %v5603_v21 = vsel %vm1211_vm4, 1.0, %v7237_v36  ;;  %v5604_v24 = vsel %vm1212_vm5, 1.0, %v7237_v36 }
 0x20d   : > { %v1222_v35 = vpack.c.bf16 %v5604_v24, %v5603_v21  ;;  %v5600_v21 = vsel %vm1186_vm1, 1.0, %v7237_v36 }
 0x20f   : > { %v7801_v7 = vpop.permute.xlu1 %1224  ;;  %1279 = vrot.lane.b32.xlu0 %v1222_v35, %s7238_s23  ;;  %v7804_v41 = vpop.permute.xlu0 %1227 }
 0x210   : > { %vm1235_vm10 = vcmp.eq.s32.totalorder %v7571_v31, %v7801_v7  ;;  %vm1236_vm11 = vcmp.eq.s32.totalorder %v7571_v31, %v7804_v41  ;;  %v5599_v7 = vsel %vm1185_vm2, 1.0, %v7237_v36 }
 0x211   : > { %v5605_v34 = vsel %vm1235_vm10, 1.0, %v7237_v36  ;;  %v5606_v5 = vsel %vm1236_vm11, 1.0, %v7237_v36 }
 0x212   : > { %v1247_v14 = vpack.c.bf16 %v5606_v5, %v5605_v34  ;;  %v6864_v5 = vld [vmem:[#allocation5 + $0x278] sm:$0xff]  }
 0x213   : > { %v7806_v42 = vpop.permute.xlu1 %1230 }
 0x214   : > { %v1251_v48 = vpop.permute.xlu0 %1250  ;;  %vm1237_vm0 = vcmp.eq.s32.totalorder %v7571_v31, %v7806_v42  ;;  %v1196_v42 = vpack.c.bf16 %v5600_v21, %v5599_v7 }
 0x215   : > { %vm1261_vm6 = vcmp.eq.s32.totalorder %v7571_v31, %v1251_v48  ;;  %v5607_v38 = vsel %vm1237_vm0, 1.0, %v7237_v36 }
 0x216   : > { %v5609_v23 = vsel %vm1261_vm6, 1.0, %v7237_v36 }
 0x217   : > { %v7808_v51 = vpop.permute.xlu1 %1233 }
 0x218   : > { %v1260_v43 = vpop.permute.xlu0 %1259  ;;  %vm1238_vm15 = vcmp.eq.s32.totalorder %v7571_v31, %v7808_v51 }
 0x219   : > { %vm1264_vm8 = vcmp.eq.s32.totalorder %v7571_v31, %v1260_v43  ;;  %v5608_v15 = vsel %vm1238_vm15, 1.0, %v7237_v36 }
 0x21a   : > { %v5612_v47 = vsel %vm1264_vm8, 1.0, %v7237_v36  ;;  %v1248_v18 = vpack.c.bf16 %v5608_v15, %v5607_v38 }
 0x21c   : > { %v1254_v28 = vpop.permute.xlu1 %1253 }
 0x21d   : > { %vm1262_vm7 = vcmp.eq.s32.totalorder %v7571_v31, %v1254_v28 }
 0x21e   : > { %v5610_v44 = vsel %vm1262_vm7, 1.0, %v7237_v36 }
 0x21f   : > { %v1273_v45 = vpack.c.bf16 %v5610_v44, %v5609_v23 }
 0x220   : > { %v1257_v46 = vpop.permute.xlu1 %1256 }
 0x221   : > { %vm1263_vm9 = vcmp.eq.s32.totalorder %v7571_v31, %v1257_v46  ;;  %1283 = vrot.lane.b32.xlu1 %v1273_v45, %s7238_s23 }
 0x222   : > { %v5611_v54 = vsel %vm1263_vm9, 1.0, %v7237_v36 }
 0x223   : > { %v1274_v8 = vpack.c.bf16 %v5612_v47, %v5611_v54 }
 0x225   : > { %1485 = vperm.xlu1 %6666, %v7687_v32   ;;  %1285 = vrot.lane.b32.xlu0 %v1274_v8, %s7238_s23  ;;  %v6854_v8 = vld [vmem:[#allocation5 + $0x250] sm:$0xff]  }
 0x226   : > { %6151 = vmatprep.subr.bf16.mxu0 %v6854_v8  ;;  %v7247_v8 = vmov 21  }
 0x229   : > { %1491 = vperm.xlu1 %6666, %v7673_v25   ;;  %1488 = vperm.xlu0 %6667, %v7682_v29  }
 0x22d   : > { %1494 = vperm.xlu1 %6666, %v7678_v26   ;;  %6668 = vset.pattern.permute.xlu0 %v7243_v55 }
 0x22e   : > { %1511 = vperm.xlu0 %6668, %v7687_v32  }
 0x231   : > { %6669 = vset.pattern.permute.xlu1 %v7243_v55 }
 0x232   : > { %1514 = vperm.xlu1 %6669, %v7682_v29   ;;  %1520 = vperm.xlu0 %6668, %v7678_v26  }
 0x236   : > { %1517 = vperm.xlu1 %6669, %v7673_v25   ;;  %6671 = vset.pattern.permute.xlu0 %v7244_v9 }
 0x237   : > { %1540 = vperm.xlu0 %6671, %v7682_v29  }
 0x23a   : > { %6670 = vset.pattern.permute.xlu1 %v7244_v9  ;;  %v6855_v9 = vld [vmem:[#allocation5 + $0x210] sm:$0xff]  }
 0x23b   : > { %1537 = vperm.xlu1 %6670, %v7687_v32   ;;  %6672 = vset.pattern.permute.xlu0 %v7245_v56 }
 0x23c   : > { %1563 = vperm.xlu0 %6672, %v7687_v32   ;;  %6152 = vmatpush3.bf16.msra.mxu0 %v6855_v9  ;;  %v7250_v9 = vmov 24  }
 0x23f   : > { %1543 = vperm.xlu1 %6670, %v7673_v25  }
 0x240   : > { %1572 = vperm.xlu0 %6672, %v7678_v26  }
 0x243   : > { %1546 = vperm.xlu1 %6670, %v7678_v26  }
 0x244   : > { %6675 = vset.pattern.permute.xlu0 %v7246_v52 }
 0x247   : > { %6673 = vset.pattern.permute.xlu1 %v7245_v56 }
 0x248   : > { %1566 = vperm.xlu1 %6673, %v7682_v29  }
 0x24c   : > { %1569 = vperm.xlu1 %6673, %v7673_v25  }
 0x250   : > { %6674 = vset.pattern.permute.xlu1 %v7246_v52  ;;  %v6856_v52 = vld [vmem:[#allocation5 + $0x258] sm:$0xff]  }
 0x251   : > { %6153 = vmatprep.subr.bf16.mxu0 %v6856_v52  ;;  %v6866_v52 = vld [vmem:[#allocation5 + $0x2c0] sm:$0xff]  }
 0x252   : > { %6175 = vmatprep.subr.bf16.mxu1 %v6866_v52 }
 0x26a   : > { %v6079_v49 = vpop.f32.mrb[0].mxu1 }
 0x26b   : > { %v6080_v50 = vpop.f32.mrb[1].mxu1 }
 0x26c   : > { %v6081_v53 = vadd.f32 %v6080_v50, %v6079_v49  ;;  %v6082_v13 = vpop.f32.mrb[2].mxu1  ;;  %v6857_v50 = vld [vmem:[#allocation5 + $0x218] sm:$0xff]  }
 0x26d   : > { %v6083_v10 = vpop.f32.mrb[3].mxu1  ;;  %6154 = vmatpush3.bf16.msra.mxu0 %v6857_v50  ;;  %v6867_v50 = vld [vmem:[#allocation5 + $0x280] sm:$0xff]  }
 0x26e   : > { %v6084_v58 = vadd.f32 %v6083_v10, %v6082_v13  ;;  %v6859_v10 = vld [vmem:[#allocation5 + $0x220] sm:$0xff]  }
 0x272   : > { %v6085_v27 = vpop.f32.mrb[4].mxu1 }
 0x273   : > { %v6086_v60 = vpop.f32.mrb[5].mxu1 }
 0x274   : > { %v6087_v61 = vadd.f32 %v6086_v60, %v6085_v27  ;;  %v6088_v59 = vpop.f32.mrb[6].mxu1 }
 0x275   : > { %v6089_v22 = vpop.f32.mrb[7].mxu1 }
 0x276   : > { %v6090_v62 = vadd.f32 %v6089_v22, %v6088_v59  ;;  %v6861_v59 = vld [vmem:[#allocation5 + $0x228] sm:$0xff]  }
 0x27d   : > { %v1278_v3 = vpop.permute.xlu1 %1277 }
 0x27e   : > { %v1289_v17 = vsel %vm355_vm14, %v1195_v37, %v1278_v3 }
 0x281   : > { %v1280_v33 = vpop.permute.xlu0 %1279 }
 0x282   : > { %v1293_v1 = vsel %vm355_vm14, %v1196_v42, %v1280_v33 }
 0x293   : > { %v1284_v40 = vpop.permute.xlu1 %1283 }
 0x294   : > { %v1297_v16 = vsel %vm355_vm14, %v1247_v14, %v1284_v40 }
 0x295   : > { %1463 = vmatprep.mubr.bf16.mxu1 %v1297_v16 }
 0x296   : > { %v6051_v19 = vpop.f32.mrb[0].mxu0  ;;  %1464 = vmatmul.mubr.bf16.vlgmr.msra.gmra.mrb[8].mxu1 %v1289_v17 }
 0x297   : > { %v6052_v20 = vpop.f32.mrb[1].mxu0  ;;  %v1286_v11 = vpop.permute.xlu0 %1285  ;;  %6176 = vmatpush3.bf16.msra.mxu1 %v6867_v50 }
 0x298   : > { %v6053_v24 = vadd.f32 %v6052_v20, %v6051_v19  ;;  %v6054_v30 = vpop.f32.mrb[2].mxu0  ;;  %v1301_v35 = vsel %vm355_vm14, %v1248_v18, %v1286_v11 }
 0x299   : > { %v6055_v4 = vpop.f32.mrb[3].mxu0  ;;  %1471 = vmatprep.mubr.bf16.mxu1 %v1301_v35 }
 0x29a   : > { %v7863_v39 = vadd.f32 %v6081_v53, %v6053_v24  ;;  %v6056_v41 = vadd.f32 %v6055_v4, %v6054_v30  ;;  %v6858_v53 = vld [vmem:[#allocation5 + $0x260] sm:$0xff]  }
 0x29b   : > { %6155 = vmatprep.subr.bf16.mxu0 %v6858_v53  ;;  %v6868_v53 = vld [vmem:[#allocation5 + $0x2c8] sm:$0xff]  }
 0x29c   : > { %v7865_v48 = vadd.f32 %v6084_v58, %v6056_v41  ;;  %v6860_v58 = vld [vmem:[#allocation5 + $0x268] sm:$0xff]   ;;  %6156 = vmatpush3.bf16.msra.mxu0 %v6859_v10  ;;  %6177 = vmatprep.subr.bf16.mxu1 %v6868_v53 }
 0x29d   : > { %6157 = vmatprep.subr.bf16.mxu0 %v6860_v58 }
 0x29e   : > { %v6057_v51 = vpop.f32.mrb[4].mxu0  ;;  %1472 = vmatmul.mubr.bf16.gmra.mrb[12].mxu1 %v1293_v1 }
 0x29f   : > { %v6058_v23 = vpop.f32.mrb[5].mxu0 }
 0x2a0   : > { %v6059_v28 = vadd.f32 %v6058_v23, %v6057_v51  ;;  %v6060_v43 = vpop.f32.mrb[6].mxu0  ;;  %6158 = vmatpush3.bf16.msra.mxu0 %v6861_v59 }
 0x2a1   : > { %v6061_v44 = vpop.f32.mrb[7].mxu0 }
 0x2a2   : > { %v7868_v45 = vadd.f32 %v6087_v61, %v6059_v28  ;;  %v6062_v46 = vadd.f32 %v6061_v44, %v6060_v43 }
 0x2a4   : > { %v7870_v47 = vadd.f32 %v6090_v62, %v6062_v46  ;;  %v7872_v54 = vpop.permute.xlu1 %1485  ;;  %v6862_v62 = vld [vmem:[#allocation5 + $0x270] sm:$0xff]  }
 0x2a5   : > { %6159 = vmatprep.subr.bf16.mxu0 %v6862_v62  ;;  %vm1496_vm15 = vcmp.eq.s32.totalorder %v7571_v31, %v7872_v54 }
 0x2a6   : > { %6160 = vmatpush3.bf16.msra.mxu0 %v6863_v2  ;;  %v5629_v10 = vsel %vm1496_vm15, 1.0, %v7237_v36 }
 0x2a7   : > { %6161 = vmatprep.subr.bf16.mxu0 %v6864_v5 }
 0x2a8   : > { %v7874_v55 = vpop.permute.xlu1 %1491  ;;  %v7876_v56 = vpop.permute.xlu0 %1488 }
 0x2a9   : > { %vm1497_vm13 = vcmp.eq.s32.totalorder %v7571_v31, %v7876_v56 }
 0x2aa   : > { %6162 = vmatpush3.bf16.msra.mxu0 %v6865_v12  ;;  %v6871_v12 = vld [vmem:[#allocation5 + $0x290] sm:$0xff]  }
 0x2ac   : > { %v7878_v49 = vpop.permute.xlu1 %1494 }
 0x2ad   : > { %v1512_v13 = vpop.permute.xlu0 %1511  ;;  %vm1499_vm2 = vcmp.eq.s32.totalorder %v7571_v31, %v7878_v49 }
 0x2ae   : > { %vm1522_vm3 = vcmp.eq.s32.totalorder %v7571_v31, %v1512_v13  ;;  %v5630_v13 = vsel %vm1497_vm13, 1.0, %v7237_v36 }
 0x2af   : > { %v5633_v60 = vsel %vm1522_vm3, 1.0, %v7237_v36  ;;  %v1508_v56 = vpack.c.bf16 %v5630_v13, %v5629_v10  ;;  %vm1498_vm3 = vcmp.eq.s32.totalorder %v7571_v31, %v7874_v55  ;;  %v6872_v55 = vld [vmem:[#allocation5 + $0x2d8] sm:$0xff]  }
 0x2b0   : > { %v5631_v2 = vsel %vm1498_vm3, 1.0, %v7237_v36 }
 0x2b1   : > { %v1515_v27 = vpop.permute.xlu1 %1514  ;;  %v1521_v61 = vpop.permute.xlu0 %1520 }
 0x2b2   : > { %vm1523_vm4 = vcmp.eq.s32.totalorder %v7571_v31, %v1515_v27  ;;  %vm1525_vm5 = vcmp.eq.s32.totalorder %v7571_v31, %v1521_v61 }
 0x2b3   : > { %v5634_v22 = vsel %vm1523_vm4, 1.0, %v7237_v36  ;;  %v5636_v57 = vsel %vm1525_vm5, 1.0, %v7237_v36 }
 0x2b4   : > { %v1534_v63 = vpack.c.bf16 %v5634_v22, %v5633_v60 }
 0x2b5   : > { %v1518_v0 = vpop.permute.xlu1 %1517 }
 0x2b6   : > { %vm1524_vm6 = vcmp.eq.s32.totalorder %v7571_v31, %v1518_v0  ;;  %1590 = vrot.lane.b32.xlu1 %v1534_v63, %s7238_s23  ;;  %v7892_v14 = vpop.permute.xlu0 %1540  ;;  %v5632_v0 = vsel %vm1499_vm2, 1.0, %v7237_v36 }
 0x2b7   : > { %v5635_v34 = vsel %vm1524_vm6, 1.0, %v7237_v36  ;;  %vm1549_vm12 = vcmp.eq.s32.totalorder %v7571_v31, %v7892_v14 }
 0x2b8   : > { %v1535_v3 = vpack.c.bf16 %v5636_v57, %v5635_v34  ;;  %v1509_v34 = vpack.c.bf16 %v5632_v0, %v5631_v2  ;;  %v8012_v0 = vld [vmem:[%s7492_s27] sm:$0xff]  ;;  %v8025_v2 = vld [vmem:[%s7492_s27 + $0x18] sm:$0xff] }
 0x2ba   : > { %v7889_v6 = vpop.permute.xlu1 %1537  ;;  %1592 = vrot.lane.b32.xlu0 %v1535_v3, %s7238_s23  ;;  %v6870_v3 = vld [vmem:[#allocation5 + $0x2d0] sm:$0xff]  }
 0x2bb   : > { %v1564_v15 = vpop.permute.xlu0 %1563  ;;  %vm1548_vm11 = vcmp.eq.s32.totalorder %v7571_v31, %v7889_v6 }
 0x2bc   : > { %vm1574_vm7 = vcmp.eq.s32.totalorder %v7571_v31, %v1564_v15  ;;  %v6873_v15 = vld [vmem:[#allocation5 + $0x298] sm:$0xff]  }
 0x2bd   : > { %v5641_v11 = vsel %vm1574_vm7, 1.0, %v7237_v36 }
 0x2be   : > { %v7894_v37 = vpop.permute.xlu1 %1543 }
 0x2bf   : > { %v1573_v24 = vpop.permute.xlu0 %1572  ;;  %vm1550_vm1 = vcmp.eq.s32.totalorder %v7571_v31, %v7894_v37 }
 0x2c0   : > { %vm1577_vm9 = vcmp.eq.s32.totalorder %v7571_v31, %v1573_v24  ;;  %v5639_v59 = vsel %vm1550_vm1, 1.0, %v7237_v36  ;;  %v6878_v24 = vld [vmem:[#allocation5 + $0x2f0] sm:$0xff]  }
 0x2c1   : > { %v5644_v51 = vsel %vm1577_vm9, 1.0, %v7237_v36 }
 0x2c2   : > { %v6107_v33 = vpop.f32.mrb[8].mxu0  ;;  %v7896_v40 = vpop.permute.xlu1 %1546 }
 0x2c3   : > { %v6108_v16 = vpop.f32.mrb[9].mxu0  ;;  %vm1551_vm0 = vcmp.eq.s32.totalorder %v7571_v31, %v7896_v40 }
 0x2c4   : > { %v6109_v38 = vadd.f32 %v6108_v16, %v6107_v33  ;;  %v6110_v17 = vpop.f32.mrb[10].mxu0  ;;  %v5640_v27 = vsel %vm1551_vm0, 1.0, %v7237_v36  ;;  %v6874_v33 = vld [vmem:[#allocation5 + $0x2e0] sm:$0xff]  }
 0x2c5   : > { %v6111_v18 = vpop.f32.mrb[11].mxu0  ;;  %v1561_v62 = vpack.c.bf16 %v5640_v27, %v5639_v59  ;;  %v6875_v16 = vld [vmem:[#allocation5 + $0x2a0] sm:$0xff]  }
 0x2c6   : > { %v7900_v19 = vadd.f32 %v6109_v38, %v7863_v39  ;;  %v6112_v20 = vadd.f32 %v6111_v18, %v6110_v17  ;;  %v6876_v38 = vld [vmem:[#allocation5 + $0x2e8] sm:$0xff]  }
 0x2c7   : > { %v1567_v21 = vpop.permute.xlu1 %1566 }
 0x2c8   : > { %v7904_v30 = vadd.f32 %v6112_v20, %v7865_v48  ;;  %vm1575_vm8 = vcmp.eq.s32.totalorder %v7571_v31, %v1567_v21 }
 0x2c9   : > { %v5642_v35 = vsel %vm1575_vm8, 1.0, %v7237_v36 }
 0x2ca   : > { %v1586_v4 = vpack.c.bf16 %v5642_v35, %v5641_v11  ;;  %v6113_v7 = vpop.f32.mrb[12].mxu0  ;;  %v6877_v11 = vld [vmem:[#allocation5 + $0x2a8] sm:$0xff]  }
 0x2cb   : > { %v6114_v41 = vpop.f32.mrb[13].mxu0  ;;  %v1570_v42 = vpop.permute.xlu1 %1569 }
 0x2cc   : > { %v6115_v39 = vadd.f32 %v6114_v41, %v6113_v7  ;;  %vm1576_vm10 = vcmp.eq.s32.totalorder %v7571_v31, %v1570_v42  ;;  %v6116_v1 = vpop.f32.mrb[14].mxu0  ;;  %1596 = vrot.lane.b32.xlu1 %v1586_v4, %s7238_s23  ;;  %v6879_v41 = vld [vmem:[#allocation5 + $0x2b0] sm:$0xff]  }
 0x2cd   : > { %v5643_v48 = vsel %vm1576_vm10, 1.0, %v7237_v36  ;;  %v6117_v23 = vpop.f32.mrb[15].mxu0 }
 0x2ce   : > { %v7914_v28 = vadd.f32 %v6115_v39, %v7868_v45  ;;  %v1587_v43 = vpack.c.bf16 %v5644_v51, %v5643_v48  ;;  %v6118_v44 = vadd.f32 %v6117_v23, %v6116_v1  ;;  %v7248_v45 = vmov 22   ;;  %v6880_v39 = vld [vmem:[#allocation5 + $0x2f8] sm:$0xff]  }
 0x2cf   : > { %v6881_v48 = vld [vmem:[#allocation5 + $0x2b8] sm:$0xff]  }
 0x2d0   : > { %v7917_v46 = vadd.f32 %v6118_v44, %v7870_v47  ;;  %1798 = vperm.xlu1 %6674, %v7687_v32   ;;  %1598 = vrot.lane.b32.xlu0 %v1587_v43, %s7238_s23  ;;  %v7249_v47 = vmov 23  }
 0x2d4   : > { %1804 = vperm.xlu1 %6674, %v7673_v25   ;;  %1801 = vperm.xlu0 %6675, %v7682_v29  }
 0x2d8   : > { %1807 = vperm.xlu1 %6674, %v7678_v26   ;;  %6676 = vset.pattern.permute.xlu0 %v7247_v8 }
 0x2d9   : > { %1824 = vperm.xlu0 %6676, %v7687_v32  }
 0x2dc   : > { %6677 = vset.pattern.permute.xlu1 %v7247_v8 }
 0x2dd   : > { %1827 = vperm.xlu1 %6677, %v7682_v29   ;;  %1833 = vperm.xlu0 %6676, %v7678_v26  }
 0x2e1   : > { %1830 = vperm.xlu1 %6677, %v7673_v25   ;;  %6679 = vset.pattern.permute.xlu0 %v7248_v45 }
 0x2e2   : > { %1853 = vperm.xlu0 %6679, %v7682_v29  }
 0x2e5   : > { %6678 = vset.pattern.permute.xlu1 %v7248_v45 }
 0x2e6   : > { %1850 = vperm.xlu1 %6678, %v7687_v32   ;;  %6680 = vset.pattern.permute.xlu0 %v7249_v47 }
 0x2e7   : > { %1876 = vperm.xlu0 %6680, %v7687_v32   ;;  %v6869_v32 = vld [vmem:[#allocation5 + $0x288] sm:$0xff]  }
 0x2e8   : > { %6178 = vmatpush3.bf16.msra.mxu1 %v6869_v32 }
 0x2e9   : > { %6179 = vmatprep.subr.bf16.mxu1 %v6870_v3  ;;  %v7253_v3 = vmov 27  }
 0x2ea   : > { %1856 = vperm.xlu1 %6678, %v7673_v25  }
 0x2eb   : > { %1885 = vperm.xlu0 %6680, %v7678_v26  }
 0x2ec   : > { %6180 = vmatpush3.bf16.msra.mxu1 %v6871_v12  ;;  %v7254_v12 = vmov 28  }
 0x2ed   : > { %6181 = vmatprep.subr.bf16.mxu1 %v6872_v55  ;;  %v6882_v55 = vld [vmem:[#allocation5 + $0x340] sm:$0xff]  }
 0x2ee   : > { %1859 = vperm.xlu1 %6678, %v7678_v26   ;;  %v5638_v26 = vsel %vm1549_vm12, 1.0, %v7237_v36  ;;  %6203 = vmatprep.subr.bf16.mxu0 %v6882_v55 }
 0x2ef   : > { %6683 = vset.pattern.permute.xlu0 %v7250_v9 }
 0x2f0   : > { %6182 = vmatpush3.bf16.msra.mxu1 %v6873_v15  ;;  %v6883_v15 = vld [vmem:[#allocation5 + $0x300] sm:$0xff]  }
 0x2f1   : > { %6183 = vmatprep.subr.bf16.mxu1 %v6874_v33  ;;  %v6884_v33 = vld [vmem:[#allocation5 + $0x348] sm:$0xff]  }
 0x2f2   : > { %6681 = vset.pattern.permute.xlu1 %v7249_v47 }
 0x2f3   : > { %1879 = vperm.xlu1 %6681, %v7682_v29  }
 0x2f4   : > { %6184 = vmatpush3.bf16.msra.mxu1 %v6875_v16 }
 0x2f5   : > { %6185 = vmatprep.subr.bf16.mxu1 %v6876_v38 }
 0x2f7   : > { %1882 = vperm.xlu1 %6681, %v7673_v25   ;;  %v5637_v25 = vsel %vm1548_vm11, 1.0, %v7237_v36 }
 0x2f8   : > { %v1560_v58 = vpack.c.bf16 %v5638_v26, %v5637_v25  ;;  %6186 = vmatpush3.bf16.msra.mxu1 %v6877_v11 }
 0x2f9   : > { %6187 = vmatprep.subr.bf16.mxu1 %v6878_v24 }
 0x2fb   : > { %6682 = vset.pattern.permute.xlu1 %v7250_v9 }
 0x2fc   : > { %6188 = vmatpush3.bf16.msra.mxu1 %v6879_v41 }
 0x2fd   : > { %6189 = vmatprep.subr.bf16.mxu1 %v6880_v39 }
 0x300   : > { %6190 = vmatpush3.bf16.msra.mxu1 %v6881_v48 }
 0x328   : > { %v1591_v29 = vpop.permute.xlu1 %1590 }
 0x329   : > { %v1602_v22 = vsel %vm355_vm14, %v1508_v56, %v1591_v29 }
 0x32c   : > { %v1593_v54 = vpop.permute.xlu0 %1592 }
 0x32d   : > { %v1606_v49 = vsel %vm355_vm14, %v1509_v34, %v1593_v54  ;;  %v7251_v34 = vmov 25  }
 0x33e   : > { %v1597_v60 = vpop.permute.xlu1 %1596 }
 0x33f   : > { %v1610_v61 = vsel %vm355_vm14, %v1560_v58, %v1597_v60 }
 0x340   : > { %1776 = vmatprep.mubr.bf16.mxu0 %v1610_v61 }
 0x341   : > { %1777 = vmatmul.mubr.bf16.vlgmr.msra.gmra.mrb[16].mxu0 %v1602_v22 }
 0x342   : > { %v1599_v63 = vpop.permute.xlu0 %1598  ;;  %6204 = vmatpush3.bf16.msra.mxu0 %v6883_v15 }
 0x343   : > { %v1614_v57 = vsel %vm355_vm14, %v1561_v62, %v1599_v63  ;;  %6205 = vmatprep.subr.bf16.mxu0 %v6884_v33 }
 0x344   : > { %1784 = vmatprep.mubr.bf16.mxu0 %v1614_v57  ;;  %v8017_v57 = vld [vmem:[%s7492_s27 + $0x10] sm:$0xff] }
 0x349   : > { %1785 = vmatmul.mubr.bf16.gmra.mrb[20].mxu0 %v1606_v49  ;;  %v7252_v49 = vmov 26  }
 0x34f   : > { %v7964_v5 = vpop.permute.xlu1 %1798 }
 0x350   : > { %vm1809_vm0 = vcmp.eq.s32.totalorder %v7571_v31, %v7964_v5 }
 0x353   : > { %v7966_v6 = vpop.permute.xlu1 %1804  ;;  %v7968_v14 = vpop.permute.xlu0 %1801 }
 0x354   : > { %vm1810_vm15 = vcmp.eq.s32.totalorder %v7571_v31, %v7968_v14 }
 0x357   : > { %v7970_v37 = vpop.permute.xlu1 %1807 }
 0x358   : > { %v1825_v40 = vpop.permute.xlu0 %1824  ;;  %vm1812_vm3 = vcmp.eq.s32.totalorder %v7571_v31, %v7970_v37 }
 0x359   : > { %vm1835_vm4 = vcmp.eq.s32.totalorder %v7571_v31, %v1825_v40  ;;  %v6885_v40 = vld [vmem:[#allocation5 + $0x308] sm:$0xff]   ;;  %v5664_v39 = vsel %vm1812_vm3, 1.0, %v7237_v36 }
 0x35a   : > { %v5665_v18 = vsel %vm1835_vm4, 1.0, %v7237_v36  ;;  %6206 = vmatpush3.bf16.msra.mxu0 %v6885_v40  ;;  %vm1811_vm4 = vcmp.eq.s32.totalorder %v7571_v31, %v7966_v6  ;;  %v6888_v6 = vld [vmem:[#allocation5 + $0x358] sm:$0xff]  }
 0x35c   : > { %v1828_v17 = vpop.permute.xlu1 %1827  ;;  %v1834_v20 = vpop.permute.xlu0 %1833 }
 0x35d   : > { %vm1836_vm5 = vcmp.eq.s32.totalorder %v7571_v31, %v1828_v17  ;;  %vm1838_vm6 = vcmp.eq.s32.totalorder %v7571_v31, %v1834_v20  ;;  %v5661_v20 = vsel %vm1809_vm0, 1.0, %v7237_v36 }
 0x35e   : > { %v5666_v21 = vsel %vm1836_vm5, 1.0, %v7237_v36  ;;  %v5668_v7 = vsel %vm1838_vm6, 1.0, %v7237_v36 }
 0x35f   : > { %v1847_v35 = vpack.c.bf16 %v5666_v21, %v5665_v18  ;;  %v5662_v18 = vsel %vm1810_vm15, 1.0, %v7237_v36 }
 0x360   : > { %v1831_v4 = vpop.permute.xlu1 %1830  ;;  %v1821_v14 = vpack.c.bf16 %v5662_v18, %v5661_v20 }
 0x361   : > { %vm1837_vm7 = vcmp.eq.s32.totalorder %v7571_v31, %v1831_v4  ;;  %1903 = vrot.lane.b32.xlu1 %v1847_v35, %s7238_s23  ;;  %v7984_v23 = vpop.permute.xlu0 %1853 }
 0x362   : > { %v5667_v42 = vsel %vm1837_vm7, 1.0, %v7237_v36  ;;  %vm1862_vm13 = vcmp.eq.s32.totalorder %v7571_v31, %v7984_v23 }
 0x363   : > { %v1848_v1 = vpack.c.bf16 %v5668_v7, %v5667_v42  ;;  %v5670_v38 = vsel %vm1862_vm13, 1.0, %v7237_v36 }
 0x365   : > { %v7981_v51 = vpop.permute.xlu1 %1850  ;;  %1905 = vrot.lane.b32.xlu0 %v1848_v1, %s7238_s23 }
 0x366   : > { %v1877_v9 = vpop.permute.xlu0 %1876  ;;  %vm1861_vm12 = vcmp.eq.s32.totalorder %v7571_v31, %v7981_v51  ;;  %v5663_v51 = vsel %vm1811_vm4, 1.0, %v7237_v36 }
 0x367   : > { %vm1887_vm8 = vcmp.eq.s32.totalorder %v7571_v31, %v1877_v9  ;;  %v5669_v16 = vsel %vm1861_vm12, 1.0, %v7237_v36  ;;  %v1822_v48 = vpack.c.bf16 %v5664_v39, %v5663_v51  ;;  %v6889_v9 = vld [vmem:[#allocation5 + $0x318] sm:$0xff]  }
 0x368   : > { %v5673_v13 = vsel %vm1887_vm8, 1.0, %v7237_v36  ;;  %v1873_v11 = vpack.c.bf16 %v5670_v38, %v5669_v16 }
 0x369   : > { %v6135_v43 = vpop.f32.mrb[8].mxu1  ;;  %v7986_v44 = vpop.permute.xlu1 %1856 }
 0x36a   : > { %v6136_v8 = vpop.f32.mrb[9].mxu1  ;;  %v1886_v29 = vpop.permute.xlu0 %1885  ;;  %vm1863_vm2 = vcmp.eq.s32.totalorder %v7571_v31, %v7986_v44 }
 0x36b   : > { %v6137_v45 = vadd.f32 %v6136_v8, %v6135_v43  ;;  %v6138_v47 = vpop.f32.mrb[10].mxu1  ;;  %vm1890_vm10 = vcmp.eq.s32.totalorder %v7571_v31, %v1886_v29  ;;  %v5671_v4 = vsel %vm1863_vm2, 1.0, %v7237_v36  ;;  %v6886_v43 = vld [vmem:[#allocation5 + $0x350] sm:$0xff]  }
 0x36c   : > { %v6139_v52 = vpop.f32.mrb[11].mxu1  ;;  %v5676_v62 = vsel %vm1890_vm10, 1.0, %v7237_v36  ;;  %v6887_v8 = vld [vmem:[#allocation5 + $0x310] sm:$0xff]   ;;  %6207 = vmatprep.subr.bf16.mxu0 %v6886_v43  ;;  %v7257_v43 = vmov 31  }
 0x36d   : > { %v7989_v50 = vadd.f32 %v6137_v45, %v7900_v19  ;;  %v6140_v53 = vadd.f32 %v6139_v52, %v6138_v47  ;;  %v7991_v32 = vpop.permute.xlu1 %1859  ;;  %6208 = vmatpush3.bf16.msra.mxu0 %v6887_v8  ;;  %v6890_v52 = vld [vmem:[#allocation5 + $0x360] sm:$0xff]   ;;  %v7258_v8 = vmov 32  }
 0x36e   : > { %vm1864_vm1 = vcmp.eq.s32.totalorder %v7571_v31, %v7991_v32  ;;  %6209 = vmatprep.subr.bf16.mxu0 %v6888_v6  ;;  %v6891_v32 = vld [vmem:[#allocation5 + $0x320] sm:$0xff]  }
 0x36f   : > { %v7994_v25 = vadd.f32 %v6140_v53, %v7904_v30  ;;  %v5672_v21 = vsel %vm1864_vm1, 1.0, %v7237_v36  ;;  %v6898_v6 = vld [vmem:[#allocation5 + $0x3c0] sm:$0xff]  }
 0x370   : > { %v1874_v41 = vpack.c.bf16 %v5672_v21, %v5671_v4  ;;  %6231 = vmatprep.subr.bf16.mxu1 %v6898_v6 }
 0x371   : > { %v6141_v26 = vpop.f32.mrb[12].mxu1  ;;  %6210 = vmatpush3.bf16.msra.mxu0 %v6889_v9  ;;  %v6899_v9 = vld [vmem:[#allocation5 + $0x380] sm:$0xff]  }
 0x372   : > { %v6142_v10 = vpop.f32.mrb[13].mxu1  ;;  %v1880_v58 = vpop.permute.xlu1 %1879  ;;  %6211 = vmatprep.subr.bf16.mxu0 %v6890_v52  ;;  %v6900_v52 = vld [vmem:[#allocation5 + $0x3c8] sm:$0xff]  }
 0x373   : > { %v6143_v56 = vadd.f32 %v6142_v10, %v6141_v26  ;;  %vm1888_vm9 = vcmp.eq.s32.totalorder %v7571_v31, %v1880_v58  ;;  %v6144_v19 = vpop.f32.mrb[14].mxu1  ;;  %v6892_v26 = vld [vmem:[#allocation5 + $0x368] sm:$0xff]  }
 0x374   : > { %v5674_v27 = vsel %vm1888_vm9, 1.0, %v7237_v36  ;;  %v6145_v54 = vpop.f32.mrb[15].mxu1  ;;  %v6893_v58 = vld [vmem:[#allocation5 + $0x328] sm:$0xff]  }
 0x375   : > { %v8001_v30 = vadd.f32 %v6143_v56, %v7914_v28  ;;  %v1899_v60 = vpack.c.bf16 %v5674_v27, %v5673_v13  ;;  %v6146_v61 = vadd.f32 %v6145_v54, %v6144_v19  ;;  %6212 = vmatpush3.bf16.msra.mxu0 %v6891_v32  ;;  %v6894_v19 = vld [vmem:[#allocation5 + $0x370] sm:$0xff]  }
 0x376   : > { %v1883_v59 = vpop.permute.xlu1 %1882  ;;  %6213 = vmatprep.subr.bf16.mxu0 %v6892_v26 }
 0x377   : > { %v8005_v22 = vadd.f32 %v6146_v61, %v7917_v46  ;;  %vm1889_vm11 = vcmp.eq.s32.totalorder %v7571_v31, %v1883_v59  ;;  %1909 = vrot.lane.b32.xlu1 %v1899_v60, %s7238_s23  ;;  %v8021_v46 = vld [vmem:[%s7492_s27 + $0x8] sm:$0xff]  ;;  %v6895_v61 = vld [vmem:[#allocation5 + $0x330] sm:$0xff]  }
 0x378   : > { %v5675_v63 = vsel %vm1889_vm11, 1.0, %v7237_v36 }
 0x379   : > { %v1900_v28 = vpack.c.bf16 %v5676_v62, %v5675_v63  ;;  %6214 = vmatpush3.bf16.msra.mxu0 %v6893_v58  ;;  %v6896_v62 = vld [vmem:[#allocation5 + $0x378] sm:$0xff]  }
 0x37a   : > { %6215 = vmatprep.subr.bf16.mxu0 %v6894_v19 }
 0x37b   : > { %2111 = vperm.xlu1 %6682, %v8012_v0   ;;  %1911 = vrot.lane.b32.xlu0 %v1900_v28, %s7238_s23 }
 0x37d   : > { %6216 = vmatpush3.bf16.msra.mxu0 %v6895_v61 }
 0x37e   : > { %6217 = vmatprep.subr.bf16.mxu0 %v6896_v62 }
 0x37f   : > { %2117 = vperm.xlu1 %6682, %v8017_v57   ;;  %2114 = vperm.xlu0 %6683, %v8021_v46  }
 0x383   : > { %2120 = vperm.xlu1 %6682, %v8025_v2   ;;  %6684 = vset.pattern.permute.xlu0 %v7251_v34 }
 0x384   : > { %2137 = vperm.xlu0 %6684, %v8012_v0  }
 0x387   : > { %6685 = vset.pattern.permute.xlu1 %v7251_v34  ;;  %v6897_v34 = vld [vmem:[#allocation5 + $0x338] sm:$0xff]  }
 0x388   : > { %2140 = vperm.xlu1 %6685, %v8021_v46   ;;  %2146 = vperm.xlu0 %6684, %v8025_v2  }
 0x389   : > { %6218 = vmatpush3.bf16.msra.mxu0 %v6897_v34 }
 0x38c   : > { %2143 = vperm.xlu1 %6685, %v8017_v57   ;;  %6687 = vset.pattern.permute.xlu0 %v7252_v49 }
 0x38d   : > { %2166 = vperm.xlu0 %6687, %v8021_v46  }
 0x390   : > { %6686 = vset.pattern.permute.xlu1 %v7252_v49 }
 0x391   : > { %2163 = vperm.xlu1 %6686, %v8012_v0   ;;  %6688 = vset.pattern.permute.xlu0 %v7253_v3 }
 0x392   : > { %2189 = vperm.xlu0 %6688, %v8012_v0  }
 0x395   : > { %2169 = vperm.xlu1 %6686, %v8017_v57  }
 0x396   : > { %2198 = vperm.xlu0 %6688, %v8025_v2  }
 0x399   : > { %2172 = vperm.xlu1 %6686, %v8025_v2  }
 0x39a   : > { %6691 = vset.pattern.permute.xlu0 %v7254_v12 }
 0x39d   : > { %6689 = vset.pattern.permute.xlu1 %v7253_v3 }
 0x39e   : > { %2192 = vperm.xlu1 %6689, %v8021_v46  }
 0x3a2   : > { %2195 = vperm.xlu1 %6689, %v8017_v57  }
 0x3a6   : > { %6690 = vset.pattern.permute.xlu1 %v7254_v12 }
 0x3d3   : > { %v1904_v17 = vpop.permute.xlu1 %1903 }
 0x3d4   : > { %v1915_v7 = vsel %vm355_vm14, %v1821_v14, %v1904_v17 }
 0x3d7   : > { %v1906_v5 = vpop.permute.xlu0 %1905 }
 0x3d8   : > { %v1919_v37 = vsel %vm355_vm14, %v1822_v48, %v1906_v5 }
 0x3e9   : > { %v1910_v24 = vpop.permute.xlu1 %1909 }
 0x3ea   : > { %v1923_v35 = vsel %vm355_vm14, %v1873_v11, %v1910_v24 }
 0x3eb   : > { %2089 = vmatprep.mubr.bf16.mxu1 %v1923_v35 }
 0x3ec   : > { %2090 = vmatmul.mubr.bf16.vlgmr.msra.gmra.mrb[16].mxu1 %v1915_v7 }
 0x3ed   : > { %v1912_v42 = vpop.permute.xlu0 %1911  ;;  %6232 = vmatpush3.bf16.msra.mxu1 %v6899_v9 }
 0x3ee   : > { %v1927_v1 = vsel %vm355_vm14, %v1874_v41, %v1912_v42  ;;  %6233 = vmatprep.subr.bf16.mxu1 %v6900_v52 }
 0x3ef   : > { %2097 = vmatprep.mubr.bf16.mxu1 %v1927_v1 }
 0x3f4   : > { %2098 = vmatmul.mubr.bf16.gmra.mrb[20].mxu1 %v1919_v37 }
 0x3fa   : > { %v8068_v23 = vpop.permute.xlu1 %2111 }
 0x3fb   : > { %vm2122_vm1 = vcmp.eq.s32.totalorder %v7571_v31, %v8068_v23 }
 0x3fe   : > { %v8070_v44 = vpop.permute.xlu1 %2117  ;;  %v8072_v45 = vpop.permute.xlu0 %2114 }
 0x3ff   : > { %vm2123_vm0 = vcmp.eq.s32.totalorder %v7571_v31, %v8072_v45 }
 0x402   : > { %v8074_v47 = vpop.permute.xlu1 %2120 }
 0x403   : > { %v2138_v53 = vpop.permute.xlu0 %2137  ;;  %vm2125_vm4 = vcmp.eq.s32.totalorder %v7571_v31, %v8074_v47 }
 0x404   : > { %vm2148_vm5 = vcmp.eq.s32.totalorder %v7571_v31, %v2138_v53  ;;  %v6901_v53 = vld [vmem:[#allocation5 + $0x388] sm:$0xff]   ;;  %v5696_v62 = vsel %vm2125_vm4, 1.0, %v7237_v36 }
 0x405   : > { %v5697_v13 = vsel %vm2148_vm5, 1.0, %v7237_v36  ;;  %6234 = vmatpush3.bf16.msra.mxu1 %v6901_v53  ;;  %vm2124_vm5 = vcmp.eq.s32.totalorder %v7571_v31, %v8070_v44  ;;  %v6904_v44 = vld [vmem:[#allocation5 + $0x3d8] sm:$0xff]  }
 0x407   : > { %v2141_v29 = vpop.permute.xlu1 %2140  ;;  %v2147_v10 = vpop.permute.xlu0 %2146 }
 0x408   : > { %vm2149_vm6 = vcmp.eq.s32.totalorder %v7571_v31, %v2141_v29  ;;  %vm2151_vm7 = vcmp.eq.s32.totalorder %v7571_v31, %v2147_v10  ;;  %v5693_v10 = vsel %vm2122_vm1, 1.0, %v7237_v36 }
 0x409   : > { %v5698_v56 = vsel %vm2149_vm6, 1.0, %v7237_v36  ;;  %v5700_v60 = vsel %vm2151_vm7, 1.0, %v7237_v36 }
 0x40a   : > { %v2160_v27 = vpack.c.bf16 %v5698_v56, %v5697_v13  ;;  %v5694_v13 = vsel %vm2123_vm0, 1.0, %v7237_v36 }
 0x40b   : > { %v2144_v54 = vpop.permute.xlu1 %2143  ;;  %v2134_v45 = vpack.c.bf16 %v5694_v13, %v5693_v10 }
 0x40c   : > { %vm2150_vm8 = vcmp.eq.s32.totalorder %v7571_v31, %v2144_v54  ;;  %2216 = vrot.lane.b32.xlu1 %v2160_v27, %s7238_s23  ;;  %v8088_v49 = vpop.permute.xlu0 %2166 }
 0x40d   : > { %v5699_v59 = vsel %vm2150_vm8, 1.0, %v7237_v36  ;;  %vm2175_vm15 = vcmp.eq.s32.totalorder %v7571_v31, %v8088_v49 }
 0x40e   : > { %v2161_v63 = vpack.c.bf16 %v5700_v60, %v5699_v59  ;;  %v5702_v26 = vsel %vm2175_vm15, 1.0, %v7237_v36 }
 0x410   : > { %v8085_v28 = vpop.permute.xlu1 %2163  ;;  %2218 = vrot.lane.b32.xlu0 %v2161_v63, %s7238_s23 }
 0x411   : > { %v2190_v40 = vpop.permute.xlu0 %2189  ;;  %vm2174_vm13 = vcmp.eq.s32.totalorder %v7571_v31, %v8085_v28  ;;  %v5695_v28 = vsel %vm2124_vm5, 1.0, %v7237_v36 }
 0x412   : > { %vm2200_vm9 = vcmp.eq.s32.totalorder %v7571_v31, %v2190_v40  ;;  %v5701_v32 = vsel %vm2174_vm13, 1.0, %v7237_v36  ;;  %v2135_v34 = vpack.c.bf16 %v5696_v62, %v5695_v28  ;;  %v6905_v40 = vld [vmem:[#allocation5 + $0x398] sm:$0xff]  }
 0x413   : > { %v5705_v21 = vsel %vm2200_vm9, 1.0, %v7237_v36  ;;  %v2186_v58 = vpack.c.bf16 %v5702_v26, %v5701_v32 }
 0x414   : > { %v6163_v3 = vpop.f32.mrb[16].mxu0  ;;  %v8090_v12 = vpop.permute.xlu1 %2169 }
 0x415   : > { %v6164_v55 = vpop.f32.mrb[17].mxu0  ;;  %v2199_v14 = vpop.permute.xlu0 %2198  ;;  %vm2176_vm3 = vcmp.eq.s32.totalorder %v7571_v31, %v8090_v12 }
 0x416   : > { %v6165_v15 = vadd.f32 %v6164_v55, %v6163_v3  ;;  %v6166_v33 = vpop.f32.mrb[18].mxu0  ;;  %vm2203_vm11 = vcmp.eq.s32.totalorder %v7571_v31, %v2199_v14  ;;  %v5703_v54 = vsel %vm2176_vm3, 1.0, %v7237_v36  ;;  %v6902_v3 = vld [vmem:[#allocation5 + $0x3d0] sm:$0xff]  }
 0x417   : > { %v6167_v16 = vpop.f32.mrb[19].mxu0  ;;  %v5708_v51 = vsel %vm2203_vm11, 1.0, %v7237_v36  ;;  %v6903_v55 = vld [vmem:[#allocation5 + $0x390] sm:$0xff]   ;;  %6235 = vmatprep.subr.bf16.mxu1 %v6902_v3  ;;  %v7261_v3 = vmov 35  }
 0x418   : > { %v8093_v38 = vadd.f32 %v6165_v15, %v7989_v50  ;;  %v6168_v17 = vadd.f32 %v6167_v16, %v6166_v33  ;;  %v8095_v18 = vpop.permute.xlu1 %2172  ;;  %6236 = vmatpush3.bf16.msra.mxu1 %v6903_v55  ;;  %v6906_v16 = vld [vmem:[#allocation5 + $0x3e0] sm:$0xff]   ;;  %v7262_v55 = vmov 36  }
 0x419   : > { %vm2177_vm2 = vcmp.eq.s32.totalorder %v7571_v31, %v8095_v18  ;;  %6237 = vmatprep.subr.bf16.mxu1 %v6904_v44  ;;  %v6907_v18 = vld [vmem:[#allocation5 + $0x3a0] sm:$0xff]  }
 0x41a   : > { %v8098_v20 = vadd.f32 %v6168_v17, %v7994_v25  ;;  %v5704_v56 = vsel %vm2177_vm2, 1.0, %v7237_v36  ;;  %v6914_v44 = vld [vmem:[#allocation5 + $0x440] sm:$0xff]  }
 0x41b   : > { %v2187_v61 = vpack.c.bf16 %v5704_v56, %v5703_v54  ;;  %6259 = vmatprep.subr.bf16.mxu0 %v6914_v44 }
 0x41c   : > { %v6169_v11 = vpop.f32.mrb[20].mxu0  ;;  %6238 = vmatpush3.bf16.msra.mxu1 %v6905_v40  ;;  %v6915_v40 = vld [vmem:[#allocation5 + $0x400] sm:$0xff]  }
 0x41d   : > { %v6170_v5 = vpop.f32.mrb[21].mxu0  ;;  %v2193_v24 = vpop.permute.xlu1 %2192  ;;  %6239 = vmatprep.subr.bf16.mxu1 %v6906_v16  ;;  %v6916_v16 = vld [vmem:[#allocation5 + $0x448] sm:$0xff]  }
 0x41e   : > { %v6171_v35 = vadd.f32 %v6170_v5, %v6169_v11  ;;  %vm2201_vm10 = vcmp.eq.s32.totalorder %v7571_v31, %v2193_v24  ;;  %v6172_v4 = vpop.f32.mrb[22].mxu0  ;;  %v6908_v11 = vld [vmem:[#allocation5 + $0x3e8] sm:$0xff]  }
 0x41f   : > { %v5706_v50 = vsel %vm2201_vm10, 1.0, %v7237_v36  ;;  %v6173_v7 = vpop.f32.mrb[23].mxu0  ;;  %v6909_v24 = vld [vmem:[#allocation5 + $0x3a8] sm:$0xff]  }
 0x420   : > { %v8105_v41 = vadd.f32 %v6171_v35, %v8001_v30  ;;  %v2212_v25 = vpack.c.bf16 %v5706_v50, %v5705_v21  ;;  %v6174_v42 = vadd.f32 %v6173_v7, %v6172_v4  ;;  %v7255_v30 = vmov 29   ;;  %6240 = vmatpush3.bf16.msra.mxu1 %v6907_v18  ;;  %v6910_v4 = vld [vmem:[#allocation5 + $0x3f0] sm:$0xff]  }
 0x421   : > { %v2196_v39 = vpop.permute.xlu1 %2195  ;;  %6241 = vmatprep.subr.bf16.mxu1 %v6908_v11 }
 0x422   : > { %v8109_v1 = vadd.f32 %v6174_v42, %v8005_v22  ;;  %vm2202_vm12 = vcmp.eq.s32.totalorder %v7571_v31, %v2196_v39  ;;  %2222 = vrot.lane.b32.xlu1 %v2212_v25, %s7238_s23  ;;  %v7256_v22 = vmov 30   ;;  %v6911_v42 = vld [vmem:[#allocation5 + $0x3b0] sm:$0xff]  }
 0x423   : > { %v5707_v48 = vsel %vm2202_vm12, 1.0, %v7237_v36 }
 0x424   : > { %v2213_v37 = vpack.c.bf16 %v5708_v51, %v5707_v48  ;;  %6242 = vmatpush3.bf16.msra.mxu1 %v6909_v24  ;;  %v6912_v51 = vld [vmem:[#allocation5 + $0x3f8] sm:$0xff]  }
 0x425   : > { %6243 = vmatprep.subr.bf16.mxu1 %v6910_v4 }
 0x426   : > { %2424 = vperm.xlu1 %6690, %v8012_v0   ;;  %2224 = vrot.lane.b32.xlu0 %v2213_v37, %s7238_s23 }
 0x428   : > { %6244 = vmatpush3.bf16.msra.mxu1 %v6911_v42 }
 0x429   : > { %6245 = vmatprep.subr.bf16.mxu1 %v6912_v51 }
 0x42a   : > { %2430 = vperm.xlu1 %6690, %v8017_v57   ;;  %2427 = vperm.xlu0 %6691, %v8021_v46  }
 0x42e   : > { %2433 = vperm.xlu1 %6690, %v8025_v2   ;;  %6692 = vset.pattern.permute.xlu0 %v7255_v30 }
 0x42f   : > { %2450 = vperm.xlu0 %6692, %v8012_v0  }
 0x432   : > { %6693 = vset.pattern.permute.xlu1 %v7255_v30  ;;  %v6913_v30 = vld [vmem:[#allocation5 + $0x3b8] sm:$0xff]  }
 0x433   : > { %2453 = vperm.xlu1 %6693, %v8021_v46   ;;  %2459 = vperm.xlu0 %6692, %v8025_v2  }
 0x434   : > { %6246 = vmatpush3.bf16.msra.mxu1 %v6913_v30 }
 0x437   : > { %2456 = vperm.xlu1 %6693, %v8017_v57   ;;  %6695 = vset.pattern.permute.xlu0 %v7256_v22 }
 0x438   : > { %2479 = vperm.xlu0 %6695, %v8021_v46  }
 0x43b   : > { %6694 = vset.pattern.permute.xlu1 %v7256_v22 }
 0x43c   : > { %2476 = vperm.xlu1 %6694, %v8012_v0   ;;  %6696 = vset.pattern.permute.xlu0 %v7257_v43 }
 0x43d   : > { %2502 = vperm.xlu0 %6696, %v8012_v0  }
 0x440   : > { %2482 = vperm.xlu1 %6694, %v8017_v57  }
 0x441   : > { %2511 = vperm.xlu0 %6696, %v8025_v2  }
 0x444   : > { %2485 = vperm.xlu1 %6694, %v8025_v2  }
 0x445   : > { %6699 = vset.pattern.permute.xlu0 %v7258_v8 }
 0x448   : > { %6697 = vset.pattern.permute.xlu1 %v7257_v43 }
 0x449   : > { %2505 = vperm.xlu1 %6697, %v8021_v46  }
 0x44d   : > { %2508 = vperm.xlu1 %6697, %v8017_v57  }
 0x451   : > { %6698 = vset.pattern.permute.xlu1 %v7258_v8 }
 0x47e   : > { %v2217_v29 = vpop.permute.xlu1 %2216 }
 0x47f   : > { %v2228_v60 = vsel %vm355_vm14, %v2134_v45, %v2217_v29 }
 0x482   : > { %v2219_v23 = vpop.permute.xlu0 %2218 }
 0x483   : > { %v2232_v47 = vsel %vm355_vm14, %v2135_v34, %v2219_v23 }
 0x494   : > { %v2223_v19 = vpop.permute.xlu1 %2222 }
 0x495   : > { %v2236_v27 = vsel %vm355_vm14, %v2186_v58, %v2223_v19 }
 0x496   : > { %2402 = vmatprep.mubr.bf16.mxu0 %v2236_v27 }
 0x497   : > { %2403 = vmatmul.mubr.bf16.vlgmr.msra.gmra.mrb[24].mxu0 %v2228_v60 }
 0x498   : > { %v2225_v59 = vpop.permute.xlu0 %2224  ;;  %6260 = vmatpush3.bf16.msra.mxu0 %v6915_v40 }
 0x499   : > { %v2240_v63 = vsel %vm355_vm14, %v2187_v61, %v2225_v59  ;;  %6261 = vmatprep.subr.bf16.mxu0 %v6916_v16 }
 0x49a   : > { %2410 = vmatprep.mubr.bf16.mxu0 %v2240_v63 }
 0x49f   : > { %2411 = vmatmul.mubr.bf16.gmra.mrb[28].mxu0 %v2232_v47 }
 0x4a5   : > { %v8160_v49 = vpop.permute.xlu1 %2424 }
 0x4a6   : > { %vm2435_vm2 = vcmp.eq.s32.totalorder %v7571_v31, %v8160_v49 }
 0x4a9   : > { %v8162_v12 = vpop.permute.xlu1 %2430  ;;  %v8164_v15 = vpop.permute.xlu0 %2427 }
 0x4aa   : > { %vm2436_vm1 = vcmp.eq.s32.totalorder %v7571_v31, %v8164_v15 }
 0x4ad   : > { %v8166_v33 = vpop.permute.xlu1 %2433 }
 0x4ae   : > { %v2451_v17 = vpop.permute.xlu0 %2450  ;;  %vm2438_vm5 = vcmp.eq.s32.totalorder %v7571_v31, %v8166_v33 }
 0x4af   : > { %vm2461_vm6 = vcmp.eq.s32.totalorder %v7571_v31, %v2451_v17  ;;  %v6917_v17 = vld [vmem:[#allocation5 + $0x408] sm:$0xff]   ;;  %v5728_v51 = vsel %vm2438_vm5, 1.0, %v7237_v36 }
 0x4b0   : > { %v5729_v21 = vsel %vm2461_vm6, 1.0, %v7237_v36  ;;  %6262 = vmatpush3.bf16.msra.mxu0 %v6917_v17  ;;  %vm2437_vm6 = vcmp.eq.s32.totalorder %v7571_v31, %v8162_v12  ;;  %v6920_v12 = vld [vmem:[#allocation5 + $0x458] sm:$0xff]  }
 0x4b2   : > { %v2454_v14 = vpop.permute.xlu1 %2453  ;;  %v2460_v5 = vpop.permute.xlu0 %2459 }
 0x4b3   : > { %vm2462_vm7 = vcmp.eq.s32.totalorder %v7571_v31, %v2454_v14  ;;  %vm2464_vm8 = vcmp.eq.s32.totalorder %v7571_v31, %v2460_v5  ;;  %v5725_v5 = vsel %vm2435_vm2, 1.0, %v7237_v36 }
 0x4b4   : > { %v5730_v35 = vsel %vm2462_vm7, 1.0, %v7237_v36  ;;  %v5732_v25 = vsel %vm2464_vm8, 1.0, %v7237_v36 }
 0x4b5   : > { %v2473_v50 = vpack.c.bf16 %v5730_v35, %v5729_v21  ;;  %v5726_v21 = vsel %vm2436_vm1, 1.0, %v7237_v36 }
 0x4b6   : > { %v2457_v7 = vpop.permute.xlu1 %2456  ;;  %v2447_v15 = vpack.c.bf16 %v5726_v21, %v5725_v5 }
 0x4b7   : > { %vm2463_vm9 = vcmp.eq.s32.totalorder %v7571_v31, %v2457_v7  ;;  %2529 = vrot.lane.b32.xlu1 %v2473_v50, %s7238_s23  ;;  %v8180_v22 = vpop.permute.xlu0 %2479 }
 0x4b8   : > { %v5731_v39 = vsel %vm2463_vm9, 1.0, %v7237_v36  ;;  %vm2488_vm0 = vcmp.eq.s32.totalorder %v7571_v31, %v8180_v22 }
 0x4b9   : > { %v2474_v48 = vpack.c.bf16 %v5732_v25, %v5731_v39  ;;  %v5734_v11 = vsel %vm2488_vm0, 1.0, %v7237_v36 }
 0x4bb   : > { %v8177_v37 = vpop.permute.xlu1 %2476  ;;  %2531 = vrot.lane.b32.xlu0 %v2474_v48, %s7238_s23 }
 0x4bc   : > { %v2503_v53 = vpop.permute.xlu0 %2502  ;;  %vm2487_vm15 = vcmp.eq.s32.totalorder %v7571_v31, %v8177_v37  ;;  %v5727_v37 = vsel %vm2437_vm6, 1.0, %v7237_v36 }
 0x4bd   : > { %vm2513_vm10 = vcmp.eq.s32.totalorder %v7571_v31, %v2503_v53  ;;  %v5733_v18 = vsel %vm2487_vm15, 1.0, %v7237_v36  ;;  %v2448_v30 = vpack.c.bf16 %v5728_v51, %v5727_v37  ;;  %v6921_v53 = vld [vmem:[#allocation5 + $0x418] sm:$0xff]  }
 0x4be   : > { %v5737_v56 = vsel %vm2513_vm10, 1.0, %v7237_v36  ;;  %v2499_v24 = vpack.c.bf16 %v5734_v11, %v5733_v18 }
 0x4bf   : > { %v6191_v43 = vpop.f32.mrb[16].mxu1  ;;  %v8182_v8 = vpop.permute.xlu1 %2482 }
 0x4c0   : > { %v6192_v6 = vpop.f32.mrb[17].mxu1  ;;  %v2512_v45 = vpop.permute.xlu0 %2511  ;;  %vm2489_vm4 = vcmp.eq.s32.totalorder %v7571_v31, %v8182_v8 }
 0x4c1   : > { %v6193_v9 = vadd.f32 %v6192_v6, %v6191_v43  ;;  %v6194_v52 = vpop.f32.mrb[18].mxu1  ;;  %vm2516_vm12 = vcmp.eq.s32.totalorder %v7571_v31, %v2512_v45  ;;  %v5735_v7 = vsel %vm2489_vm4, 1.0, %v7237_v36  ;;  %v6918_v43 = vld [vmem:[#allocation5 + $0x450] sm:$0xff]  }
 0x4c2   : > { %v6195_v32 = vpop.f32.mrb[19].mxu1  ;;  %v5740_v28 = vsel %vm2516_vm12, 1.0, %v7237_v36  ;;  %v6919_v6 = vld [vmem:[#allocation5 + $0x410] sm:$0xff]   ;;  %6263 = vmatprep.subr.bf16.mxu0 %v6918_v43  ;;  %v7265_v43 = vmov 39  }
 0x4c3   : > { %v8185_v26 = vadd.f32 %v6193_v9, %v8093_v38  ;;  %v6196_v29 = vadd.f32 %v6195_v32, %v6194_v52  ;;  %v8187_v13 = vpop.permute.xlu1 %2485  ;;  %6264 = vmatpush3.bf16.msra.mxu0 %v6919_v6  ;;  %v6922_v32 = vld [vmem:[#allocation5 + $0x460] sm:$0xff]   ;;  %v7266_v6 = vmov 40  }
 0x4c4   : > { %vm2490_vm3 = vcmp.eq.s32.totalorder %v7571_v31, %v8187_v13  ;;  %6265 = vmatprep.subr.bf16.mxu0 %v6920_v12  ;;  %v6923_v13 = vld [vmem:[#allocation5 + $0x420] sm:$0xff]  }
 0x4c5   : > { %v8190_v10 = vadd.f32 %v6196_v29, %v8098_v20  ;;  %v5736_v35 = vsel %vm2490_vm3, 1.0, %v7237_v36 }
 0x4c6   : > { %v2500_v42 = vpack.c.bf16 %v5736_v35, %v5735_v7 }
 0x4c7   : > { %v6197_v58 = vpop.f32.mrb[20].mxu1  ;;  %6266 = vmatpush3.bf16.msra.mxu0 %v6921_v53 }
 0x4c8   : > { %v6198_v23 = vpop.f32.mrb[21].mxu1  ;;  %v2506_v19 = vpop.permute.xlu1 %2505  ;;  %6267 = vmatprep.subr.bf16.mxu0 %v6922_v32 }
 0x4c9   : > { %v6199_v27 = vadd.f32 %v6198_v23, %v6197_v58  ;;  %vm2514_vm11 = vcmp.eq.s32.totalorder %v7571_v31, %v2506_v19  ;;  %v6200_v54 = vpop.f32.mrb[22].mxu1  ;;  %v6924_v58 = vld [vmem:[#allocation5 + $0x468] sm:$0xff]  }
 0x4ca   : > { %v5738_v38 = vsel %vm2514_vm11, 1.0, %v7237_v36  ;;  %v6201_v60 = vpop.f32.mrb[23].mxu1  ;;  %v6925_v19 = vld [vmem:[#allocation5 + $0x428] sm:$0xff]  }
 0x4cb   : > { %v8197_v61 = vadd.f32 %v6199_v27, %v8105_v41  ;;  %v2525_v20 = vpack.c.bf16 %v5738_v38, %v5737_v56  ;;  %v6202_v59 = vadd.f32 %v6201_v60, %v6200_v54  ;;  %v7259_v41 = vmov 33   ;;  %6268 = vmatpush3.bf16.msra.mxu0 %v6923_v13  ;;  %v6926_v54 = vld [vmem:[#allocation5 + $0x470] sm:$0xff]  }
 0x4cc   : > { %v2509_v62 = vpop.permute.xlu1 %2508  ;;  %6269 = vmatprep.subr.bf16.mxu0 %v6924_v58 }
 0x4cd   : > { %v8201_v63 = vadd.f32 %v6202_v59, %v8109_v1  ;;  %vm2515_vm13 = vcmp.eq.s32.totalorder %v7571_v31, %v2509_v62  ;;  %2535 = vrot.lane.b32.xlu1 %v2525_v20, %s7238_s23  ;;  %v7260_v1 = vmov 34   ;;  %v6927_v59 = vld [vmem:[#allocation5 + $0x430] sm:$0xff]  }
 0x4ce   : > { %v5739_v34 = vsel %vm2515_vm13, 1.0, %v7237_v36 }
 0x4cf   : > { %v2526_v47 = vpack.c.bf16 %v5740_v28, %v5739_v34  ;;  %6270 = vmatpush3.bf16.msra.mxu0 %v6925_v19  ;;  %v6928_v28 = vld [vmem:[#allocation5 + $0x478] sm:$0xff]  }
 0x4d0   : > { %6271 = vmatprep.subr.bf16.mxu0 %v6926_v54 }
 0x4d1   : > { %2737 = vperm.xlu1 %6698, %v8012_v0   ;;  %2537 = vrot.lane.b32.xlu0 %v2526_v47, %s7238_s23 }
 0x4d3   : > { %6272 = vmatpush3.bf16.msra.mxu0 %v6927_v59  ;;  %v6932_v59 = vld [vmem:[#allocation5 + $0x4c8] sm:$0xff]  }
 0x4d4   : > { %6273 = vmatprep.subr.bf16.mxu0 %v6928_v28  ;;  %v6934_v28 = vld [vmem:[#allocation5 + $0x4d0] sm:$0xff]  }
 0x4d5   : > { %2743 = vperm.xlu1 %6698, %v8017_v57   ;;  %2740 = vperm.xlu0 %6699, %v8021_v46  }
 0x4d9   : > { %2746 = vperm.xlu1 %6698, %v8025_v2   ;;  %6700 = vset.pattern.permute.xlu0 %v7259_v41 }
 0x4da   : > { %2763 = vperm.xlu0 %6700, %v8012_v0  }
 0x4dd   : > { %6701 = vset.pattern.permute.xlu1 %v7259_v41  ;;  %v6929_v41 = vld [vmem:[#allocation5 + $0x438] sm:$0xff]  }
 0x4de   : > { %2766 = vperm.xlu1 %6701, %v8021_v46   ;;  %2772 = vperm.xlu0 %6700, %v8025_v2  }
 0x4df   : > { %6274 = vmatpush3.bf16.msra.mxu0 %v6929_v41 }
 0x4e2   : > { %2769 = vperm.xlu1 %6701, %v8017_v57   ;;  %6703 = vset.pattern.permute.xlu0 %v7260_v1 }
 0x4e3   : > { %2792 = vperm.xlu0 %6703, %v8021_v46  }
 0x4e6   : > { %6702 = vset.pattern.permute.xlu1 %v7260_v1 }
 0x4e7   : > { %2789 = vperm.xlu1 %6702, %v8012_v0   ;;  %6704 = vset.pattern.permute.xlu0 %v7261_v3 }
 0x4e8   : > { %2815 = vperm.xlu0 %6704, %v8012_v0  }
 0x4eb   : > { %2795 = vperm.xlu1 %6702, %v8017_v57  }
 0x4ec   : > { %2824 = vperm.xlu0 %6704, %v8025_v2  }
 0x4ef   : > { %2798 = vperm.xlu1 %6702, %v8025_v2  }
 0x4f0   : > { %6707 = vset.pattern.permute.xlu0 %v7262_v55 }
 0x4f3   : > { %6705 = vset.pattern.permute.xlu1 %v7261_v3 }
 0x4f4   : > { %2818 = vperm.xlu1 %6705, %v8021_v46  }
 0x4f8   : > { %2821 = vperm.xlu1 %6705, %v8017_v57  }
 0x4fc   : > { %6706 = vset.pattern.permute.xlu1 %v7262_v55 }
 0x529   : > { %v2530_v14 = vpop.permute.xlu1 %2529 }
 0x52a   : > { %v2541_v25 = vsel %vm355_vm14, %v2447_v15, %v2530_v14 }
 0x52d   : > { %v2532_v49 = vpop.permute.xlu0 %2531 }
 0x52e   : > { %v2545_v33 = vsel %vm355_vm14, %v2448_v30, %v2532_v49 }
 0x53f   : > { %v2536_v4 = vpop.permute.xlu1 %2535 }
 0x540   : > { %v2549_v50 = vsel %vm355_vm14, %v2499_v24, %v2536_v4 }
 0x541   : > { %2715 = vmatprep.mubr.bf16.mxu1 %v2549_v50 }
 0x542   : > { %2716 = vmatmul.mubr.bf16.vlgmr.msra.gmra.mrb[24].mxu1 %v2541_v25 }
 0x543   : > { %v2538_v39 = vpop.permute.xlu0 %2537 }
 0x544   : > { %v2553_v48 = vsel %vm355_vm14, %v2500_v42, %v2538_v39 }
 0x545   : > { %2723 = vmatprep.mubr.bf16.mxu1 %v2553_v48 }
 0x54a   : > { %2724 = vmatmul.mubr.bf16.gmra.mrb[28].mxu1 %v2545_v33 }
 0x550   : > { %v8252_v22 = vpop.permute.xlu1 %2737 }
 0x551   : > { %vm2748_vm3 = vcmp.eq.s32.totalorder %v7571_v31, %v8252_v22 }
 0x552   : > { %v5757_v12 = vsel %vm2748_vm3, 1.0, %v7237_v36 }
 0x554   : > { %v8254_v8 = vpop.permute.xlu1 %2743  ;;  %v8256_v9 = vpop.permute.xlu0 %2740 }
 0x555   : > { %vm2749_vm2 = vcmp.eq.s32.totalorder %v7571_v31, %v8256_v9 }
 0x558   : > { %v8258_v52 = vpop.permute.xlu1 %2746 }
 0x559   : > { %v2764_v29 = vpop.permute.xlu0 %2763  ;;  %vm2751_vm6 = vcmp.eq.s32.totalorder %v7571_v31, %v8258_v52 }
 0x55a   : > { %vm2774_vm7 = vcmp.eq.s32.totalorder %v7571_v31, %v2764_v29  ;;  %v5760_v19 = vsel %vm2751_vm6, 1.0, %v7237_v36 }
 0x55b   : > { %v5761_v56 = vsel %vm2774_vm7, 1.0, %v7237_v36  ;;  %vm2750_vm7 = vcmp.eq.s32.totalorder %v7571_v31, %v8254_v8  ;;  %v6933_v8 = vld [vmem:[#allocation5 + $0x488] sm:$0xff]  }
 0x55c   : > { %v5759_v54 = vsel %vm2750_vm7, 1.0, %v7237_v36 }
 0x55d   : > { %v2767_v45 = vpop.permute.xlu1 %2766  ;;  %v2773_v23 = vpop.permute.xlu0 %2772 }
 0x55e   : > { %vm2775_vm8 = vcmp.eq.s32.totalorder %v7571_v31, %v2767_v45  ;;  %vm2777_vm9 = vcmp.eq.s32.totalorder %v7571_v31, %v2773_v23 }
 0x55f   : > { %v5762_v27 = vsel %vm2775_vm8, 1.0, %v7237_v36  ;;  %v5764_v20 = vsel %vm2777_vm9, 1.0, %v7237_v36 }
 0x560   : > { %v2786_v38 = vpack.c.bf16 %v5762_v27, %v5761_v56 }
 0x561   : > { %v2770_v60 = vpop.permute.xlu1 %2769 }
 0x562   : > { %vm2776_vm10 = vcmp.eq.s32.totalorder %v7571_v31, %v2770_v60  ;;  %2842 = vrot.lane.b32.xlu1 %v2786_v38, %s7238_s23  ;;  %v8272_v1 = vpop.permute.xlu0 %2792  ;;  %v2761_v38 = vpack.c.bf16 %v5760_v19, %v5759_v54  ;;  %v6930_v60 = vld [vmem:[#allocation5 + $0x4c0] sm:$0xff]  }
 0x563   : > { %v5763_v62 = vsel %vm2776_vm10, 1.0, %v7237_v36  ;;  %vm2801_vm1 = vcmp.eq.s32.totalorder %v7571_v31, %v8272_v1  ;;  %6287 = vmatprep.subr.bf16.mxu1 %v6930_v60  ;;  %v6936_v1 = vld [vmem:[#allocation5 + $0x4d8] sm:$0xff]   ;;  %v8397_v60 = vld [vmem:[%s7492_s27 + $0x10] sm:$0xff] }
 0x564   : > { %v2787_v34 = vpack.c.bf16 %v5764_v20, %v5763_v62  ;;  %v6931_v20 = vld [vmem:[#allocation5 + $0x480] sm:$0xff]  }
 0x565   : > { %6288 = vmatpush3.bf16.msra.mxu1 %v6931_v20  ;;  %v8405_v20 = vld [vmem:[%s7492_s27 + $0x18] sm:$0xff] }
 0x566   : > { %v8269_v47 = vpop.permute.xlu1 %2789  ;;  %2844 = vrot.lane.b32.xlu0 %v2787_v34, %s7238_s23  ;;  %6289 = vmatprep.subr.bf16.mxu1 %v6932_v59  ;;  %v7267_v59 = vmov 41  }
 0x567   : > { %v2816_v17 = vpop.permute.xlu0 %2815  ;;  %vm2800_vm0 = vcmp.eq.s32.totalorder %v7571_v31, %v8269_v47  ;;  %v6935_v47 = vld [vmem:[#allocation5 + $0x490] sm:$0xff]  }
 0x568   : > { %vm2826_vm11 = vcmp.eq.s32.totalorder %v7571_v31, %v2816_v17 }
 0x569   : > { %v5769_v35 = vsel %vm2826_vm11, 1.0, %v7237_v36  ;;  %6290 = vmatpush3.bf16.msra.mxu1 %v6933_v8  ;;  %v7268_v8 = vmov 43  }
 0x56a   : > { %v6219_v3 = vpop.f32.mrb[24].mxu0  ;;  %v8274_v55 = vpop.permute.xlu1 %2795  ;;  %6291 = vmatprep.subr.bf16.mxu1 %v6934_v28  ;;  %v7269_v28 = vmov 47  }
 0x56b   : > { %v6220_v44 = vpop.f32.mrb[25].mxu0  ;;  %v2825_v15 = vpop.permute.xlu0 %2824  ;;  %vm2802_vm5 = vcmp.eq.s32.totalorder %v7571_v31, %v8274_v55  ;;  %v6937_v55 = vld [vmem:[#allocation5 + $0x498] sm:$0xff]  }
 0x56c   : > { %v6221_v40 = vadd.f32 %v6220_v44, %v6219_v3  ;;  %v6222_v16 = vpop.f32.mrb[26].mxu0  ;;  %vm2829_vm13 = vcmp.eq.s32.totalorder %v7571_v31, %v2825_v15  ;;  %v5767_v58 = vsel %vm2802_vm5, 1.0, %v7237_v36  ;;  %v6941_v15 = vld [vmem:[#allocation5 + $0x4a8] sm:$0xff]  }
 0x56d   : > { %v6223_v18 = vpop.f32.mrb[27].mxu0  ;;  %v5772_v37 = vsel %vm2829_vm13, 1.0, %v7237_v36  ;;  %6292 = vmatpush3.bf16.msra.mxu1 %v6935_v47  ;;  %v7270_v47 = vmov 45  }
 0x56e   : > { %v8277_v11 = vadd.f32 %v6221_v40, %v8185_v26  ;;  %v6224_v14 = vadd.f32 %v6223_v18, %v6222_v16  ;;  %v8279_v21 = vpop.permute.xlu1 %2798  ;;  %6293 = vmatprep.subr.bf16.mxu1 %v6936_v1  ;;  %v6938_v40 = vld [vmem:[#allocation5 + $0x4e0] sm:$0xff]   ;;  %v7271_v1 = vmov 51  }
 0x56f   : > { %vm2803_vm4 = vcmp.eq.s32.totalorder %v7571_v31, %v8279_v21  ;;  %v6939_v16 = vld [vmem:[#allocation5 + $0x4a0] sm:$0xff]  }
 0x570   : > { %v8282_v5 = vadd.f32 %v6224_v14, %v8190_v10  ;;  %v5768_v32 = vsel %vm2803_vm4, 1.0, %v7237_v36 }
 0x571   : > { %v2813_v56 = vpack.c.bf16 %v5768_v32, %v5767_v58  ;;  %6294 = vmatpush3.bf16.msra.mxu1 %v6937_v55  ;;  %v7272_v55 = vmov 49  }
 0x572   : > { %v6225_v24 = vpop.f32.mrb[28].mxu0  ;;  %6295 = vmatprep.subr.bf16.mxu1 %v6938_v40  ;;  %v7274_v40 = vmov 53  }
 0x573   : > { %v6226_v49 = vpop.f32.mrb[29].mxu0  ;;  %v2819_v4 = vpop.permute.xlu1 %2818 }
 0x574   : > { %v6227_v50 = vadd.f32 %v6226_v49, %v6225_v24  ;;  %vm2827_vm12 = vcmp.eq.s32.totalorder %v7571_v31, %v2819_v4  ;;  %v6228_v7 = vpop.f32.mrb[30].mxu0  ;;  %v6940_v24 = vld [vmem:[#allocation5 + $0x4e8] sm:$0xff]  }
 0x575   : > { %v5770_v26 = vsel %vm2827_vm12, 1.0, %v7237_v36  ;;  %v6229_v25 = vpop.f32.mrb[31].mxu0  ;;  %6296 = vmatpush3.bf16.msra.mxu1 %v6939_v16  ;;  %v7275_v16 = vmov 59  }
 0x576   : > { %v8289_v42 = vadd.f32 %v6227_v50, %v8197_v61  ;;  %v2838_v10 = vpack.c.bf16 %v5770_v26, %v5769_v35  ;;  %v6230_v39 = vadd.f32 %v6229_v25, %v6228_v7  ;;  %v7263_v61 = vmov 37   ;;  %6297 = vmatprep.subr.bf16.mxu1 %v6940_v24  ;;  %v6942_v7 = vld [vmem:[#allocation5 + $0x4f0] sm:$0xff]  }
 0x577   : > { %v2822_v51 = vpop.permute.xlu1 %2821  ;;  %v6943_v26 = vld [vmem:[#allocation5 + $0x4b0] sm:$0xff]   ;;  %v7280_v24 = vmov 42  }
 0x578   : > { %v8293_v48 = vadd.f32 %v6230_v39, %v8201_v63  ;;  %vm2828_vm15 = vcmp.eq.s32.totalorder %v7571_v31, %v2822_v51  ;;  %2848 = vrot.lane.b32.xlu1 %v2838_v10, %s7238_s23  ;;  %v7264_v63 = vmov 38   ;;  %v6944_v39 = vld [vmem:[#allocation5 + $0x4f8] sm:$0xff]  }
 0x579   : > { %v5771_v30 = vsel %vm2828_vm15, 1.0, %v7237_v36  ;;  %6298 = vmatpush3.bf16.msra.mxu1 %v6941_v15  ;;  %v7281_v15 = vmov 44  }
 0x57a   : > { %v2839_v33 = vpack.c.bf16 %v5772_v37, %v5771_v30  ;;  %6299 = vmatprep.subr.bf16.mxu1 %v6942_v7  ;;  %v6945_v37 = vld [vmem:[#allocation5 + $0x4b8] sm:$0xff]  }
 0x57c   : > { %3050 = vperm.xlu1 %6706, %v8012_v0   ;;  %2850 = vrot.lane.b32.xlu0 %v2839_v33, %s7238_s23 }
 0x57d   : > { %6300 = vmatpush3.bf16.msra.mxu1 %v6943_v26 }
 0x57e   : > { %6301 = vmatprep.subr.bf16.mxu1 %v6944_v39  ;;  %v7282_v39 = vmov 54  }
 0x580   : > { %3056 = vperm.xlu1 %6706, %v8017_v57   ;;  %3053 = vperm.xlu0 %6707, %v8021_v46  }
 0x581   : > { %6302 = vmatpush3.bf16.msra.mxu1 %v6945_v37 }
 0x584   : > { %3059 = vperm.xlu1 %6706, %v8025_v2   ;;  %6708 = vset.pattern.permute.xlu0 %v7263_v61 }
 0x585   : > { %3076 = vperm.xlu0 %6708, %v8012_v0  }
 0x588   : > { %6709 = vset.pattern.permute.xlu1 %v7263_v61 }
 0x589   : > { %3079 = vperm.xlu1 %6709, %v8021_v46   ;;  %3085 = vperm.xlu0 %6708, %v8025_v2  }
 0x58d   : > { %3082 = vperm.xlu1 %6709, %v8017_v57   ;;  %6711 = vset.pattern.permute.xlu0 %v7264_v63 }
 0x58e   : > { %3105 = vperm.xlu0 %6711, %v8021_v46  }
 0x591   : > { %6710 = vset.pattern.permute.xlu1 %v7264_v63 }
 0x592   : > { %3102 = vperm.xlu1 %6710, %v8012_v0   ;;  %6712 = vset.pattern.permute.xlu0 %v7265_v43 }
 0x593   : > { %3128 = vperm.xlu0 %6712, %v8012_v0   ;;  %v5765_v0 = vsel %vm2800_vm0, 1.0, %v7237_v36 }
 0x596   : > { %3108 = vperm.xlu1 %6710, %v8017_v57  }
 0x597   : > { %3137 = vperm.xlu0 %6712, %v8025_v2  }
 0x59a   : > { %3111 = vperm.xlu1 %6710, %v8025_v2   ;;  %v5758_v2 = vsel %vm2749_vm2, 1.0, %v7237_v36 }
 0x59b   : > { %6715 = vset.pattern.permute.xlu0 %v7266_v6  ;;  %v2760_v9 = vpack.c.bf16 %v5758_v2, %v5757_v12 }
 0x59e   : > { %6713 = vset.pattern.permute.xlu1 %v7265_v43 }
 0x59f   : > { %3131 = vperm.xlu1 %6713, %v8021_v46   ;;  %v5766_v46 = vsel %vm2801_vm1, 1.0, %v7237_v36 }
 0x5a0   : > { %v2812_v53 = vpack.c.bf16 %v5766_v46, %v5765_v0 }
 0x5a3   : > { %3134 = vperm.xlu1 %6713, %v8017_v57  }
 0x5a7   : > { %6714 = vset.pattern.permute.xlu1 %v7266_v6 }
 0x5d4   : > { %v2843_v57 = vpop.permute.xlu1 %2842 }
 0x5d5   : > { %v2854_v45 = vsel %vm355_vm14, %v2760_v9, %v2843_v57 }
 0x5d8   : > { %v2845_v22 = vpop.permute.xlu0 %2844 }
 0x5d9   : > { %v2858_v52 = vsel %vm355_vm14, %v2761_v38, %v2845_v22 }
 0x5ea   : > { %v2849_v29 = vpop.permute.xlu1 %2848 }
 0x5eb   : > { %v2862_v13 = vsel %vm355_vm14, %v2812_v53, %v2849_v29 }
 0x5ec   : > { %3028 = vmatprep.mubr.bf16.mxu0 %v2862_v13 }
 0x5ed   : > { %3029 = vmatmul.mubr.bf16.vlgmr.msra.gmra.mrb[32].mxu0 %v2854_v45 }
 0x5ee   : > { %v2851_v23 = vpop.permute.xlu0 %2850 }
 0x5ef   : > { %v2866_v27 = vsel %vm355_vm14, %v2813_v56, %v2851_v23 }
 0x5f0   : > { %3036 = vmatprep.mubr.bf16.mxu0 %v2866_v27 }
 0x5f5   : > { %3037 = vmatmul.mubr.bf16.gmra.mrb[36].mxu0 %v2858_v52  ;;  %v8392_v52 = vld [vmem:[%s7492_s27] sm:$0xff] }
 0x5fb   : > { %v8344_v62 = vpop.permute.xlu1 %3050 }
 0x5fc   : > { %vm3061_vm4 = vcmp.eq.s32.totalorder %v7571_v31, %v8344_v62 }
 0x5ff   : > { %v8346_v34 = vpop.permute.xlu1 %3056  ;;  %v8348_v41 = vpop.permute.xlu0 %3053 }
 0x600   : > { %vm3062_vm3 = vcmp.eq.s32.totalorder %v7571_v31, %v8348_v41  ;;  %v5789_v41 = vsel %vm3061_vm4, 1.0, %v7237_v36 }
 0x603   : > { %v8350_v3 = vpop.permute.xlu1 %3059 }
 0x604   : > { %v3077_v44 = vpop.permute.xlu0 %3076  ;;  %vm3064_vm7 = vcmp.eq.s32.totalorder %v7571_v31, %v8350_v3 }
 0x605   : > { %vm3087_vm8 = vcmp.eq.s32.totalorder %v7571_v31, %v3077_v44  ;;  %v7273_v44 = vmov 55  }
 0x606   : > { %v5793_v18 = vsel %vm3087_vm8, 1.0, %v7237_v36  ;;  %vm3063_vm8 = vcmp.eq.s32.totalorder %v7571_v31, %v8346_v34  ;;  %v6946_v34 = vld [vmem:[#allocation5 + $0x540] sm:$0xff]  }
 0x607   : > { %v5791_v3 = vsel %vm3063_vm8, 1.0, %v7237_v36  ;;  %6315 = vmatprep.subr.bf16.mxu0 %v6946_v34 }
 0x608   : > { %v3080_v17 = vpop.permute.xlu1 %3079  ;;  %v3086_v14 = vpop.permute.xlu0 %3085 }
 0x609   : > { %vm3088_vm9 = vcmp.eq.s32.totalorder %v7571_v31, %v3080_v17  ;;  %vm3090_vm10 = vcmp.eq.s32.totalorder %v7571_v31, %v3086_v14  ;;  %v7276_v17 = vmov 57   ;;  %v7278_v14 = vmov 61  }
 0x60a   : > { %v5794_v21 = vsel %vm3088_vm9, 1.0, %v7237_v36  ;;  %v5796_v4 = vsel %vm3090_vm10, 1.0, %v7237_v36 }
 0x60b   : > { %v3099_v35 = vpack.c.bf16 %v5794_v21, %v5793_v18  ;;  %v7277_v18 = vmov 63   ;;  %v7279_v21 = vmov 46  }
 0x60c   : > { %v3083_v49 = vpop.permute.xlu1 %3082 }
 0x60d   : > { %vm3089_vm11 = vcmp.eq.s32.totalorder %v7571_v31, %v3083_v49  ;;  %3155 = vrot.lane.b32.xlu1 %v3099_v35, %s7238_s23  ;;  %v8364_v51 = vpop.permute.xlu0 %3105 }
 0x60e   : > { %v5795_v50 = vsel %vm3089_vm11, 1.0, %v7237_v36  ;;  %vm3114_vm2 = vcmp.eq.s32.totalorder %v7571_v31, %v8364_v51 }
 0x60f   : > { %v3100_v25 = vpack.c.bf16 %v5796_v4, %v5795_v50  ;;  %v5798_v49 = vsel %vm3114_vm2, 1.0, %v7237_v36  ;;  %v5790_v50 = vsel %vm3062_vm3, 1.0, %v7237_v36 }
 0x610   : > { %v3073_v62 = vpack.c.bf16 %v5790_v50, %v5789_v41  ;;  %v6964_v50 = vld [vmem:[#allocation5 + $0x5d0] sm:$0xff]  }
 0x611   : > { %v8361_v10 = vpop.permute.xlu1 %3102  ;;  %3157 = vrot.lane.b32.xlu0 %v3100_v25, %s7238_s23  ;;  %v6965_v41 = vld [vmem:[#allocation5 + $0x590] sm:$0xff]  }
 0x612   : > { %v3129_v6 = vpop.permute.xlu0 %3128  ;;  %vm3113_vm1 = vcmp.eq.s32.totalorder %v7571_v31, %v8361_v10 }
 0x613   : > { %vm3139_vm12 = vcmp.eq.s32.totalorder %v7571_v31, %v3129_v6  ;;  %v5797_v35 = vsel %vm3113_vm1, 1.0, %v7237_v36 }
 0x614   : > { %v5801_v32 = vsel %vm3139_vm12, 1.0, %v7237_v36  ;;  %v3125_v7 = vpack.c.bf16 %v5798_v49, %v5797_v35  ;;  %v6962_v49 = vld [vmem:[#allocation5 + $0x570] sm:$0xff]  }
 0x615   : > { %v6247_v30 = vpop.f32.mrb[24].mxu1  ;;  %v8366_v33 = vpop.permute.xlu1 %3108 }
 0x616   : > { %v6248_v61 = vpop.f32.mrb[25].mxu1  ;;  %v3138_v9 = vpop.permute.xlu0 %3137  ;;  %vm3115_vm6 = vcmp.eq.s32.totalorder %v7571_v31, %v8366_v33 }
 0x617   : > { %v6249_v63 = vadd.f32 %v6248_v61, %v6247_v30  ;;  %v6250_v43 = vpop.f32.mrb[26].mxu1  ;;  %vm3142_vm15 = vcmp.eq.s32.totalorder %v7571_v31, %v3138_v9  ;;  %v5799_v37 = vsel %vm3115_vm6, 1.0, %v7237_v36 }
 0x618   : > { %v6251_v0 = vpop.f32.mrb[27].mxu1  ;;  %v5804_v54 = vsel %vm3142_vm15, 1.0, %v7237_v36 }
 0x619   : > { %v8369_v46 = vadd.f32 %v6249_v63, %v8277_v11  ;;  %v6252_v57 = vadd.f32 %v6251_v0, %v6250_v43  ;;  %v8371_v2 = vpop.permute.xlu1 %3111  ;;  %v5792_v63 = vsel %vm3064_vm7, 1.0, %v7237_v36 }
 0x61a   : > { %vm3116_vm5 = vcmp.eq.s32.totalorder %v7571_v31, %v8371_v2  ;;  %v3074_v6 = vpack.c.bf16 %v5792_v63, %v5791_v3  ;;  %v6947_v2 = vld [vmem:[#allocation5 + $0x500] sm:$0xff]   ;;  %v6967_v63 = vld [vmem:[#allocation5 + $0x538] sm:$0xff]  }
 0x61b   : > { %v8374_v12 = vadd.f32 %v6252_v57, %v8282_v5  ;;  %v5800_v26 = vsel %vm3116_vm5, 1.0, %v7237_v36  ;;  %6316 = vmatpush3.bf16.msra.mxu0 %v6947_v2 }
 0x61c   : > { %v3126_v33 = vpack.c.bf16 %v5800_v26, %v5799_v37 }
 0x61d   : > { %v6253_v53 = vpop.f32.mrb[28].mxu1 }
 0x61e   : > { %v6254_v22 = vpop.f32.mrb[29].mxu1  ;;  %v3132_v29 = vpop.permute.xlu1 %3131 }
 0x61f   : > { %v6255_v13 = vadd.f32 %v6254_v22, %v6253_v53  ;;  %vm3140_vm13 = vcmp.eq.s32.totalorder %v7571_v31, %v3132_v29  ;;  %v6256_v11 = vpop.f32.mrb[30].mxu1  ;;  %v6948_v53 = vld [vmem:[#allocation5 + $0x548] sm:$0xff]   ;;  %v6950_v29 = vld [vmem:[#allocation5 + $0x550] sm:$0xff]  }
 0x620   : > { %v5802_v58 = vsel %vm3140_vm13, 1.0, %v7237_v36  ;;  %v6257_v45 = vpop.f32.mrb[31].mxu1  ;;  %6317 = vmatprep.subr.bf16.mxu0 %v6948_v53 }
 0x621   : > { %v8381_v5 = vadd.f32 %v6255_v13, %v8289_v42  ;;  %v3151_v56 = vpack.c.bf16 %v5802_v58, %v5801_v32  ;;  %v6258_v23 = vadd.f32 %v6257_v45, %v6256_v11  ;;  %v6949_v32 = vld [vmem:[#allocation5 + $0x508] sm:$0xff]   ;;  %v6951_v11 = vld [vmem:[#allocation5 + $0x510] sm:$0xff]   ;;  %v6952_v45 = vld [vmem:[#allocation5 + $0x558] sm:$0xff]  }
 0x622   : > { %v3135_v19 = vpop.permute.xlu1 %3134  ;;  %6318 = vmatpush3.bf16.msra.mxu0 %v6949_v32 }
 0x623   : > { %v8385_v27 = vadd.f32 %v6258_v23, %v8293_v48  ;;  %vm3141_vm0 = vcmp.eq.s32.totalorder %v7571_v31, %v3135_v19  ;;  %3161 = vrot.lane.b32.xlu1 %v3151_v56, %s7238_s23  ;;  %v8401_v48 = vld [vmem:[%s7492_s27 + $0x8] sm:$0xff]  ;;  %6319 = vmatprep.subr.bf16.mxu0 %v6950_v29  ;;  %v6953_v56 = vld [vmem:[#allocation5 + $0x518] sm:$0xff]   ;;  %v6954_v19 = vld [vmem:[#allocation5 + $0x560] sm:$0xff]  }
 0x624   : > { %v5803_v38 = vsel %vm3141_vm0, 1.0, %v7237_v36 }
 0x625   : > { %v3152_v42 = vpack.c.bf16 %v5804_v54, %v5803_v38  ;;  %v6955_v54 = vld [vmem:[#allocation5 + $0x520] sm:$0xff]  }
 0x626   : > { %6320 = vmatpush3.bf16.msra.mxu0 %v6951_v11  ;;  %v6956_v38 = vld [vmem:[#allocation5 + $0x5c0] sm:$0xff]  }
 0x627   : > { %3363 = vperm.xlu1 %6714, %v8392_v52   ;;  %3163 = vrot.lane.b32.xlu0 %v3152_v42, %s7238_s23  ;;  %v6970_v11 = vld [vmem:[#allocation5 + $0x5e0] sm:$0xff]  }
 0x628   : > { %6321 = vmatprep.subr.bf16.mxu0 %v6952_v45  ;;  %6343 = vmatprep.subr.bf16.mxu1 %v6956_v38 }
 0x62a   : > { %6322 = vmatpush3.bf16.msra.mxu0 %v6953_v56 }
 0x62b   : > { %3369 = vperm.xlu1 %6714, %v8397_v60   ;;  %3366 = vperm.xlu0 %6715, %v8401_v48  }
 0x62c   : > { %6323 = vmatprep.subr.bf16.mxu0 %v6954_v19 }
 0x62e   : > { %6324 = vmatpush3.bf16.msra.mxu0 %v6955_v54  ;;  %v6973_v54 = vld [vmem:[#allocation5 + $0x5a8] sm:$0xff]  }
 0x62f   : > { %3372 = vperm.xlu1 %6714, %v8405_v20   ;;  %6716 = vset.pattern.permute.xlu0 %v7267_v59 }
 0x630   : > { %3389 = vperm.xlu0 %6716, %v8392_v52  }
 0x633   : > { %6717 = vset.pattern.permute.xlu1 %v7267_v59 }
 0x634   : > { %3392 = vperm.xlu1 %6717, %v8401_v48   ;;  %6719 = vset.pattern.permute.xlu0 %v7268_v8 }
 0x635   : > { %3444 = vperm.xlu0 %6719, %v8401_v48  }
 0x638   : > { %6718 = vset.pattern.permute.xlu1 %v7268_v8 }
 0x639   : > { %3441 = vperm.xlu1 %6718, %v8392_v52   ;;  %3450 = vperm.xlu0 %6719, %v8405_v20  }
 0x63d   : > { %6720 = vset.pattern.permute.xlu1 %v7269_v28  ;;  %6724 = vset.pattern.permute.xlu0 %v7269_v28 }
 0x63e   : > { %3754 = vperm.xlu1 %6720, %v8392_v52   ;;  %3760 = vperm.xlu0 %6724, %v8397_v60  }
 0x642   : > { %3757 = vperm.xlu1 %6720, %v8401_v48   ;;  %6725 = vset.pattern.permute.xlu0 %v7270_v47 }
 0x643   : > { %3702 = vperm.xlu0 %6725, %v8392_v52  }
 0x646   : > { %6721 = vset.pattern.permute.xlu1 %v7270_v47 }
 0x647   : > { %3705 = vperm.xlu1 %6721, %v8401_v48   ;;  %3711 = vperm.xlu0 %6725, %v8405_v20  }
 0x64b   : > { %6722 = vset.pattern.permute.xlu1 %v7268_v8  ;;  %6732 = vset.pattern.permute.xlu0 %v7271_v1 }
 0x64c   : > { %3447 = vperm.xlu1 %6722, %v8397_v60   ;;  %4073 = vperm.xlu0 %6732, %v8397_v60  }
 0x650   : > { %6723 = vset.pattern.permute.xlu1 %v7267_v59  ;;  %6733 = vset.pattern.permute.xlu0 %v7272_v55  ;;  %v6957_v59 = vld [vmem:[#allocation5 + $0x580] sm:$0xff]  }
 0x651   : > { %3395 = vperm.xlu1 %6723, %v8397_v60   ;;  %4015 = vperm.xlu0 %6733, %v8392_v52  }
 0x655   : > { %3398 = vperm.xlu1 %6723, %v8405_v20   ;;  %4024 = vperm.xlu0 %6733, %v8405_v20  }
 0x659   : > { %6726 = vset.pattern.permute.xlu1 %v7269_v28  ;;  %6736 = vset.pattern.permute.xlu0 %v7273_v44  ;;  %v6958_v28 = vld [vmem:[#allocation5 + $0x568] sm:$0xff]  }
 0x65a   : > { %3763 = vperm.xlu1 %6726, %v8405_v20   ;;  %4383 = vperm.xlu0 %6736, %v8401_v48  }
 0x65b   : > { %6325 = vmatprep.subr.bf16.mxu0 %v6958_v28 }
 0x65e   : > { %6727 = vset.pattern.permute.xlu1 %v7270_v47  ;;  %4386 = vperm.xlu0 %6736, %v8397_v60   ;;  %v6959_v47 = vld [vmem:[#allocation5 + $0x528] sm:$0xff]  }
 0x65f   : > { %3708 = vperm.xlu1 %6727, %v8397_v60   ;;  %6326 = vmatpush3.bf16.msra.mxu0 %v6959_v47  ;;  %v6974_v47 = vld [vmem:[#allocation5 + $0x5f0] sm:$0xff]  }
 0x660   : > { %6327 = vmatprep.subr.bf16.mxu0 %v6962_v49 }
 0x662   : > { %6740 = vset.pattern.permute.xlu0 %v7274_v40 }
 0x663   : > { %6728 = vset.pattern.permute.xlu1 %v7271_v1  ;;  %4337 = vperm.xlu0 %6740, %v8405_v20  }
 0x664   : > { %4067 = vperm.xlu1 %6728, %v8392_v52  }
 0x667   : > { %6744 = vset.pattern.permute.xlu0 %v7275_v16 }
 0x668   : > { %4070 = vperm.xlu1 %6728, %v8401_v48   ;;  %4696 = vperm.xlu0 %6744, %v8401_v48  }
 0x66c   : > { %6729 = vset.pattern.permute.xlu1 %v7272_v55  ;;  %4699 = vperm.xlu0 %6744, %v8397_v60  }
 0x66d   : > { %4018 = vperm.xlu1 %6729, %v8401_v48  }
 0x670   : > { %6750 = vset.pattern.permute.xlu0 %v7276_v17 }
 0x671   : > { %6730 = vset.pattern.permute.xlu1 %v7273_v44  ;;  %4650 = vperm.xlu0 %6750, %v8405_v20  }
 0x672   : > { %4380 = vperm.xlu1 %6730, %v8392_v52  }
 0x675   : > { %6751 = vset.pattern.permute.xlu0 %v7277_v18 }
 0x676   : > { %6731 = vset.pattern.permute.xlu1 %v7274_v40  ;;  %5006 = vperm.xlu0 %6751, %v8392_v52  }
 0x677   : > { %4328 = vperm.xlu1 %6731, %v8392_v52  }
 0x67a   : > { %5012 = vperm.xlu0 %6751, %v8397_v60  }
 0x67b   : > { %4331 = vperm.xlu1 %6731, %v8401_v48  }
 0x67e   : > { %6752 = vset.pattern.permute.xlu0 %v7278_v14 }
 0x67f   : > { %6734 = vset.pattern.permute.xlu1 %v7271_v1  ;;  %4957 = vperm.xlu0 %6752, %v8401_v48   ;;  %v3156_v4 = vpop.permute.xlu1 %3155  ;;  %v6960_v1 = vld [vmem:[#allocation5 + $0x5c8] sm:$0xff]  }
 0x680   : > { %4076 = vperm.xlu1 %6734, %v8405_v20   ;;  %v3167_v30 = vsel %vm355_vm14, %v3073_v62, %v3156_v4  ;;  %v6963_v4 = vld [vmem:[#allocation5 + $0x530] sm:$0xff]  }
 0x681   : > { %6328 = vmatpush3.bf16.msra.mxu0 %v6963_v4 }
 0x683   : > { %4963 = vperm.xlu0 %6752, %v8405_v20   ;;  %v3158_v25 = vpop.permute.xlu0 %3157 }
 0x684   : > { %6735 = vset.pattern.permute.xlu1 %v7272_v55  ;;  %v3171_v0 = vsel %vm355_vm14, %v3074_v6, %v3158_v25  ;;  %v6961_v55 = vld [vmem:[#allocation5 + $0x588] sm:$0xff]   ;;  %v6969_v6 = vld [vmem:[#allocation5 + $0x598] sm:$0xff]  }
 0x685   : > { %4021 = vperm.xlu1 %6735, %v8397_v60  }
 0x687   : > { %6756 = vset.pattern.permute.xlu0 %v7279_v21 }
 0x688   : > { %3734 = vperm.xlu0 %6756, %v8397_v60  }
 0x689   : > { %6737 = vset.pattern.permute.xlu1 %v7280_v24 }
 0x68a   : > { %3415 = vperm.xlu1 %6737, %v8392_v52  }
 0x68c   : > { %6757 = vset.pattern.permute.xlu0 %v7281_v15 }
 0x68d   : > { %3676 = vperm.xlu0 %6757, %v8392_v52  }
 0x68e   : > { %3418 = vperm.xlu1 %6737, %v8401_v48  }
 0x691   : > { %3685 = vperm.xlu0 %6757, %v8405_v20  }
 0x692   : > { %6738 = vset.pattern.permute.xlu1 %v7273_v44 }
 0x693   : > { %4389 = vperm.xlu1 %6738, %v8405_v20  }
 0x695   : > { %v3162_v10 = vpop.permute.xlu1 %3161  ;;  %6763 = vset.pattern.permute.xlu0 %v7282_v39 }
 0x696   : > { %v3175_v51 = vsel %vm355_vm14, %v3125_v7, %v3162_v10 }
 0x697   : > { %6739 = vset.pattern.permute.xlu1 %v7274_v40  ;;  %3341 = vmatprep.mubr.bf16.mxu1 %v3175_v51 }
 0x698   : > { %4334 = vperm.xlu1 %6739, %v8397_v60   ;;  %3342 = vmatmul.mubr.bf16.vlgmr.msra.gmra.mrb[32].mxu1 %v3167_v30  ;;  %v6966_v30 = vld [vmem:[#allocation5 + $0x578] sm:$0xff]  }
 0x699   : > { %v3164_v61 = vpop.permute.xlu0 %3163  ;;  %6344 = vmatpush3.bf16.msra.mxu1 %v6957_v59  ;;  %6329 = vmatprep.subr.bf16.mxu0 %v6966_v30 }
 0x69a   : > { %v3179_v43 = vsel %vm355_vm14, %v3126_v33, %v3164_v61  ;;  %6345 = vmatprep.subr.bf16.mxu1 %v6960_v1  ;;  %6330 = vmatpush3.bf16.msra.mxu0 %v6967_v63 }
 0x69b   : > { %3349 = vmatprep.mubr.bf16.mxu1 %v3179_v43  ;;  %v6968_v43 = vld [vmem:[#allocation5 + $0x5d8] sm:$0xff]  }
 0x69c   : > { %6741 = vset.pattern.permute.xlu1 %v7279_v21 }
 0x69d   : > { %3728 = vperm.xlu1 %6741, %v8392_v52   ;;  %6346 = vmatpush3.bf16.msra.mxu1 %v6961_v55 }
 0x69e   : > { %6347 = vmatprep.subr.bf16.mxu1 %v6964_v50 }
 0x6a0   : > { %3350 = vmatmul.mubr.bf16.gmra.mrb[36].mxu1 %v3171_v0 }
 0x6a1   : > { %3731 = vperm.xlu1 %6741, %v8401_v48   ;;  %6348 = vmatpush3.bf16.msra.mxu1 %v6965_v41 }
 0x6a2   : > { %6349 = vmatprep.subr.bf16.mxu1 %v6968_v43 }
 0x6a5   : > { %6742 = vset.pattern.permute.xlu1 %v7281_v15  ;;  %6350 = vmatpush3.bf16.msra.mxu1 %v6969_v6 }
 0x6a6   : > { %3679 = vperm.xlu1 %6742, %v8401_v48   ;;  %v8496_v57 = vpop.permute.xlu1 %3363  ;;  %6351 = vmatprep.subr.bf16.mxu1 %v6970_v11 }
 0x6aa   : > { %6743 = vset.pattern.permute.xlu1 %v7275_v16  ;;  %v8499_v9 = vpop.permute.xlu1 %3369  ;;  %v8502_v22 = vpop.permute.xlu0 %3366 }
 0x6ab   : > { %4693 = vperm.xlu1 %6743, %v8392_v52  }
 0x6ae   : > { %v8504_v13 = vpop.permute.xlu1 %3372 }
 0x6af   : > { %6745 = vset.pattern.permute.xlu1 %v7276_v17  ;;  %v3390_v58 = vpop.permute.xlu0 %3389 }
 0x6b0   : > { %4641 = vperm.xlu1 %6745, %v8392_v52   ;;  %vm3400_vm12 = vcmp.eq.s32.totalorder %v7571_v31, %v3390_v58 }
 0x6b1   : > { %v5825_v10 = vsel %vm3400_vm12, 1.0, %v7237_v36 }
 0x6b3   : > { %v3393_v23 = vpop.permute.xlu1 %3392 }
 0x6b4   : > { %4644 = vperm.xlu1 %6745, %v8401_v48   ;;  %v3445_v42 = vpop.permute.xlu0 %3444  ;;  %vm3401_vm11 = vcmp.eq.s32.totalorder %v7571_v31, %v3393_v23  ;;  %v6972_v23 = vld [vmem:[#allocation5 + $0x5e8] sm:$0xff]  }
 0x6b5   : > { %vm3453_vm10 = vcmp.eq.s32.totalorder %v7571_v31, %v3445_v42  ;;  %v5826_v25 = vsel %vm3401_vm11, 1.0, %v7237_v36 }
 0x6b6   : > { %v5834_v40 = vsel %vm3453_vm10, 1.0, %v7237_v36  ;;  %v3412_v0 = vpack.c.bf16 %v5826_v25, %v5825_v10 }
 0x6b8   : > { %6746 = vset.pattern.permute.xlu1 %v7277_v18  ;;  %v3442_v8 = vpop.permute.xlu1 %3441  ;;  %v8521_v62 = vpop.permute.xlu0 %3450 }
 0x6b9   : > { %5009 = vperm.xlu1 %6746, %v8401_v48   ;;  %vm3452_vm9 = vcmp.eq.s32.totalorder %v7571_v31, %v3442_v8  ;;  %vm3455_vm11 = vcmp.eq.s32.totalorder %v7571_v31, %v8521_v62  ;;  %v7285_v62 = vmov 52  }
 0x6ba   : > { %v5833_v44 = vsel %vm3452_vm9, 1.0, %v7237_v36 }
 0x6bb   : > { %v3464_v7 = vpack.c.bf16 %v5834_v40, %v5833_v44 }
 0x6bd   : > { %6747 = vset.pattern.permute.xlu1 %v7278_v14  ;;  %v8516_v35 = vpop.permute.xlu1 %3754  ;;  %v8530_v53 = vpop.permute.xlu0 %3760 }
 0x6be   : > { %4954 = vperm.xlu1 %6747, %v8392_v52   ;;  %vm3765_vm15 = vcmp.eq.s32.totalorder %v7571_v31, %v8516_v35  ;;  %v6977_v35 = vld [vmem:[#allocation5 + $0x5b8] sm:$0xff]   ;;  %vm3767_vm5 = vcmp.eq.s32.totalorder %v7571_v31, %v8530_v53 }
 0x6bf   : > { %v5865_v1 = vsel %vm3765_vm15, 1.0, %v7237_v36 }
 0x6c0   : > { %v6275_v26 = vpop.f32.mrb[32].mxu0 }
 0x6c1   : > { %v6276_v51 = vpop.f32.mrb[33].mxu0  ;;  %v3758_v37 = vpop.permute.xlu1 %3757 }
 0x6c2   : > { %v6277_v33 = vadd.f32 %v6276_v51, %v6275_v26  ;;  %v6278_v61 = vpop.f32.mrb[34].mxu0  ;;  %3474 = vrot.lane.b32.xlu1 %v3464_v7, %s7238_s23  ;;  %vm3766_vm13 = vcmp.eq.s32.totalorder %v7571_v31, %v3758_v37  ;;  %v3703_v38 = vpop.permute.xlu0 %3702  ;;  %v5867_v51 = vsel %vm3767_vm5, 1.0, %v7237_v36 }
 0x6c3   : > { %v6279_v3 = vpop.f32.mrb[35].mxu0  ;;  %6748 = vset.pattern.permute.xlu1 %v7275_v16  ;;  %v6971_v16 = vld [vmem:[#allocation5 + $0x5a0] sm:$0xff]   ;;  %v5866_v8 = vsel %vm3766_vm13, 1.0, %v7237_v36  ;;  %vm3713_vm1 = vcmp.eq.s32.totalorder %v7571_v31, %v3703_v38 }
 0x6c4   : > { %v8528_v34 = vadd.f32 %v6277_v33, %v8369_v46  ;;  %v6280_v2 = vadd.f32 %v6279_v3, %v6278_v61  ;;  %6352 = vmatpush3.bf16.msra.mxu1 %v6971_v16  ;;  %v3777_v44 = vpack.c.bf16 %v5866_v8, %v5865_v1  ;;  %v7283_v61 = vmov 50  }
 0x6c5   : > { %6353 = vmatprep.subr.bf16.mxu1 %v6972_v23 }
 0x6c6   : > { %v8533_v32 = vadd.f32 %v6280_v2, %v8374_v12  ;;  %v3706_v29 = vpop.permute.xlu1 %3705  ;;  %3468 = vrot.lane.b32.xlu1 %v3412_v0, %s7238_s23  ;;  %v8559_v50 = vpop.permute.xlu0 %3711 }
 0x6c7   : > { %vm3714_vm0 = vcmp.eq.s32.totalorder %v7571_v31, %v3706_v29 }
 0x6c8   : > { %v6281_v58 = vpop.f32.mrb[36].mxu0  ;;  %6354 = vmatpush3.bf16.msra.mxu1 %v6973_v54  ;;  %v5858_v40 = vsel %vm3714_vm0, 1.0, %v7237_v36  ;;  %vm3716_vm0 = vcmp.eq.s32.totalorder %v7571_v31, %v8559_v50 }
 0x6c9   : > { %v6282_v45 = vpop.f32.mrb[37].mxu0  ;;  %6355 = vmatprep.subr.bf16.mxu1 %v6974_v47  ;;  %v7286_v47 = vmov 58  }
 0x6ca   : > { %v6283_v56 = vadd.f32 %v6282_v45, %v6281_v58  ;;  %v6284_v46 = vpop.f32.mrb[38].mxu0  ;;  %4702 = vperm.xlu1 %6748, %v8405_v20  }
 0x6cb   : > { %v6285_v19 = vpop.f32.mrb[39].mxu0  ;;  %v8538_v12 = vpop.permute.xlu1 %3447 }
 0x6cc   : > { %v8541_v42 = vadd.f32 %v6283_v56, %v8381_v5  ;;  %v6286_v59 = vadd.f32 %v6285_v19, %v6284_v46  ;;  %v6975_v5 = vld [vmem:[#allocation5 + $0x5b0] sm:$0xff]   ;;  %v8566_v10 = vpop.permute.xlu0 %4073  ;;  %vm3454_vm10 = vcmp.eq.s32.totalorder %v7571_v31, %v8538_v12  ;;  %v7284_v56 = vmov 48  }
 0x6cd   : > { %6356 = vmatpush3.bf16.msra.mxu1 %v6975_v5  ;;  %v5835_v23 = vsel %vm3454_vm10, 1.0, %v7237_v36  ;;  %v5836_v19 = vsel %vm3455_vm11, 1.0, %v7237_v36  ;;  %vm4080_vm12 = vcmp.eq.s32.totalorder %v7571_v31, %v8566_v10  ;;  %vm3374_vm10 = vcmp.eq.s32.totalorder %v7571_v31, %v8496_v57 }
 0x6ce   : > { %v8547_v28 = vadd.f32 %v6286_v59, %v8385_v27  ;;  %6749 = vset.pattern.permute.xlu1 %v7276_v17  ;;  %v5857_v27 = vsel %vm3713_vm1, 1.0, %v7237_v36  ;;  %v6976_v17 = vld [vmem:[#allocation5 + $0x5f8] sm:$0xff]   ;;  %v3465_v12 = vpack.c.bf16 %v5836_v19, %v5835_v23  ;;  %v5899_v59 = vsel %vm4080_vm12, 1.0, %v7237_v36  ;;  %v6979_v23 = vld [vmem:[#allocation5 + $0x600] sm:$0xff]  }
 0x6cf   : > { %4647 = vperm.xlu1 %6749, %v8397_v60   ;;  %6357 = vmatprep.subr.bf16.mxu1 %v6976_v17  ;;  %v3725_v4 = vpack.c.bf16 %v5858_v40, %v5857_v27  ;;  %v5860_v27 = vsel %vm3716_vm0, 1.0, %v7237_v36 }
 0x6d0   : > { %v3396_v55 = vpop.permute.xlu1 %3395  ;;  %v8578_v33 = vpop.permute.xlu0 %4015 }
 0x6d1   : > { %vm3402_vm2 = vcmp.eq.s32.totalorder %v7571_v31, %v3396_v55  ;;  %6358 = vmatpush3.bf16.msra.mxu1 %v6977_v35  ;;  %vm4026_vm1 = vcmp.eq.s32.totalorder %v7571_v31, %v8578_v33 }
 0x6d2   : > { %v5827_v41 = vsel %vm3402_vm2, 1.0, %v7237_v36  ;;  %v5889_v35 = vsel %vm4026_vm1, 1.0, %v7237_v36 }
 0x6d3   : > { %3787 = vrot.lane.b32.xlu1 %v3777_v44, %s7238_s23 }
 0x6d4   : > { %v3399_v49 = vpop.permute.xlu1 %3398  ;;  %6753 = vset.pattern.permute.xlu1 %v7277_v18  ;;  %v8585_v43 = vpop.permute.xlu0 %4024 }
 0x6d5   : > { %vm3403_vm3 = vcmp.eq.s32.totalorder %v7571_v31, %v3399_v49 }
 0x6d6   : > { %v5828_v7 = vsel %vm3403_vm3, 1.0, %v7237_v36 }
 0x6d7   : > { %v3413_v26 = vpack.c.bf16 %v5828_v7, %v5827_v41  ;;  %3781 = vrot.lane.b32.xlu1 %v3725_v4, %s7238_s23 }
 0x6d9   : > { %v3764_v25 = vpop.permute.xlu1 %3763  ;;  %3470 = vrot.lane.b32.xlu0 %v3413_v26, %s7238_s23  ;;  %v4384_v2 = vpop.permute.xlu0 %4383  ;;  %v7287_v26 = vmov 56  }
 0x6da   : > { %vm3768_vm4 = vcmp.eq.s32.totalorder %v7571_v31, %v3764_v25  ;;  %vm4392_vm8 = vcmp.eq.s32.totalorder %v7571_v31, %v4384_v2  ;;  %v7290_v2 = vmov 64  }
 0x6db   : > { %5015 = vperm.xlu1 %6753, %v8405_v20   ;;  %v5868_v18 = vsel %vm3768_vm4, 1.0, %v7237_v36  ;;  %v5930_v29 = vsel %vm4392_vm8, 1.0, %v7237_v36  ;;  %vm4029_vm8 = vcmp.eq.s32.totalorder %v7571_v31, %v8585_v43 }
 0x6dc   : > { %v3778_v30 = vpack.c.bf16 %v5868_v18, %v5867_v51 }
 0x6dd   : > { %4357 = vperm.xlu0 %6763, %v8401_v48   ;;  %v8645_v55 = vpop.permute.xlu0 %4386 }
 0x6de   : > { %v8575_v37 = vpop.permute.xlu1 %3708  ;;  %vm4393_vm11 = vcmp.eq.s32.totalorder %v7571_v31, %v8645_v55 }
 0x6df   : > { %6754 = vset.pattern.permute.xlu1 %v7278_v14  ;;  %vm3715_vm15 = vcmp.eq.s32.totalorder %v7571_v31, %v8575_v37  ;;  %v7288_v37 = vmov 62   ;;  %v5931_v55 = vsel %vm4393_vm11, 1.0, %v7237_v36 }
 0x6e0   : > { %4960 = vperm.xlu1 %6754, %v8397_v60   ;;  %v5859_v44 = vsel %vm3715_vm15, 1.0, %v7237_v36 }
 0x6e1   : > { %3789 = vrot.lane.b32.xlu0 %v3778_v30, %s7238_s23  ;;  %v3726_v17 = vpack.c.bf16 %v5860_v27, %v5859_v44  ;;  %v6988_v44 = vld [vmem:[#allocation5 + $0x658] sm:$0xff]  }
 0x6e2   : > { %6765 = vset.pattern.permute.xlu0 %v7283_v61  ;;  %v8661_v4 = vpop.permute.xlu0 %4337 }
 0x6e3   : > { %v4068_v63 = vpop.permute.xlu1 %4067 }
 0x6e4   : > { %6755 = vset.pattern.permute.xlu1 %v7280_v24  ;;  %vm4078_vm6 = vcmp.eq.s32.totalorder %v7571_v31, %v4068_v63  ;;  %v7289_v63 = vmov 60  }
 0x6e5   : > { %3421 = vperm.xlu1 %6755, %v8397_v60   ;;  %v5897_v14 = vsel %vm4078_vm6, 1.0, %v7237_v36 }
 0x6e7   : > { %v4071_v3 = vpop.permute.xlu1 %4070  ;;  %v8674_v18 = vpop.permute.xlu0 %4696 }
 0x6e8   : > { %vm4079_vm7 = vcmp.eq.s32.totalorder %v7571_v31, %v4071_v3 }
 0x6e9   : > { %v5898_v6 = vsel %vm4079_vm7, 1.0, %v7237_v36  ;;  %3424 = vperm.xlu1 %6755, %v8405_v20   ;;  %vm3375_vm7 = vcmp.eq.s32.totalorder %v7571_v31, %v8502_v22 }
 0x6ea   : > { %v4090_v0 = vpack.c.bf16 %v5898_v6, %v5897_v14  ;;  %v5822_v22 = vsel %vm3375_vm7, 1.0, %v7237_v36  ;;  %vm4705_vm7 = vcmp.eq.s32.totalorder %v7571_v31, %v8674_v18 }
 0x6eb   : > { %v8683_v33 = vpop.permute.xlu0 %4699 }
 0x6ec   : > { %v8592_v53 = vpop.permute.xlu1 %4018  ;;  %4100 = vrot.lane.b32.xlu0 %v4090_v0, %s7238_s23 }
 0x6ed   : > { %6758 = vset.pattern.permute.xlu1 %v7279_v21  ;;  %v6978_v21 = vld [vmem:[#allocation5 + $0x640] sm:$0xff]   ;;  %vm4027_vm2 = vcmp.eq.s32.totalorder %v7571_v31, %v8592_v53 }
 0x6ee   : > { %3737 = vperm.xlu1 %6758, %v8405_v20   ;;  %6371 = vmatprep.subr.bf16.mxu0 %v6978_v21  ;;  %v5890_v49 = vsel %vm4027_vm2, 1.0, %v7237_v36 }
 0x6ef   : > { %v4038_v41 = vpack.c.bf16 %v5890_v49, %v5889_v35 }
 0x6f0   : > { %v8692_v3 = vpop.permute.xlu0 %4650 }
 0x6f1   : > { %v4381_v24 = vpop.permute.xlu1 %4380  ;;  %vm4655_vm12 = vcmp.eq.s32.totalorder %v7571_v31, %v8692_v3 }
 0x6f2   : > { %vm4391_vm9 = vcmp.eq.s32.totalorder %v7571_v31, %v4381_v24  ;;  %6759 = vset.pattern.permute.xlu1 %v7281_v15  ;;  %v6981_v15 = vld [vmem:[#allocation5 + $0x6c0] sm:$0xff]   ;;  %v5956_v27 = vsel %vm4655_vm12, 1.0, %v7237_v36 }
 0x6f3   : > { %v5929_v11 = vsel %vm4391_vm9, 1.0, %v7237_v36  ;;  %3682 = vperm.xlu1 %6759, %v8397_v60   ;;  %6399 = vmatprep.subr.bf16.mxu1 %v6981_v15 }
 0x6f4   : > { %v4403_v16 = vpack.c.bf16 %v5930_v29, %v5929_v11 }
 0x6f5   : > { %v8700_v6 = vpop.permute.xlu0 %5006 }
 0x6f6   : > { %v8603_v58 = vpop.permute.xlu1 %4328  ;;  %4413 = vrot.lane.b32.xlu0 %v4403_v16, %s7238_s23 }
 0x6f7   : > { %6760 = vset.pattern.permute.xlu1 %v7283_v61  ;;  %vm4339_vm4 = vcmp.eq.s32.totalorder %v7571_v31, %v8603_v58 }
 0x6f8   : > { %4041 = vperm.xlu1 %6760, %v8392_v52   ;;  %v5921_v25 = vsel %vm4339_vm4, 1.0, %v7237_v36  ;;  %vm4342_vm4 = vcmp.eq.s32.totalorder %v7571_v31, %v8661_v4 }
 0x6f9   : > { %v8709_v24 = vpop.permute.xlu0 %5012 }
 0x6fa   : > { %v4332_v45 = vpop.permute.xlu1 %4331  ;;  %4047 = vperm.xlu0 %6765, %v8397_v60  }
 0x6fb   : > { %vm4340_vm3 = vcmp.eq.s32.totalorder %v7571_v31, %v4332_v45  ;;  %v5892_v45 = vsel %vm4029_vm8, 1.0, %v7237_v36 }
 0x6fc   : > { %4044 = vperm.xlu1 %6760, %v8401_v48   ;;  %v5922_v7 = vsel %vm4340_vm3, 1.0, %v7237_v36 }
 0x6fd   : > { %v4351_v10 = vpack.c.bf16 %v5922_v7, %v5921_v25  ;;  %v6990_v25 = vld [vmem:[#allocation5 + $0x618] sm:$0xff]  }
 0x6fe   : > { %6766 = vset.pattern.permute.xlu0 %v7284_v56 }
 0x6ff   : > { %v4077_v46 = vpop.permute.xlu1 %4076  ;;  %3989 = vperm.xlu0 %6766, %v8392_v52  }
 0x700   : > { %6761 = vset.pattern.permute.xlu1 %v7284_v56  ;;  %vm4081_vm13 = vcmp.eq.s32.totalorder %v7571_v31, %v4077_v46 }
 0x701   : > { %3992 = vperm.xlu1 %6761, %v8401_v48   ;;  %v5900_v8 = vsel %vm4081_vm13, 1.0, %v7237_v36 }
 0x702   : > { %v4091_v1 = vpack.c.bf16 %v5900_v8, %v5899_v59  ;;  %v6984_v8 = vld [vmem:[#allocation5 + $0x650] sm:$0xff]  }
 0x703   : > { %3998 = vperm.xlu0 %6766, %v8405_v20  }
 0x704   : > { %v8621_v54 = vpop.permute.xlu1 %4021 }
 0x705   : > { %3476 = vrot.lane.b32.xlu1 %v3465_v12, %s7238_s23  ;;  %vm4028_vm9 = vcmp.eq.s32.totalorder %v7571_v31, %v8621_v54  ;;  %v6980_v12 = vld [vmem:[#allocation5 + $0x648] sm:$0xff]  }
 0x706   : > { %6762 = vset.pattern.permute.xlu1 %v7282_v39  ;;  %v5891_v43 = vsel %vm4028_vm9, 1.0, %v7237_v36 }
 0x707   : > { %6770 = vset.pattern.permute.xlu0 %v7285_v62  ;;  %v4039_v57 = vpack.c.bf16 %v5892_v45, %v5891_v43  ;;  %v6985_v45 = vld [vmem:[#allocation5 + $0x6c8] sm:$0xff]  }
 0x708   : > { %4308 = vperm.xlu0 %6770, %v8397_v60   ;;  %v6996_v43 = vld [vmem:[#allocation5 + $0x668] sm:$0xff]  }
 0x709   : > { %v8630_v38 = vpop.permute.xlu1 %3415  ;;  %4354 = vperm.xlu1 %6762, %v8392_v52  }
 0x70a   : > { %vm3426_vm6 = vcmp.eq.s32.totalorder %v7571_v31, %v8630_v38  ;;  %v6982_v38 = vld [vmem:[#allocation5 + $0x608] sm:$0xff]  }
 0x70c   : > { %6773 = vset.pattern.permute.xlu0 %v7286_v47 }
 0x70d   : > { %v8636_v5 = vpop.permute.xlu1 %3418  ;;  %6764 = vset.pattern.permute.xlu1 %v7285_v62  ;;  %4670 = vperm.xlu0 %6773, %v8401_v48  }
 0x70e   : > { %4302 = vperm.xlu1 %6764, %v8392_v52   ;;  %vm3427_vm5 = vcmp.eq.s32.totalorder %v7571_v31, %v8636_v5 }
 0x70f   : > { %v5830_v29 = vsel %vm3427_vm5, 1.0, %v7237_v36 }
 0x711   : > { %4102 = vrot.lane.b32.xlu0 %v4091_v1, %s7238_s23  ;;  %v6986_v1 = vld [vmem:[#allocation5 + $0x610] sm:$0xff]  }
 0x712   : > { %v8653_v40 = vpop.permute.xlu1 %4389  ;;  %4305 = vperm.xlu1 %6764, %v8401_v48  }
 0x713   : > { %vm4394_vm15 = vcmp.eq.s32.totalorder %v7571_v31, %v8653_v40 }
 0x715   : > { %4673 = vperm.xlu0 %6773, %v8397_v60  }
 0x716   : > { %3783 = vrot.lane.b32.xlu1 %v3726_v17, %s7238_s23 }
 0x717   : > { %v8664_v50 = vpop.permute.xlu1 %4334  ;;  %6767 = vset.pattern.permute.xlu1 %v7283_v61 }
 0x718   : > { %vm4341_vm5 = vcmp.eq.s32.totalorder %v7571_v31, %v8664_v50  ;;  %v5924_v50 = vsel %vm4342_vm4, 1.0, %v7237_v36 }
 0x719   : > { %6779 = vset.pattern.permute.xlu0 %v7287_v26  ;;  %v5923_v3 = vsel %vm4341_vm5, 1.0, %v7237_v36  ;;  %vm3377_vm5 = vcmp.eq.s32.totalorder %v7571_v31, %v8504_v13 }
 0x71a   : > { %4094 = vrot.lane.b32.xlu1 %v4038_v41, %s7238_s23  ;;  %4624 = vperm.xlu0 %6779, %v8405_v20  }
 0x71c   : > { %v8676_v51 = vpop.permute.xlu1 %3728 }
 0x71d   : > { %vm3739_vm0 = vcmp.eq.s32.totalorder %v7571_v31, %v8676_v51 }
 0x71e   : > { %4407 = vrot.lane.b32.xlu1 %v4351_v10, %s7238_s23  ;;  %6780 = vset.pattern.permute.xlu0 %v7288_v37  ;;  %v5861_v40 = vsel %vm3739_vm0, 1.0, %v7237_v36 }
 0x71f   : > { %4980 = vperm.xlu0 %6780, %v8392_v52  }
 0x720   : > { %v8681_v30 = vpop.permute.xlu1 %3731 }
 0x721   : > { %vm3740_vm13 = vcmp.eq.s32.totalorder %v7571_v31, %v8681_v30 }
 0x722   : > { %4050 = vperm.xlu1 %6767, %v8405_v20   ;;  %v5862_v17 = vsel %vm3740_vm13, 1.0, %v7237_v36  ;;  %vm5017_vm13 = vcmp.eq.s32.totalorder %v7571_v31, %v8700_v6 }
 0x723   : > { %4986 = vperm.xlu0 %6780, %v8397_v60   ;;  %v3751_v41 = vpack.c.bf16 %v5862_v17, %v5861_v40 }
 0x725   : > { %v8687_v61 = vpop.permute.xlu1 %3679 }
 0x726   : > { %6768 = vset.pattern.permute.xlu1 %v7284_v56  ;;  %v5821_v56 = vsel %vm3374_vm10, 1.0, %v7237_v36  ;;  %vm3688_vm1 = vcmp.eq.s32.totalorder %v7571_v31, %v8687_v61  ;;  %v6992_v61 = vld [vmem:[#allocation5 + $0x660] sm:$0xff]  }
 0x727   : > { %3995 = vperm.xlu1 %6768, %v8397_v60   ;;  %6781 = vset.pattern.permute.xlu0 %v7289_v63  ;;  %v3386_v46 = vpack.c.bf16 %v5822_v22, %v5821_v56  ;;  %v5854_v51 = vsel %vm3688_vm1, 1.0, %v7237_v36  ;;  %v4352_v22 = vpack.c.bf16 %v5924_v50, %v5923_v3  ;;  %v6987_v56 = vld [vmem:[#allocation5 + $0x688] sm:$0xff]  }
 0x728   : > { %4931 = vperm.xlu0 %6781, %v8401_v48  }
 0x72a   : > { %v8695_v14 = vpop.permute.xlu1 %4693 }
 0x72b   : > { %6769 = vset.pattern.permute.xlu1 %v7282_v39  ;;  %v8719_v39 = vpop.permute.xlu0 %4957  ;;  %vm4704_vm8 = vcmp.eq.s32.totalorder %v7571_v31, %v8695_v14 }
 0x72c   : > { %4360 = vperm.xlu1 %6769, %v8397_v60   ;;  %4937 = vperm.xlu0 %6781, %v8405_v20   ;;  %vm4966_vm1 = vcmp.eq.s32.totalorder %v7571_v31, %v8719_v39 }
 0x72f   : > { %v8702_v0 = vpop.permute.xlu1 %4641  ;;  %v8738_v58 = vpop.permute.xlu0 %4963 }
 0x730   : > { %4363 = vperm.xlu1 %6769, %v8405_v20   ;;  %6784 = vset.pattern.permute.xlu0 %v7290_v2  ;;  %vm4652_vm11 = vcmp.eq.s32.totalorder %v7571_v31, %v8702_v0 }
 0x731   : > { %5241 = vperm.xlu0 %6784, %v8392_v52  }
 0x733   : > { %v8707_v53 = vpop.permute.xlu1 %4644  ;;  %v8746_v54 = vpop.permute.xlu0 %3734 }
 0x734   : > { %6771 = vset.pattern.permute.xlu1 %v7285_v62  ;;  %vm4653_vm10 = vcmp.eq.s32.totalorder %v7571_v31, %v8707_v53  ;;  %vm3741_vm12 = vcmp.eq.s32.totalorder %v7571_v31, %v8746_v54 }
 0x735   : > { %4311 = vperm.xlu1 %6771, %v8405_v20   ;;  %5250 = vperm.xlu0 %6784, %v8405_v20   ;;  %v5829_v20 = vsel %vm3426_vm6, 1.0, %v7237_v36  ;;  %vm4968_vm6 = vcmp.eq.s32.totalorder %v7571_v31, %v8738_v58  ;;  %v7004_v58 = vld [vmem:[#allocation5 + $0x678] sm:$0xff]   ;;  %v5954_v53 = vsel %vm4653_vm10, 1.0, %v7237_v36  ;;  %v5863_v3 = vsel %vm3741_vm12, 1.0, %v7237_v36 }
 0x736   : > { %v3438_v16 = vpack.c.bf16 %v5830_v29, %v5829_v20  ;;  %v6983_v20 = vld [vmem:[#allocation5 + $0x680] sm:$0xff]   ;;  %vm3376_vm10 = vcmp.eq.s32.totalorder %v7571_v31, %v8499_v9 }
 0x737   : > { %v3677_v5 = vpop.permute.xlu0 %3676 }
 0x738   : > { %v8714_v60 = vpop.permute.xlu1 %5009  ;;  %vm3687_vm2 = vcmp.eq.s32.totalorder %v7571_v31, %v3677_v5 }
 0x739   : > { %6772 = vset.pattern.permute.xlu1 %v7286_v47  ;;  %v5853_v30 = vsel %vm3687_vm2, 1.0, %v7237_v36 }
 0x73a   : > { %4667 = vperm.xlu1 %6772, %v8392_v52   ;;  %v3699_v29 = vpack.c.bf16 %v5854_v51, %v5853_v30  ;;  %v7003_v30 = vld [vmem:[#allocation5 + $0x6a8] sm:$0xff]  }
 0x73b   : > { %v8806_v18 = vpop.permute.xlu0 %3685 }
 0x73d   : > { %v8725_v11 = vpop.permute.xlu1 %4954 }
 0x73e   : > { %6774 = vset.pattern.permute.xlu1 %v7287_v26  ;;  %vm4965_vm2 = vcmp.eq.s32.totalorder %v7571_v31, %v8725_v11 }
 0x73f   : > { %4615 = vperm.xlu1 %6774, %v8392_v52  }
 0x741   : > { %v3475_v21 = vpop.permute.xlu1 %3474 }
 0x742   : > { %v3488_v15 = vsel %vm355_vm14, %v3438_v16, %v3475_v21  ;;  %v6994_v16 = vld [vmem:[#allocation5 + $0x620] sm:$0xff]  }
 0x743   : > { %3654 = vmatprep.mubr.bf16.mxu0 %v3488_v15  ;;  %4618 = vperm.xlu1 %6774, %v8401_v48  }
 0x745   : > { %v3469_v19 = vpop.permute.xlu1 %3468 }
 0x746   : > { %v3480_v62 = vsel %vm355_vm14, %v3386_v46, %v3469_v19  ;;  %v6998_v46 = vld [vmem:[#allocation5 + $0x628] sm:$0xff]   ;;  %v7058_v19 = vld [vmem:[%s7492_s27 + $0x18] sm:$0xff] }
 0x747   : > { %3655 = vmatmul.mubr.bf16.vlgmr.msra.gmra.mrb[40].mxu0 %v3480_v62  ;;  %4096 = vrot.lane.b32.xlu1 %v4039_v57, %s7238_s23  ;;  %v7000_v57 = vld [vmem:[#allocation5 + $0x670] sm:$0xff]   ;;  %v6993_v62 = vld [vmem:[#allocation5 + $0x6d8] sm:$0xff]  }
 0x748   : > { %6775 = vset.pattern.permute.xlu1 %v7288_v37  ;;  %6372 = vmatpush3.bf16.msra.mxu0 %v6979_v23 }
 0x749   : > { %v8751_v59 = vpop.permute.xlu1 %4702  ;;  %6373 = vmatprep.subr.bf16.mxu0 %v6980_v12  ;;  %v6991_v12 = vld [vmem:[#allocation5 + $0x690] sm:$0xff]  }
 0x74b   : > { %4983 = vperm.xlu1 %6775, %v8401_v48   ;;  %v5932_v48 = vsel %vm4394_vm15, 1.0, %v7237_v36  ;;  %vm5018_vm15 = vcmp.eq.s32.totalorder %v7571_v31, %v8714_v60  ;;  %v7009_v60 = vld [vmem:[#allocation5 + $0x6b8] sm:$0xff]  }
 0x74c   : > { %6374 = vmatpush3.bf16.msra.mxu0 %v6982_v38  ;;  %v4404_v10 = vpack.c.bf16 %v5932_v48, %v5931_v55  ;;  %v7002_v38 = vld [vmem:[#allocation5 + $0x630] sm:$0xff]  }
 0x74d   : > { %6375 = vmatprep.subr.bf16.mxu0 %v6984_v8  ;;  %v5988_v8 = vsel %vm4968_vm6, 1.0, %v7237_v36  ;;  %v8810_v55 = vld [vmem:[%s7492_s27 + $0x10] sm:$0xff]  ;;  %vm4706_vm6 = vcmp.eq.s32.totalorder %v7571_v31, %v8683_v33  ;;  %v5824_v33 = vsel %vm3377_vm5, 1.0, %v7237_v36 }
 0x74e   : > { %v4648_v35 = vpop.permute.xlu1 %4647 }
 0x74f   : > { %vm4654_vm3 = vcmp.eq.s32.totalorder %v7571_v31, %v4648_v35  ;;  %6776 = vset.pattern.permute.xlu1 %v7289_v63  ;;  %v6997_v35 = vld [vmem:[#allocation5 + $0x6e0] sm:$0xff]  }
 0x750   : > { %v5955_v49 = vsel %vm4654_vm3, 1.0, %v7237_v36  ;;  %4928 = vperm.xlu1 %6776, %v8392_v52   ;;  %6376 = vmatpush3.bf16.msra.mxu0 %v6986_v1  ;;  %v5962_v1 = vsel %vm4705_vm7, 1.0, %v7237_v36  ;;  %vm4707_vm7 = vcmp.eq.s32.totalorder %v7571_v31, %v8751_v59 }
 0x751   : > { %v4665_v7 = vpack.c.bf16 %v5956_v27, %v5955_v49  ;;  %6377 = vmatprep.subr.bf16.mxu0 %v6988_v44  ;;  %v5961_v44 = vsel %vm4704_vm8, 1.0, %v7237_v36  ;;  %v6995_v27 = vld [vmem:[#allocation5 + $0x698] sm:$0xff]   ;;  %v7010_v49 = vld [vmem:[#allocation5 + $0x740] sm:$0xff]   ;;  %v5964_v59 = vsel %vm4707_vm7, 1.0, %v7237_v36 }
 0x752   : > { %v3788_v4 = vpop.permute.xlu1 %3787  ;;  %v4716_v48 = vpack.c.bf16 %v5962_v1, %v5961_v44 }
 0x753   : > { %4722 = vrot.lane.b32.xlu0 %v4665_v7, %s7238_s23  ;;  %v3801_v52 = vsel %vm355_vm14, %v3751_v41, %v3788_v4  ;;  %v6999_v41 = vld [vmem:[#allocation5 + $0x6a0] sm:$0xff]   ;;  %v5953_v7 = vsel %vm4652_vm11, 1.0, %v7237_v36  ;;  %v7005_v4 = vld [vmem:[#allocation5 + $0x6f0] sm:$0xff]   ;;  %vm5019_vm11 = vcmp.eq.s32.totalorder %v7571_v31, %v8709_v24 }
 0x754   : > { %3967 = vmatprep.mubr.bf16.mxu1 %v3801_v52  ;;  %4415 = vrot.lane.b32.xlu1 %v4404_v10, %s7238_s23  ;;  %v4664_v0 = vpack.c.bf16 %v5954_v53, %v5953_v7  ;;  %v8822_v10 = vpop.permute.xlu0 %3470 }
 0x755   : > { %6777 = vset.pattern.permute.xlu1 %v7286_v47  ;;  %6378 = vmatpush3.bf16.msra.mxu0 %v6990_v25  ;;  %v6989_v47 = vld [vmem:[#allocation5 + $0x6d0] sm:$0xff]   ;;  %v7001_v25 = vld [vmem:[#allocation5 + $0x6e8] sm:$0xff]  }
 0x756   : > { %v3782_v21 = vpop.permute.xlu1 %3781  ;;  %6379 = vmatprep.subr.bf16.mxu0 %v6992_v61 }
 0x757   : > { %v3793_v15 = vsel %vm355_vm14, %v3699_v29, %v3782_v21 }
 0x758   : > { %4409 = vrot.lane.b32.xlu1 %v4352_v22, %s7238_s23  ;;  %3968 = vmatmul.mubr.bf16.vlgmr.msra.gmra.mrb[40].mxu1 %v3793_v15  ;;  %v7008_v22 = vld [vmem:[#allocation5 + $0x6f8] sm:$0xff]  }
 0x759   : > { %6400 = vmatpush3.bf16.msra.mxu1 %v6983_v20  ;;  %6380 = vmatpush3.bf16.msra.mxu0 %v6994_v16  ;;  %v7007_v16 = vld [vmem:[#allocation5 + $0x6b0] sm:$0xff]  }
 0x75a   : > { %v8790_v23 = vpop.permute.xlu1 %5015  ;;  %6401 = vmatprep.subr.bf16.mxu1 %v6985_v45  ;;  %6381 = vmatprep.subr.bf16.mxu0 %v6996_v43 }
 0x75b   : > { %vm5020_vm12 = vcmp.eq.s32.totalorder %v7571_v31, %v8790_v23 }
 0x75c   : > { %4676 = vperm.xlu1 %6777, %v7058_v19   ;;  %v8829_v61 = vpop.permute.xlu0 %4357  ;;  %v5996_v24 = vsel %vm5020_vm12, 1.0, %v7237_v36 }
 0x75d   : > { %6402 = vmatpush3.bf16.msra.mxu1 %v6987_v56  ;;  %6382 = vmatpush3.bf16.msra.mxu0 %v6998_v46  ;;  %v5993_v56 = vsel %vm5017_vm13, 1.0, %v7237_v36  ;;  %v5994_v46 = vsel %vm5018_vm15, 1.0, %v7237_v36  ;;  %vm4366_vm13 = vcmp.eq.s32.totalorder %v7571_v31, %v8829_v61 }
 0x75e   : > { %6403 = vmatprep.subr.bf16.mxu1 %v6989_v47  ;;  %6383 = vmatprep.subr.bf16.mxu0 %v7000_v57 }
 0x75f   : > { %v4961_v5 = vpop.permute.xlu1 %4960 }
 0x760   : > { %vm4967_vm9 = vcmp.eq.s32.totalorder %v7571_v31, %v4961_v5  ;;  %6778 = vset.pattern.permute.xlu1 %v7287_v26  ;;  %v7006_v26 = vld [vmem:[#allocation5 + $0x638] sm:$0xff]   ;;  %v3790_v6 = vpop.permute.xlu0 %3789 }
 0x761   : > { %v5987_v14 = vsel %vm4967_vm9, 1.0, %v7237_v36  ;;  %4621 = vperm.xlu1 %6778, %v8810_v55   ;;  %6404 = vmatpush3.bf16.msra.mxu1 %v6991_v12  ;;  %v5029_v12 = vpack.c.bf16 %v5994_v46, %v5993_v56 }
 0x762   : > { %v4978_v17 = vpack.c.bf16 %v5988_v8, %v5987_v14  ;;  %6405 = vmatprep.subr.bf16.mxu1 %v6993_v62  ;;  %6384 = vmatpush3.bf16.msra.mxu0 %v7002_v38  ;;  %v5986_v62 = vsel %vm4966_vm1, 1.0, %v7237_v36  ;;  %v5985_v38 = vsel %vm4965_vm2, 1.0, %v7237_v36 }
 0x763   : > { %6385 = vmatprep.subr.bf16.mxu0 %v7004_v58  ;;  %v4977_v44 = vpack.c.bf16 %v5986_v62, %v5985_v38  ;;  %v7013_v62 = vld [vmem:[#allocation5 + $0x708] sm:$0xff]   ;;  %v7021_v38 = vld [vmem:[#allocation5 + $0x780] sm:$0xff]  }
 0x764   : > { %v8816_v40 = vpop.permute.xlu1 %3421  ;;  %5035 = vrot.lane.b32.xlu0 %v4978_v17, %s7238_s23  ;;  %v4101_v17 = vpop.permute.xlu0 %4100 }
 0x765   : > { %4726 = vrot.lane.b32.xlu1 %v4716_v48, %s7238_s23  ;;  %6406 = vmatpush3.bf16.msra.mxu1 %v6995_v27  ;;  %vm3428_vm8 = vcmp.eq.s32.totalorder %v7571_v31, %v8816_v40 }
 0x766   : > { %6782 = vset.pattern.permute.xlu1 %v7288_v37  ;;  %6407 = vmatprep.subr.bf16.mxu1 %v6997_v35  ;;  %v5963_v35 = vsel %vm4706_vm6, 1.0, %v7237_v36  ;;  %v5831_v48 = vsel %vm3428_vm8, 1.0, %v7237_v36 }
 0x767   : > { %6386 = vmatpush3.bf16.msra.mxu0 %v7006_v26  ;;  %v5823_v26 = vsel %vm3376_vm10, 1.0, %v7237_v36  ;;  %v4717_v7 = vpack.c.bf16 %v5964_v59, %v5963_v35  ;;  %v7017_v35 = vld [vmem:[#allocation5 + $0x718] sm:$0xff]   ;;  %v7029_v59 = vld [vmem:[#allocation5 + $0x790] sm:$0xff]  }
 0x768   : > { %v8824_v51 = vpop.permute.xlu1 %3424  ;;  %6427 = vmatprep.subr.bf16.mxu0 %v7010_v49  ;;  %v4414_v40 = vpop.permute.xlu0 %4413 }
 0x769   : > { %4720 = vrot.lane.b32.xlu1 %v4664_v0, %s7238_s23  ;;  %6408 = vmatpush3.bf16.msra.mxu1 %v6999_v41  ;;  %vm3429_vm3 = vcmp.eq.s32.totalorder %v7571_v31, %v8824_v51  ;;  %v3387_v41 = vpack.c.bf16 %v5824_v33, %v5823_v26  ;;  %v5995_v0 = vsel %vm5019_vm11, 1.0, %v7237_v36  ;;  %v7032_v26 = vld [vmem:[#allocation5 + $0x7d8] sm:$0xff]  }
 0x76a   : > { %6409 = vmatprep.subr.bf16.mxu1 %v7001_v25 }
 0x76b   : > { %v6303_v37 = vpop.f32.mrb[32].mxu1 }
 0x76c   : > { %v6304_v50 = vpop.f32.mrb[33].mxu1 }
 0x76d   : > { %v6305_v52 = vadd.f32 %v6304_v50, %v6303_v37  ;;  %v6306_v29 = vpop.f32.mrb[34].mxu1  ;;  %v3738_v20 = vpop.permute.xlu1 %3737  ;;  %4989 = vperm.xlu1 %6782, %v7058_v19   ;;  %6410 = vmatpush3.bf16.msra.mxu1 %v7003_v30  ;;  %v7020_v19 = vld [vmem:[#allocation5 + $0x7c0] sm:$0xff]  }
 0x76e   : > { %vm3742_vm0 = vcmp.eq.s32.totalorder %v7571_v31, %v3738_v20  ;;  %v6307_v54 = vpop.f32.mrb[35].mxu1  ;;  %6411 = vmatprep.subr.bf16.mxu1 %v7005_v4  ;;  %v5030_v4 = vpack.c.bf16 %v5996_v24, %v5995_v0  ;;  %v7023_v24 = vld [vmem:[#allocation5 + $0x728] sm:$0xff]  }
 0x76f   : > { %v8838_v21 = vadd.f32 %v6305_v52, %v8528_v34  ;;  %v5864_v45 = vsel %vm3742_vm0, 1.0, %v7237_v36  ;;  %v6308_v43 = vadd.f32 %v6307_v54, %v6306_v29  ;;  %vm3690_vm0 = vcmp.eq.s32.totalorder %v7571_v31, %v8806_v18 }
 0x770   : > { %v3752_v15 = vpack.c.bf16 %v5864_v45, %v5863_v3  ;;  %v5856_v29 = vsel %vm3690_vm0, 1.0, %v7237_v36 }
 0x771   : > { %v8844_v47 = vadd.f32 %v6308_v43, %v8533_v32  ;;  %6783 = vset.pattern.permute.xlu1 %v7289_v63  ;;  %6412 = vmatpush3.bf16.msra.mxu1 %v7007_v16 }
 0x772   : > { %v8851_v34 = vpop.permute.xlu1 %3682  ;;  %4934 = vperm.xlu1 %6783, %v8810_v55   ;;  %v3805_v57 = vsel %vm355_vm14, %v3752_v15, %v3790_v6  ;;  %6413 = vmatprep.subr.bf16.mxu1 %v7008_v22  ;;  %v7011_v6 = vld [vmem:[#allocation5 + $0x700] sm:$0xff]  }
 0x773   : > { %v6309_v32 = vpop.f32.mrb[36].mxu1  ;;  %3975 = vmatprep.mubr.bf16.mxu1 %v3805_v57  ;;  %vm3689_vm1 = vcmp.eq.s32.totalorder %v7571_v31, %v8851_v34 }
 0x774   : > { %v6310_v63 = vpop.f32.mrb[37].mxu1  ;;  %v5855_v20 = vsel %vm3689_vm1, 1.0, %v7237_v36 }
 0x775   : > { %v6311_v39 = vadd.f32 %v6310_v63, %v6309_v32  ;;  %v6312_v8 = vpop.f32.mrb[38].mxu1  ;;  %6414 = vmatpush3.bf16.msra.mxu1 %v7009_v60  ;;  %v3700_v18 = vpack.c.bf16 %v5856_v29, %v5855_v20  ;;  %v7039_v29 = vld [vmem:[#allocation5 + $0x7b0] sm:$0xff]   ;;  %v7040_v20 = vld [vmem:[#allocation5 + $0x7f8] sm:$0xff]  }
 0x776   : > { %v6313_v11 = vpop.f32.mrb[39].mxu1  ;;  %5039 = vrot.lane.b32.xlu1 %v5029_v12, %s7238_s23  ;;  %6455 = vmatprep.subr.bf16.mxu1 %v7020_v19  ;;  %v7012_v19 = vld [vmem:[#allocation5 + $0x748] sm:$0xff]  }
 0x777   : > { %v8859_v5 = vadd.f32 %v6311_v39, %v8541_v42  ;;  %v6314_v58 = vadd.f32 %v6313_v11, %v6312_v8  ;;  %v4042_v1 = vpop.permute.xlu1 %4041  ;;  %6785 = vset.pattern.permute.xlu1 %v7290_v2  ;;  %v7060_v42 = vld [vmem:[%s7492_s27 + $0x8] sm:$0xff]  ;;  %v7014_v8 = vld [vmem:[#allocation5 + $0x750] sm:$0xff]  }
 0x778   : > { %vm4052_vm9 = vcmp.eq.s32.totalorder %v7571_v31, %v4042_v1  ;;  %v7024_v11 = vld [vmem:[#allocation5 + $0x7c8] sm:$0xff]  }
 0x779   : > { %v8863_v14 = vadd.f32 %v6314_v58, %v8547_v28  ;;  %v5832_v28 = vsel %vm3429_vm3, 1.0, %v7237_v36  ;;  %v5893_v9 = vsel %vm4052_vm9, 1.0, %v7237_v36  ;;  %v4048_v51 = vpop.permute.xlu0 %4047 }
 0x77a   : > { %5033 = vrot.lane.b32.xlu1 %v4977_v44, %s7238_s23  ;;  %v3439_v53 = vpack.c.bf16 %v5832_v28, %v5831_v48  ;;  %vm4054_vm6 = vcmp.eq.s32.totalorder %v7571_v31, %v4048_v51  ;;  %v7015_v44 = vld [vmem:[#allocation5 + $0x710] sm:$0xff]   ;;  %v7016_v28 = vld [vmem:[#allocation5 + $0x758] sm:$0xff]   ;;  %v7036_v51 = vld [vmem:[#allocation5 + $0x7e8] sm:$0xff]  }
 0x77b   : > { %v4045_v27 = vpop.permute.xlu1 %4044 }
 0x77c   : > { %vm4053_vm4 = vcmp.eq.s32.totalorder %v7571_v31, %v4045_v27  ;;  %v7025_v27 = vld [vmem:[#allocation5 + $0x788] sm:$0xff]  }
 0x77d   : > { %v5894_v13 = vsel %vm4053_vm4, 1.0, %v7237_v36 }
 0x77e   : > { %5244 = vperm.xlu1 %6785, %v7060_v42   ;;  %v4064_v49 = vpack.c.bf16 %v5894_v13, %v5893_v9  ;;  %v3990_v50 = vpop.permute.xlu0 %3989  ;;  %v7028_v13 = vld [vmem:[#allocation5 + $0x7d0] sm:$0xff]   ;;  %v7018_v9 = vld [vmem:[#allocation5 + $0x760] sm:$0xff]  }
 0x77f   : > { %vm4000_vm3 = vcmp.eq.s32.totalorder %v7571_v31, %v3990_v50  ;;  %v7030_v50 = vld [vmem:[#allocation5 + $0x778] sm:$0xff]  }
 0x780   : > { %v3993_v2 = vpop.permute.xlu1 %3992  ;;  %v4114_v30 = vsel %vm355_vm14, %v4064_v49, %v4101_v17  ;;  %v5885_v45 = vsel %vm4000_vm3, 1.0, %v7237_v36  ;;  %v5895_v17 = vsel %vm4054_vm6, 1.0, %v7237_v36  ;;  %v7019_v49 = vld [vmem:[#allocation5 + $0x720] sm:$0xff]  }
 0x781   : > { %vm4001_vm2 = vcmp.eq.s32.totalorder %v7571_v31, %v3993_v2 }
 0x782   : > { %5247 = vperm.xlu1 %6785, %v8810_v55   ;;  %v3484_v55 = vsel %vm355_vm14, %v3387_v41, %v8822_v10  ;;  %v5926_v10 = vsel %vm4366_vm13, 1.0, %v7237_v36  ;;  %v8915_v61 = vpop.permute.xlu0 %3998  ;;  %v5886_v22 = vsel %vm4001_vm2, 1.0, %v7237_v36  ;;  %v7033_v41 = vld [vmem:[#allocation5 + $0x798] sm:$0xff]  }
 0x783   : > { %v4012_v46 = vpack.c.bf16 %v5886_v22, %v5885_v45  ;;  %vm4003_vm8 = vcmp.eq.s32.totalorder %v7571_v31, %v8915_v61 }
 0x784   : > { %v3477_v25 = vpop.permute.xlu1 %3476  ;;  %v5888_v45 = vsel %vm4003_vm8, 1.0, %v7237_v36 }
 0x785   : > { %v3492_v23 = vsel %vm355_vm14, %v3439_v53, %v3477_v25  ;;  %v7034_v25 = vld [vmem:[#allocation5 + $0x7e0] sm:$0xff]  }
 0x786   : > { %3662 = vmatprep.mubr.bf16.mxu0 %v3492_v23  ;;  %4728 = vrot.lane.b32.xlu1 %v4717_v7, %s7238_s23  ;;  %v7022_v7 = vld [vmem:[#allocation5 + $0x768] sm:$0xff]   ;;  %v7035_v23 = vld [vmem:[#allocation5 + $0x7a0] sm:$0xff]  }
 0x787   : > { %3663 = vmatmul.mubr.bf16.gmra.mrb[44].mxu0 %v3484_v55  ;;  %v8923_v60 = vpop.permute.xlu0 %4308  ;;  %v7026_v55 = vld [vmem:[#allocation5 + $0x770] sm:$0xff]  }
 0x788   : > { %v4355_v37 = vpop.permute.xlu1 %4354  ;;  %4280 = vmatprep.mubr.bf16.mxu0 %v4114_v30  ;;  %vm4315_vm12 = vcmp.eq.s32.totalorder %v7571_v31, %v8923_v60 }
 0x789   : > { %vm4365_vm15 = vcmp.eq.s32.totalorder %v7571_v31, %v4355_v37  ;;  %v7037_v37 = vld [vmem:[#allocation5 + $0x7a8] sm:$0xff]  }
 0x78a   : > { %5041 = vrot.lane.b32.xlu1 %v5030_v4, %s7238_s23  ;;  %v5925_v52 = vsel %vm4365_vm15, 1.0, %v7237_v36  ;;  %v7027_v4 = vld [vmem:[#allocation5 + $0x730] sm:$0xff]  }
 0x78b   : > { %v4377_v54 = vpack.c.bf16 %v5926_v10, %v5925_v52  ;;  %v7031_v52 = vld [vmem:[#allocation5 + $0x738] sm:$0xff]  }
 0x78c   : > { %v8930_v1 = vpop.permute.xlu0 %4670 }
 0x78d   : > { %v4303_v3 = vpop.permute.xlu1 %4302  ;;  %v4427_v56 = vsel %vm355_vm14, %v4377_v54, %v4414_v40  ;;  %v7041_v54 = vld [vmem:[#allocation5 + $0x7b8] sm:$0xff]   ;;  %vm4679_vm15 = vcmp.eq.s32.totalorder %v7571_v31, %v8930_v1 }
 0x78e   : > { %vm4313_vm5 = vcmp.eq.s32.totalorder %v7571_v31, %v4303_v3  ;;  %v7038_v3 = vld [vmem:[#allocation5 + $0x7f0] sm:$0xff]  }
 0x78f   : > { %v5917_v12 = vsel %vm4313_vm5, 1.0, %v7237_v36 }
 0x790   : > { %v4103_v48 = vpop.permute.xlu0 %4102 }
 0x791   : > { %v4306_v16 = vpop.permute.xlu1 %4305 }
 0x792   : > { %vm4314_vm4 = vcmp.eq.s32.totalorder %v7571_v31, %v4306_v16  ;;  %v7042_v16 = vld [vmem:[#allocation5 + $0x800] sm:$0xff]  }
 0x793   : > { %v5918_v34 = vsel %vm4314_vm4, 1.0, %v7237_v36 }
 0x794   : > { %v4325_v63 = vpack.c.bf16 %v5918_v34, %v5917_v12  ;;  %v5919_v12 = vsel %vm4315_vm12, 1.0, %v7237_v36 }
 0x795   : > { %v3784_v43 = vpop.permute.xlu1 %3783 }
 0x796   : > { %v3797_v15 = vsel %vm355_vm14, %v3700_v18, %v3784_v43 }
 0x797   : > { %3976 = vmatmul.mubr.bf16.gmra.mrb[44].mxu1 %v3797_v15 }
 0x798   : > { %4593 = vmatprep.mubr.bf16.mxu1 %v4427_v56 }
 0x799   : > { %v4095_v57 = vpop.permute.xlu1 %4094 }
 0x79a   : > { %v4106_v32 = vsel %vm355_vm14, %v4012_v46, %v4095_v57 }
 0x79b   : > { %4281 = vmatmul.mubr.bf16.vlgmr.msra.gmra.mrb[48].mxu0 %v4106_v32 }
 0x79c   : > { %6428 = vmatpush3.bf16.msra.mxu0 %v7011_v6 }
 0x79d   : > { %v4408_v39 = vpop.permute.xlu1 %4407  ;;  %6429 = vmatprep.subr.bf16.mxu0 %v7012_v19 }
 0x79e   : > { %v4419_v58 = vsel %vm355_vm14, %v4325_v63, %v4408_v39  ;;  %v8952_v39 = vpop.permute.xlu0 %4673 }
 0x79f   : > { %4594 = vmatmul.mubr.bf16.vlgmr.msra.gmra.mrb[48].mxu1 %v4419_v58 }
 0x7a0   : > { %6430 = vmatpush3.bf16.msra.mxu0 %v7013_v62  ;;  %6456 = vmatpush3.bf16.msra.mxu1 %v7021_v38 }
 0x7a1   : > { %v4051_v42 = vpop.permute.xlu1 %4050  ;;  %6431 = vmatprep.subr.bf16.mxu0 %v7014_v8  ;;  %6457 = vmatprep.subr.bf16.mxu1 %v7024_v11 }
 0x7a2   : > { %vm4055_vm7 = vcmp.eq.s32.totalorder %v7571_v31, %v4051_v42 }
 0x7a3   : > { %v5896_v2 = vsel %vm4055_vm7, 1.0, %v7237_v36  ;;  %vm4680_vm7 = vcmp.eq.s32.totalorder %v7571_v31, %v8952_v39 }
 0x7a4   : > { %v4065_v33 = vpack.c.bf16 %v5896_v2, %v5895_v17  ;;  %6432 = vmatpush3.bf16.msra.mxu0 %v7015_v44  ;;  %6458 = vmatpush3.bf16.msra.mxu1 %v7025_v27  ;;  %v4625_v44 = vpop.permute.xlu0 %4624  ;;  %v5958_v27 = vsel %vm4679_vm15, 1.0, %v7237_v36 }
 0x7a5   : > { %6433 = vmatprep.subr.bf16.mxu0 %v7016_v28  ;;  %6459 = vmatprep.subr.bf16.mxu1 %v7028_v13  ;;  %vm4629_vm8 = vcmp.eq.s32.totalorder %v7571_v31, %v4625_v44 }
 0x7a6   : > { %v3996_v53 = vpop.permute.xlu1 %3995  ;;  %v4118_v40 = vsel %vm355_vm14, %v4065_v33, %v4103_v48 }
 0x7a7   : > { %4288 = vmatprep.mubr.bf16.mxu0 %v4118_v40  ;;  %vm4002_vm9 = vcmp.eq.s32.totalorder %v7571_v31, %v3996_v53 }
 0x7a8   : > { %6434 = vmatpush3.bf16.msra.mxu0 %v7017_v35  ;;  %6460 = vmatpush3.bf16.msra.mxu1 %v7029_v59  ;;  %v5887_v43 = vsel %vm4002_vm9, 1.0, %v7237_v36  ;;  %v4981_v28 = vpop.permute.xlu0 %4980 }
 0x7a9   : > { %6435 = vmatprep.subr.bf16.mxu0 %v7018_v9  ;;  %6461 = vmatprep.subr.bf16.mxu1 %v7032_v26  ;;  %v4013_v56 = vpack.c.bf16 %v5888_v45, %v5887_v43  ;;  %v7043_v26 = vld [vmem:[#allocation5 + $0x808] sm:$0xff]   ;;  %vm4991_vm3 = vcmp.eq.s32.totalorder %v7571_v31, %v4981_v28 }
 0x7ab   : > { %v4361_v0 = vpop.permute.xlu1 %4360 }
 0x7ac   : > { %6436 = vmatpush3.bf16.msra.mxu0 %v7019_v49  ;;  %6462 = vmatpush3.bf16.msra.mxu1 %v7033_v41  ;;  %vm4367_vm11 = vcmp.eq.s32.totalorder %v7571_v31, %v4361_v0  ;;  %v4987_v48 = vpop.permute.xlu0 %4986  ;;  %v7044_v49 = vld [vmem:[#allocation5 + $0x810] sm:$0xff]  }
 0x7ad   : > { %6437 = vmatprep.subr.bf16.mxu0 %v7022_v7  ;;  %6463 = vmatprep.subr.bf16.mxu1 %v7034_v25  ;;  %v5927_v19 = vsel %vm4367_vm11, 1.0, %v7237_v36  ;;  %v7045_v7 = vld [vmem:[#allocation5 + $0x818] sm:$0xff]   ;;  %v5989_v25 = vsel %vm4991_vm3, 1.0, %v7237_v36 }
 0x7af   : > { %v4364_v30 = vpop.permute.xlu1 %4363 }
 0x7b0   : > { %6438 = vmatpush3.bf16.msra.mxu0 %v7023_v24  ;;  %6464 = vmatpush3.bf16.msra.mxu1 %v7035_v23  ;;  %vm4368_vm10 = vcmp.eq.s32.totalorder %v7571_v31, %v4364_v30  ;;  %v4932_v41 = vpop.permute.xlu0 %4931 }
 0x7b1   : > { %6439 = vmatprep.subr.bf16.mxu0 %v7026_v55  ;;  %6465 = vmatprep.subr.bf16.mxu1 %v7036_v51  ;;  %v5928_v57 = vsel %vm4368_vm10, 1.0, %v7237_v36  ;;  %vm4940_vm5 = vcmp.eq.s32.totalorder %v7571_v31, %v4932_v41 }
 0x7b2   : > { %v4378_v32 = vpack.c.bf16 %v5928_v57, %v5927_v19  ;;  %v5982_v51 = vsel %vm4940_vm5, 1.0, %v7237_v36 }
 0x7b4   : > { %v4312_v10 = vpop.permute.xlu1 %4311  ;;  %6440 = vmatpush3.bf16.msra.mxu0 %v7027_v4  ;;  %6466 = vmatpush3.bf16.msra.mxu1 %v7037_v37  ;;  %v4938_v23 = vpop.permute.xlu0 %4937 }
 0x7b5   : > { %6441 = vmatprep.subr.bf16.mxu0 %v7030_v50  ;;  %6467 = vmatprep.subr.bf16.mxu1 %v7038_v3  ;;  %vm4316_vm13 = vcmp.eq.s32.totalorder %v7571_v31, %v4312_v10  ;;  %vm4942_vm11 = vcmp.eq.s32.totalorder %v7571_v31, %v4938_v23 }
 0x7b6   : > { %v5920_v63 = vsel %vm4316_vm13, 1.0, %v7237_v36  ;;  %v5984_v43 = vsel %vm4942_vm11, 1.0, %v7237_v36 }
 0x7b7   : > { %v4326_v8 = vpack.c.bf16 %v5920_v63, %v5919_v12 }
 0x7b8   : > { %6442 = vmatpush3.bf16.msra.mxu0 %v7031_v52  ;;  %6468 = vmatpush3.bf16.msra.mxu1 %v7039_v29  ;;  %v5242_v10 = vpop.permute.xlu0 %5241 }
 0x7b9   : > { %v4668_v18 = vpop.permute.xlu1 %4667  ;;  %6469 = vmatprep.subr.bf16.mxu1 %v7040_v20  ;;  %6489 = vmatprep.subr.bf16.mxu0 %v7042_v16  ;;  %v5959_v20 = vsel %vm4680_vm7, 1.0, %v7237_v36  ;;  %vm5252_vm12 = vcmp.eq.s32.totalorder %v7571_v31, %v5242_v10 }
 0x7ba   : > { %vm4678_vm0 = vcmp.eq.s32.totalorder %v7571_v31, %v4668_v18 }
 0x7bb   : > { %v5957_v17 = vsel %vm4678_vm0, 1.0, %v7237_v36  ;;  %vm4993_vm0 = vcmp.eq.s32.totalorder %v7571_v31, %v4987_v48 }
 0x7bc   : > { %6470 = vmatpush3.bf16.msra.mxu1 %v7041_v54  ;;  %v4690_v13 = vpack.c.bf16 %v5958_v27, %v5957_v17  ;;  %v5251_v54 = vpop.permute.xlu0 %5250  ;;  %v5991_v57 = vsel %vm4993_vm0, 1.0, %v7237_v36 }
 0x7bd   : > { %vm5255_vm3 = vcmp.eq.s32.totalorder %v7571_v31, %v5251_v54 }
 0x7be   : > { %v4616_v22 = vpop.permute.xlu1 %4615  ;;  %v6016_v27 = vsel %vm5255_vm3, 1.0, %v7237_v36 }
 0x7bf   : > { %vm4626_vm2 = vcmp.eq.s32.totalorder %v7571_v31, %v4616_v22 }
 0x7c0   : > { %v5949_v1 = vsel %vm4626_vm2, 1.0, %v7237_v36 }
 0x7c2   : > { %v4619_v15 = vpop.permute.xlu1 %4618 }
 0x7c3   : > { %vm4627_vm1 = vcmp.eq.s32.totalorder %v7571_v31, %v4619_v15 }
 0x7c4   : > { %v5950_v2 = vsel %vm4627_vm1, 1.0, %v7237_v36 }
 0x7c5   : > { %v4638_v59 = vpack.c.bf16 %v5950_v2, %v5949_v1 }
 0x7c6   : > { %v4097_v46 = vpop.permute.xlu1 %4096 }
 0x7c7   : > { %v4110_v6 = vsel %vm355_vm14, %v4013_v56, %v4097_v46  ;;  %v6013_v56 = vsel %vm5252_vm12, 1.0, %v7237_v36 }
 0x7c8   : > { %4289 = vmatmul.mubr.bf16.gmra.mrb[52].mxu0 %v4110_v6 }
 0x7ca   : > { %v4984_v34 = vpop.permute.xlu1 %4983 }
 0x7cb   : > { %vm4992_vm4 = vcmp.eq.s32.totalorder %v7571_v31, %v4984_v34 }
 0x7cc   : > { %v5990_v0 = vsel %vm4992_vm4, 1.0, %v7237_v36 }
 0x7cd   : > { %v5003_v55 = vpack.c.bf16 %v5990_v0, %v5989_v25 }
 0x7cf   : > { %v4929_v61 = vpop.permute.xlu1 %4928 }
 0x7d0   : > { %vm4939_vm6 = vcmp.eq.s32.totalorder %v7571_v31, %v4929_v61 }
 0x7d1   : > { %v5981_v30 = vsel %vm4939_vm6, 1.0, %v7237_v36 }
 0x7d2   : > { %v4951_v50 = vpack.c.bf16 %v5982_v51, %v5981_v30 }
 0x7d3   : > { %v4416_v62 = vpop.permute.xlu1 %4415 }
 0x7d4   : > { %v4431_v38 = vsel %vm355_vm14, %v4378_v32, %v4416_v62  ;;  %v4723_v32 = vpop.permute.xlu0 %4722 }
 0x7d5   : > { %4601 = vmatprep.mubr.bf16.mxu1 %v4431_v38 }
 0x7d7   : > { %v4410_v11 = vpop.permute.xlu1 %4409 }
 0x7d8   : > { %v4423_v58 = vsel %vm355_vm14, %v4326_v8, %v4410_v11  ;;  %v5036_v11 = vpop.permute.xlu0 %5035 }
 0x7d9   : > { %4602 = vmatmul.mubr.bf16.gmra.mrb[52].mxu1 %v4423_v58 }
 0x7db   : > { %v8955_v60 = vpop.permute.xlu1 %4676 }
 0x7dc   : > { %vm4681_vm10 = vcmp.eq.s32.totalorder %v7571_v31, %v8955_v60 }
 0x7dd   : > { %v5960_v22 = vsel %vm4681_vm10, 1.0, %v7237_v36 }
 0x7de   : > { %v4691_v46 = vpack.c.bf16 %v5960_v22, %v5959_v20 }
 0x7e0   : > { %v4622_v42 = vpop.permute.xlu1 %4621 }
 0x7e1   : > { %vm4628_vm9 = vcmp.eq.s32.totalorder %v7571_v31, %v4622_v42 }
 0x7e2   : > { %v5951_v18 = vsel %vm4628_vm9, 1.0, %v7237_v36 }
 0x7e4   : > { %v4727_v33 = vpop.permute.xlu1 %4726 }
 0x7e5   : > { %v4740_v35 = vsel %vm355_vm14, %v4690_v13, %v4727_v33 }
 0x7e6   : > { %4906 = vmatprep.mubr.bf16.mxu0 %v4740_v35 }
 0x7e8   : > { %v4721_v9 = vpop.permute.xlu1 %4720 }
 0x7e9   : > { %v4732_v53 = vsel %vm355_vm14, %v4638_v59, %v4721_v9 }
 0x7ea   : > { %4907 = vmatmul.mubr.bf16.vlgmr.msra.gmra.mrb[56].mxu0 %v4732_v53 }
 0x7eb   : > { %6490 = vmatpush3.bf16.msra.mxu0 %v7042_v16  ;;  %v5952_v16 = vsel %vm4629_vm8, 1.0, %v7237_v36 }
 0x7ec   : > { %v4990_v40 = vpop.permute.xlu1 %4989  ;;  %6491 = vmatprep.subr.bf16.mxu0 %v7043_v26  ;;  %v4639_v15 = vpack.c.bf16 %v5952_v16, %v5951_v18 }
 0x7ed   : > { %vm4994_vm1 = vcmp.eq.s32.totalorder %v7571_v31, %v4990_v40 }
 0x7ee   : > { %v5992_v61 = vsel %vm4994_vm1, 1.0, %v7237_v36  ;;  %v4736_v38 = vsel %vm355_vm14, %v4639_v15, %v4723_v32 }
 0x7ef   : > { %6492 = vmatpush3.bf16.msra.mxu0 %v7043_v26  ;;  %v5004_v39 = vpack.c.bf16 %v5992_v61, %v5991_v57 }
 0x7f0   : > { %6493 = vmatprep.subr.bf16.mxu0 %v7044_v49 }
 0x7f1   : > { %v4935_v24 = vpop.permute.xlu1 %4934 }
 0x7f2   : > { %vm4941_vm13 = vcmp.eq.s32.totalorder %v7571_v31, %v4935_v24 }
 0x7f3   : > { %6494 = vmatpush3.bf16.msra.mxu0 %v7044_v49  ;;  %v5983_v6 = vsel %vm4941_vm13, 1.0, %v7237_v36 }
 0x7f4   : > { %6495 = vmatprep.subr.bf16.mxu0 %v7045_v7  ;;  %v4952_v63 = vpack.c.bf16 %v5984_v43, %v5983_v6 }
 0x7f5   : > { %v5040_v4 = vpop.permute.xlu1 %5039 }
 0x7f6   : > { %v5053_v37 = vsel %vm355_vm14, %v5003_v55, %v5040_v4  ;;  %v5049_v44 = vsel %vm355_vm14, %v4952_v63, %v5036_v11 }
 0x7f7   : > { %5219 = vmatprep.mubr.bf16.mxu1 %v5053_v37  ;;  %6496 = vmatpush3.bf16.msra.mxu0 %v7045_v7 }
 0x7f9   : > { %v5034_v3 = vpop.permute.xlu1 %5033 }
 0x7fa   : > { %v5045_v52 = vsel %vm355_vm14, %v4951_v50, %v5034_v3 }
 0x7fb   : > { %5220 = vmatmul.mubr.bf16.vlgmr.msra.gmra.mrb[56].mxu1 %v5045_v52 }
 0x7fd   : > { %v5245_v29 = vpop.permute.xlu1 %5244 }
 0x7fe   : > { %vm5253_vm15 = vcmp.eq.s32.totalorder %v7571_v31, %v5245_v29 }
 0x7ff   : > { %v6014_v34 = vsel %vm5253_vm15, 1.0, %v7237_v36 }
 0x800   : > { %v5264_v62 = vpack.c.bf16 %v6014_v34, %v6013_v56 }
 0x801   : > { %v5248_v45 = vpop.permute.xlu1 %5247 }
 0x802   : > { %vm5254_vm2 = vcmp.eq.s32.totalorder %v7571_v31, %v5248_v45 }
 0x803   : > { %v6015_v60 = vsel %vm5254_vm2, 1.0, %v7237_v36 }
 0x804   : > { %v5265_v17 = vpack.c.bf16 %v6016_v27, %v6015_v60 }
 0x805   : > { %v4729_v19 = vpop.permute.xlu1 %4728 }
 0x806   : > { %v4744_v12 = vsel %vm355_vm14, %v4691_v46, %v4729_v19 }
 0x807   : > { %4914 = vmatprep.mubr.bf16.mxu0 %v4744_v12 }
 0x808   : > { %4915 = vmatmul.mubr.bf16.gmra.mrb[60].mxu0 %v4736_v38 }
 0x809   : > { %v5042_v8 = vpop.permute.xlu1 %5041  ;;  %6497 = vmatprep.mubr.msk.bf16.mxu0 %vm355_vm14, %v5264_v62 }
 0x80a   : > { %v5057_v58 = vsel %vm355_vm14, %v5004_v39, %v5042_v8 }
 0x80b   : > { %5227 = vmatprep.mubr.bf16.mxu1 %v5057_v58 }
 0x80c   : > { %5228 = vmatmul.mubr.bf16.gmra.mrb[60].mxu1 %v5049_v44 }
 0x810   : > { %6498 = vmatmul.mubr.msk.bf16.vlgmr.msra.gmra.mrb[64].mxu0 %vm355_vm14, %v5265_v17 }
 0x81a   : > { %v6331_v42 = vpop.f32.mrb[40].mxu0 }
 0x81b   : > { %v6332_v28 = vpop.f32.mrb[41].mxu0 }
 0x81c   : > { %v6333_v13 = vadd.f32 %v6332_v28, %v6331_v42  ;;  %v6334_v2 = vpop.f32.mrb[42].mxu0 }
 0x81d   : > { %v6335_v33 = vpop.f32.mrb[43].mxu0 }
 0x81e   : > { %v3671_v31 = vadd.f32 %v6333_v13, %v8838_v21  ;;  %v6336_v35 = vadd.f32 %v6335_v33, %v6334_v2 }
 0x820   : > { %v3672_v1 = vadd.f32 %v6336_v35, %v8844_v47 }
 0x82b   : > { %v6359_v59 = vpop.f32.mrb[40].mxu1 }
 0x82c   : > { %v6360_v48 = vpop.f32.mrb[41].mxu1 }
 0x82d   : > { %v6361_v9 = vadd.f32 %v6360_v48, %v6359_v59  ;;  %v6362_v26 = vpop.f32.mrb[42].mxu1 }
 0x82e   : > { %v6363_v53 = vpop.f32.mrb[43].mxu1 }
 0x82f   : > { %v3984_v40 = vadd.f32 %v6361_v9, %v3671_v31  ;;  %v6364_v36 = vadd.f32 %v6363_v53, %v6362_v26 }
 0x831   : > { %v3985_v49 = vadd.f32 %v6364_v36, %v3672_v1 }
 0x85a   : > { %v6337_v41 = vpop.f32.mrb[44].mxu0 }
 0x85b   : > { %v6338_v7 = vpop.f32.mrb[45].mxu0 }
 0x85c   : > { %v6339_v25 = vadd.f32 %v6338_v7, %v6337_v41  ;;  %v6340_v0 = vpop.f32.mrb[46].mxu0 }
 0x85d   : > { %v6341_v24 = vpop.f32.mrb[47].mxu0 }
 0x85e   : > { %v3673_v23 = vadd.f32 %v6339_v25, %v8859_v5  ;;  %v6342_v55 = vadd.f32 %v6341_v24, %v6340_v0 }
 0x860   : > { %v3674_v21 = vadd.f32 %v6342_v55, %v8863_v14 }
 0x86a   : > { %v6365_v51 = vpop.f32.mrb[44].mxu1 }
 0x86b   : > { %v6366_v47 = vpop.f32.mrb[45].mxu1 }
 0x86c   : > { %v6367_v30 = vadd.f32 %v6366_v47, %v6365_v51  ;;  %v6368_v4 = vpop.f32.mrb[46].mxu1 }
 0x86d   : > { %v6369_v37 = vpop.f32.mrb[47].mxu1 }
 0x86e   : > { %v3986_v50 = vadd.f32 %v6367_v30, %v3673_v23  ;;  %v6370_v3 = vadd.f32 %v6369_v37, %v6368_v4  ;;  %v6387_v10 = vpop.f32.mrb[48].mxu0 }
 0x86f   : > { %v6388_v52 = vpop.f32.mrb[49].mxu0 }
 0x870   : > { %v3987_v29 = vadd.f32 %v6370_v3, %v3674_v21  ;;  %v6389_v20 = vadd.f32 %v6388_v52, %v6387_v10  ;;  %v6390_v16 = vpop.f32.mrb[50].mxu0  ;;  %v6023_v52 = vld [vmem:[#allocation7] ss:$0 sm:$0xff] }
 0x871   : > { %v6391_v54 = vpop.f32.mrb[51].mxu0 }
 0x872   : > { %v4297_v18 = vadd.f32 %v6389_v20, %v3984_v40  ;;  %v6392_v22 = vadd.f32 %v6391_v54, %v6390_v16  ;;  %v6415_v45 = vpop.f32.mrb[48].mxu1 }
 0x873   : > { %v6416_v5 = vpop.f32.mrb[49].mxu1 }
 0x874   : > { %v4298_v43 = vadd.f32 %v6392_v22, %v3985_v49  ;;  %v6417_v15 = vadd.f32 %v6416_v5, %v6415_v45  ;;  %v6418_v14 = vpop.f32.mrb[50].mxu1 }
 0x875   : > { %v6419_v56 = vpop.f32.mrb[51].mxu1 }
 0x876   : > { %v4610_v46 = vadd.f32 %v6417_v15, %v4297_v18  ;;  %v6420_v6 = vadd.f32 %v6419_v56, %v6418_v14 }
 0x878   : > { %v4611_v34 = vadd.f32 %v6420_v6, %v4298_v43 }
 0x89b   : > { %v6393_v57 = vpop.f32.mrb[52].mxu0 }
 0x89c   : > { %v6394_v61 = vpop.f32.mrb[53].mxu0 }
 0x89d   : > { %v6395_v19 = vadd.f32 %v6394_v61, %v6393_v57  ;;  %v6396_v32 = vpop.f32.mrb[54].mxu0 }
 0x89e   : > { %v6397_v12 = vpop.f32.mrb[55].mxu0 }
 0x89f   : > { %v4299_v63 = vadd.f32 %v6395_v19, %v3986_v50  ;;  %v6398_v62 = vadd.f32 %v6397_v12, %v6396_v32 }
 0x8a1   : > { %v4300_v38 = vadd.f32 %v6398_v62, %v3987_v29 }
 0x8ac   : > { %v6421_v39 = vpop.f32.mrb[52].mxu1 }
 0x8ad   : > { %v6422_v8 = vpop.f32.mrb[53].mxu1 }
 0x8ae   : > { %v6423_v11 = vadd.f32 %v6422_v8, %v6421_v39  ;;  %v6424_v58 = vpop.f32.mrb[54].mxu1 }
 0x8af   : > { %v6425_v60 = vpop.f32.mrb[55].mxu1 }
 0x8b0   : > { %v4612_v44 = vadd.f32 %v6423_v11, %v4299_v63  ;;  %v6426_v27 = vadd.f32 %v6425_v60, %v6424_v58 }
 0x8b2   : > { %v4613_v17 = vadd.f32 %v6426_v27, %v4300_v38 }
 0x8bd   : > { %v6443_v42 = vpop.f32.mrb[56].mxu0 }
 0x8be   : > { %v6444_v28 = vpop.f32.mrb[57].mxu0 }
 0x8bf   : > { %v6445_v13 = vadd.f32 %v6444_v28, %v6443_v42  ;;  %v6446_v2 = vpop.f32.mrb[58].mxu0 }
 0x8c0   : > { %v6447_v33 = vpop.f32.mrb[59].mxu0 }
 0x8c1   : > { %v4923_v31 = vadd.f32 %v6445_v13, %v4610_v46  ;;  %v6448_v35 = vadd.f32 %v6447_v33, %v6446_v2 }
 0x8c3   : > { %v4924_v1 = vadd.f32 %v6448_v35, %v4611_v34 }
 0x8ce   : > { %v6471_v59 = vpop.f32.mrb[56].mxu1 }
 0x8cf   : > { %v6472_v48 = vpop.f32.mrb[57].mxu1 }
 0x8d0   : > { %v6473_v9 = vadd.f32 %v6472_v48, %v6471_v59  ;;  %v6474_v26 = vpop.f32.mrb[58].mxu1 }
 0x8d1   : > { %v6475_v53 = vpop.f32.mrb[59].mxu1 }
 0x8d2   : > { %v6476_v40 = vadd.f32 %v6475_v53, %v6474_v26  ;;  %v5236_v36 = vadd.f32 %v6473_v9, %v4923_v31 }
 0x8d4   : > { %v5237_v49 = vadd.f32 %v6476_v40, %v4924_v1 }
 0x8db   : > { %v6449_v41 = vpop.f32.mrb[60].mxu0 }
 0x8dc   : > { %v6450_v7 = vpop.f32.mrb[61].mxu0 }
 0x8dd   : > { %v6451_v25 = vadd.f32 %v6450_v7, %v6449_v41  ;;  %v6452_v0 = vpop.f32.mrb[62].mxu0 }
 0x8de   : > { %v6453_v24 = vpop.f32.mrb[63].mxu0 }
 0x8df   : > { %v4925_v23 = vadd.f32 %v6451_v25, %v4612_v44  ;;  %v6454_v55 = vadd.f32 %v6453_v24, %v6452_v0  ;;  %v6477_v21 = vpop.f32.mrb[60].mxu1 }
 0x8e0   : > { %v6478_v51 = vpop.f32.mrb[61].mxu1 }
 0x8e1   : > { %v4926_v47 = vadd.f32 %v6454_v55, %v4613_v17  ;;  %v6479_v30 = vadd.f32 %v6478_v51, %v6477_v21  ;;  %v6480_v4 = vpop.f32.mrb[62].mxu1 }
 0x8e2   : > { %v6481_v37 = vpop.f32.mrb[63].mxu1 }
 0x8e3   : > { %v6482_v50 = vadd.f32 %v6481_v37, %v6480_v4  ;;  %v5238_v3 = vadd.f32 %v6479_v30, %v4925_v23  ;;  %v6499_v10 = vpop.f32.mrb[64].mxu0 }
 0x8e4   : > { %v5338_v29 = vpop.f32.mrb[65].mxu0 }
 0x8e5   : > { %v5355_v20 = vadd.f32 %v6499_v10, %v5238_v3  ;;  %v5353_v16 = vadd.f32 %v5338_v29, %v5236_v36  ;;  %v5239_v54 = vadd.f32 %v6482_v50, %v4926_v47  ;;  %v6500_v18 = vpop.f32.mrb[66].mxu0  ;;  %5379 = sbr.rel (!%p9096_p9) target bundleno = 2312 (0x908), region = 48 }
 0x8e6   : > { %v5341_v22 = vpop.f32.mrb[67].mxu0 }
 0x8e7   : > { %v5366_v45 = vadd.f32 %v6023_v52, %v5355_v20  ;;  %v5364_v5 = vadd.f32 %v6023_v52, %v5353_v16  ;;  %v5356_v43 = vadd.f32 %v6500_v18, %v5239_v54  ;;  %v5354_v15 = vadd.f32 %v5341_v22, %v5237_v49 }
 0x8e9   : > { %5370 = vst [vmem:[%s221_s26 + $0x10] sm:$0xff] %v5366_v45  ;;  %5368 = vst [vmem:[%s221_s26] sm:$0xff] %v5364_v5  ;;  %v5367_v14 = vadd.f32 %v6023_v52, %v5356_v43  ;;  %v5365_v56 = vadd.f32 %v6023_v52, %v5354_v15 }
 0x8eb   : > { %5371 = vst [vmem:[%s221_s26 + $0x18] sm:$0xff] %v5367_v14  ;;  %5369 = vst [vmem:[%s221_s26 + $0x8] sm:$0xff] %v5365_v56 }
 0x8ec   : > { %s9105_s11 = smov (!%p5382_p10, %s5381_s11), 4 }
 0x8ed   : > { %s9020_s28 = sshll.u32 %s9105_s11, 7 }
 0x8ee   : > { %s5386_s30 = ssub.s32 512, %s9020_s28 }
 0x8ef   : > { %5387 = vsyncadd %s5373_s29, %s5386_s30  ;;  %p6027_p1 = scmp.ne.s32.totalorder %s9020_s28, 0  ;;  %s6034_s5 = sshll.u32 %s7335_s16, 9 }
 0x8f0   : > { %s9030_s4 = scalar_lea.hbm %s9081_s3, %s6034_s5  ;;  %s5392_s8 = sshll.u32 %s221_s26, 4  ;;  %s9032_s8 = int_to_ptr.vmem [resolvable:$true] %s5392_s8 }
 0x8f1   : > { %s7145_s22 = scalar_lea.vmem %s9032_s8, %s9020_s28  ;;  %s7291_s9 = smov [#allocation8]  }
 0x8f2   : > { %p7146_p3 = scmp.ne.s32.totalorder %s9032_s8, %s7145_s22  ;;  %s7149_s10 = sshll.u32 %s7291_s9, 4  ;;  %s7150_s10 = int_to_ptr.vmem [resolvable:$false] %s7149_s10 }
 0x8f3   : > { %s7151_s16 = scalar_lea.vmem %s7150_s10, 1024  ;;  %p7152_p11 = scmp.lt.s32.totalorder %s9032_s8, %s7150_s10 }
 0x8f4   : > { %p7147_p5 = pnand %p7146_p3, %p6027_p1  ;;  %p7153_p13 = scmp.lt.s32.totalorder %s7151_s16, %s7145_s22 }
 0x8f6   : > { %p7148_p6 = pneg %p7147_p5  ;;  %p7154_p0 = por %p7153_p13, %p7152_p11 }
 0x8f8   : > { %p7155_p12 = pnand %p7154_p0, %p7148_p6 }
 0x8fa   : > { %7158 = shalt.err (!%p7155_p12)
}
 0x8fb   : > { %s7159_s19 = scalar_lea.hbm %s9030_s4, %s9020_s28  ;;  %s7163_s23 = scalar_lea.hbm %s9081_s3, 640 }
 0x8fc   : > { %p7160_p7 = scmp.ne.s32.totalorder %s9030_s4, %s7159_s19  ;;  %p7164_p9 = scmp.lt.u32.totalorder %s9030_s4, %s9081_s3 }
 0x8fd   : > { %p7165_p10 = scmp.lt.u32.totalorder %s7163_s23, %s7159_s19  ;;  %p7167_p5 = scmp.lt.u32.totalorder %s7159_s19, %s9030_s4 }
 0x8fe   : > { %p7161_p2 = pnand %p7160_p7, %p6027_p1 }
 0x8ff   : > { %p7166_p3 = por %p7165_p10, %p7164_p9 }
 0x900   : > { %p7162_p8 = pneg %p7161_p2 }
 0x901   : > { %p7168_p6 = por %p7167_p5, %p7166_p3 }
 0x903   : > { %p7169_p11 = pnand %p7168_p6, %p7162_p8 }
 0x905   : > { %7172 = shalt.err (!%p7169_p11)
}
 0x906   : > { %s7292_s11 = smov 128   ;;  %s7293_s30 = smov 8  }
 0x907   : > { %5398 = dma.vmem_to_hbm [thread:$0]  (%p6027_p1), %s9032_s8, %s9020_s28, %s9030_s4, %s5373_s29, %s7292_s11, %s7292_s11, %s7293_s30  }
 0x908 PF: > { %s5407_s5 = sand.u32 1, %s7203_s12   ;;  %p9097_p13 = scmp.ne.s32.totalorder %s9088_s25, 0 }
 0x909   : > { %s5408_s24 = scalar_lea.sflag [#allocation4], %s5407_s5 }
 0x90a   : > { %p6519_p0 = pnand %p5488_p4, %p9097_p13 }
 0x90c   : > { %7198 = dma.done.wait (!%p6519_p0), %s5408_s24, 512  }
 0x90d   : > { %7200 = vsyncadd (!%p6519_p0), %s5408_s24, 4294966784  ;;  %p17_p12 = scmp.ge.s32.totalorder %s7339_s18, 4   ;;  %s9098_s12 = smov %s7207_s13 }
 0x90e   : > { %s9099_s13 = smov %s7211_s14  ;;  %s9100_s14 = smov %s7351_s21 }
 0x90f   : > { %s9101_s15 = smov %s7339_s18  ;;  %19 = sbr.rel (!%p17_p12) target bundleno = 6 (0x6), region = 85 }
 0x916   :  { %5413 = vsyncpa [#allocation3], 1 }
 0x917   :  { %5415 = vsyncpa [#allocation3 + $0x1], 1 }
 0x918   :  { %5416 = vsyncpa [#allocation6], 1 }
 0x919   :  { %5417 = vsyncpa [#allocation4], 1 }
 0x91a   :  { %5419 = vsyncpa [#allocation4 + $0x1], 1 }

</bundles_post_ra>
